<compile_context>
chip_gen: v7x
topology: tpu7x:2x2x1
jax: 0.10.0
libtpu: 0.0.40
codegen_flags: <defaults>
</compile_context>

<pallas_src>
import functools
import numpy as np
import jax
import jax.numpy as jnp
from jax import lax
from jax.experimental import pallas as pl
from jax.experimental.pallas import tpu as pltpu

# ------------------------- small configuration ------------------------------
B = 2                         # batch size
IN_CH = 3                     # image channels
IMG = 32                      # image resolution (384 in full model)
PATCH = 16                    # ViT patch size
N_PATCH = (IMG // PATCH) ** 2            # 4
N_TOK = N_PATCH + 1                      # 5 = cls + patches
VIT_DIM = 64                  # ViT width (768 in full model)
VIT_DEPTH = 2                 # ViT depth (12 in full model)
VIT_HEADS = 4
VIT_MLP = VIT_DIM * 4
ENC_W = 64                    # encoder_width (512 in full model)
NUM_CLASS = 8                 # tag classes (4585 in full model)
DES_PER_CLASS = 3             # descriptions per class (51 in full model)
HID = 128                     # q2l hidden_size (768 in full model)
Q2L_HEADS = 4
Q2L_LAYERS = 2
Q2L_INTER = HID * 4
N_TEXT = B                    # rows of batch_text_embed
N_QRY = NUM_CLASS + N_TEXT    # merged query sequence length


# ====================== in-kernel math helpers (on values) ===================

def _ln(x, g, b, eps):
    mean = jnp.mean(x, axis=-1, keepdims=True)
    var = jnp.mean((x - mean) * (x - mean), axis=-1, keepdims=True)
    return (x - mean) * lax.rsqrt(var + eps) * g + b


def _gelu(x):  # exact (erf) GELU, matching nn.GELU / BERT gelu
    return 0.5 * x * (1.0 + lax.erf(x * jnp.float32(1.0 / np.sqrt(2.0))))


def _softmax(x):
    x = x - jnp.max(x, axis=-1, keepdims=True)
    p = jnp.exp(x)
    return p * pl.reciprocal(jnp.sum(p, axis=-1, keepdims=True), approx=True)


def _asl_elem(x, y, gamma_neg, gamma_pos, clip, eps=1e-8):
    """Per-element asymmetric-loss term (before the final -sum)."""
    xs_pos = jax.nn.sigmoid(x)
    xs_neg = 1.0 - xs_pos
    if clip is not None and clip > 0:
        xs_neg = jnp.minimum(xs_neg + clip, 1.0)
    los_pos = y * jnp.log(jnp.maximum(xs_pos, eps))
    los_neg = (1.0 - y) * jnp.log(jnp.maximum(xs_neg, eps))
    loss = los_pos + los_neg
    if gamma_neg > 0 or gamma_pos > 0:
        pt = xs_pos * y + xs_neg * (1.0 - y)
        gamma = gamma_pos * y + gamma_neg * (1.0 - y)
        # pow(base, gamma) with clamped positive base
        loss = loss * jnp.exp(gamma * jnp.log(jnp.maximum(1.0 - pt, eps)))
    return loss


def _mh_attention(q_full, k_full, v_full, heads):
    """Multi-head attention on full-width Q/K/V (only the tiny per-head
    score/context dots stay per-head); returns the concatenated context."""
    dh = q_full.shape[-1] // heads
    scale = 1.0 / float(np.sqrt(dh))
    ctxs = []
    for hh in range(heads):
        qh = q_full[:, hh * dh:(hh + 1) * dh].astype(jnp.bfloat16)
        kh = k_full[:, hh * dh:(hh + 1) * dh].astype(jnp.bfloat16)
        vh = v_full[:, hh * dh:(hh + 1) * dh].astype(jnp.bfloat16)
        s = lax.dot_general(qh, kh, (((1,), (1,)), ((), ())),
                            preferred_element_type=jnp.float32) * scale
        p = _softmax(s)
        ctxs.append(jnp.dot(p.astype(jnp.bfloat16), vh,
                            preferred_element_type=jnp.float32))
    return jnp.concatenate(ctxs, axis=-1)


# ============================== Pallas kernels ===============================

def _vit_kernel(p_ref, pw_ref, pb_ref, cls_ref, pos_ref,
                ln1g_ref, ln1b_ref, qkvw_ref, qkvb_ref, ow_ref, ob_ref,
                ln2g_ref, ln2b_ref, f1w_ref, f1b_ref, f2w_ref, f2b_ref,
                o_ref, *, heads, eps):
    # grid = (batch, layer); output block (b,0,0) is resident across layers.
    @pl.when(pl.program_id(1) == 0)
    def _():  # fused patch-embed + cls token + pos-embed, single full store
        y = jnp.dot(p_ref[0].astype(jnp.bfloat16), pw_ref[...],
                    preferred_element_type=jnp.float32) + pb_ref[...]
        tok = jnp.concatenate([cls_ref[...], y], axis=0) + pos_ref[...]
        o_ref[0] = tok.astype(o_ref.dtype)

    x = o_ref[0]                                                    # (T, D) f32
    d = x.shape[-1]
    h = _ln(x, ln1g_ref[0], ln1b_ref[0], eps)
    qkv = jnp.dot(h.astype(jnp.bfloat16), qkvw_ref[0],
                  preferred_element_type=jnp.float32) + qkvb_ref[0]  # (T, 3D)
    ctx = _mh_attention(qkv[:, :d], qkv[:, d:2 * d], qkv[:, 2 * d:], heads)
    attn = jnp.dot(ctx.astype(jnp.bfloat16), ow_ref[0],
                   preferred_element_type=jnp.float32) + ob_ref[0]
    x = x + attn
    h2 = _ln(x, ln2g_ref[0], ln2b_ref[0], eps)
    m = _gelu(jnp.dot(h2.astype(jnp.bfloat16), f1w_ref[0],
                      preferred_element_type=jnp.float32) + f1b_ref[0])
    x = x + jnp.dot(m.astype(jnp.bfloat16), f2w_ref[0],
                    preferred_element_type=jnp.float32) + f2b_ref[0]
    o_ref[0] = x.astype(o_ref.dtype)


def _post_vit_kernel(scale_ref, x_ref, ng_ref, nb_ref, pw_ref, pb_ref,
                     clip_ref, labt_ref, lab_ref, wvw_ref, wvb_ref, text_ref,
                     emb_ref, qry_ref, l1_ref, *, eps, nclass, des):
    # final ViT LN -> image_proj
    xb = _ln(x_ref[0], ng_ref[...], nb_ref[...], eps)
    eb = jnp.dot(xb.astype(jnp.bfloat16), pw_ref[...],
                 preferred_element_type=jnp.float32) + pb_ref[...]   # (T, E)
    emb_ref[0] = eb.astype(emb_ref.dtype)

    # L1 distillation loss partial (per-image sum; mean taken outside)
    cls = eb[:1, :]                                                  # (1, E)
    l1_ref[0] = jnp.sum(jnp.abs(cls - clip_ref[0]), keepdims=True)

    # CLIP-style description re-weighting, entirely on the MXU.
    cls_n = cls * lax.rsqrt(jnp.sum(cls * cls, axis=-1, keepdims=True))
    scale = jnp.exp(scale_ref[...])                                  # (1, 1)
    logits = scale * jnp.dot(cls_n.astype(jnp.bfloat16), labt_ref[...],
                             preferred_element_type=jnp.float32)     # (1, C*des)
    cd = nclass * des
    m = jnp.max(logits, axis=-1, keepdims=True)   # constant shift within groups
    ex = jnp.exp(logits - m)                                         # (1, CD)
    # per-class softmax denominators via indicator matmuls (no reshape needed)
    rj = lax.broadcasted_iota(jnp.int32, (cd, nclass), 0)
    cc = lax.broadcasted_iota(jnp.int32, (cd, nclass), 1)
    g = jnp.logical_and(rj >= cc * des, rj < (cc + 1) * des).astype(jnp.float32)
    tr = lax.broadcasted_iota(jnp.int32, (nclass, cd), 0)
    tc = lax.broadcasted_iota(jnp.int32, (nclass, cd), 1)
    gt = jnp.logical_and(tc >= tr * des, tc < (tr + 1) * des).astype(jnp.float32)
    denom = jnp.dot(jnp.dot(ex, g, preferred_element_type=jnp.float32), gt,
                    preferred_element_type=jnp.float32)              # (1, CD)
    w = ex / denom                                                   # (1, CD)
    # rew[c] = sum_d w[c,d] * label_embed[c*des+d]  ==  (gt * w) @ label_embed
    rew = jnp.dot((gt * w).astype(jnp.bfloat16), lab_ref[...],
                  preferred_element_type=jnp.float32)                # (C, E)

    # wordvec_proj + ReLU for label queries and (shared) text queries
    lq = jnp.maximum(
        jnp.dot(rew.astype(jnp.bfloat16), wvw_ref[...],
                preferred_element_type=jnp.float32) + wvb_ref[...], 0.0)
    tq = jnp.maximum(
        jnp.dot(text_ref[...].astype(jnp.bfloat16), wvw_ref[...],
                preferred_element_type=jnp.float32) + wvb_ref[...], 0.0)
    qry_ref[0] = jnp.concatenate([lq, tq], axis=0).astype(qry_ref.dtype)


def _q2l_kernel(q0_ref, e_ref,
                qw_ref, qb_ref, kvw_ref, kvb_ref, ow_ref, ob_ref,
                ln1g_ref, ln1b_ref, iw_ref, ib_ref, o2w_ref, o2b_ref,
                ln2g_ref, ln2b_ref, o_ref, *, heads, eps):
    # grid = (batch, layer); query block is resident across layers.
    @pl.when(pl.program_id(1) == 0)
    def _():
        o_ref[...] = q0_ref[...]

    h = o_ref[0]                                                     # (Tq, HID)
    hid = h.shape[-1]
    e = e_ref[0].astype(jnp.bfloat16)                                # (Tk, E)
    q_full = jnp.dot(h.astype(jnp.bfloat16), qw_ref[0],
                     preferred_element_type=jnp.float32) + qb_ref[0]
    kv = jnp.dot(e, kvw_ref[0],
                 preferred_element_type=jnp.float32) + kvb_ref[0]    # (Tk, 2H)
    ctx = _mh_attention(q_full, kv[:, :hid], kv[:, hid:], heads)
    attn = jnp.dot(ctx.astype(jnp.bfloat16), ow_ref[0],
                   preferred_element_type=jnp.float32) + ob_ref[0]
    x1 = _ln(attn + h, ln1g_ref[0], ln1b_ref[0], eps)
    inter = _gelu(jnp.dot(x1.astype(jnp.bfloat16), iw_ref[0],
                          preferred_element_type=jnp.float32) + ib_ref[0])
    out = jnp.dot(inter.astype(jnp.bfloat16), o2w_ref[0],
                  preferred_element_type=jnp.float32) + o2b_ref[0]
    o_ref[0] = _ln(out + x1, ln2g_ref[0], ln2b_ref[0], eps).astype(o_ref.dtype)


def _fc_loss_kernel(h_ref, w_ref, b_ref, tag_ref, lt_ref, la_ref, *, nclass):
    bidx = pl.program_id(0)
    logits = jnp.dot(h_ref[0].astype(jnp.bfloat16), w_ref[...],
                     preferred_element_type=jnp.float32) + b_ref[...]  # (Tq, 1)
    row = lax.broadcasted_iota(jnp.int32, logits.shape, 0)
    is_tag = row < nclass
    y_tag = tag_ref[0]                                    # zero-padded to (Tq,1)
    y_align = ((row - nclass) == bidx).astype(jnp.float32)  # eye over text rows
    lt_elem = _asl_elem(logits, y_tag, 7.0, 0.0, 0.05)
    la_elem = _asl_elem(logits, y_align, 4.0, 0.0, 0.05)
    lt_ref[0] = jnp.sum(jnp.where(is_tag, lt_elem, 0.0), keepdims=True)
    la_ref[0] = jnp.sum(jnp.where(is_tag, 0.0, la_elem), keepdims=True)


# ============================ host-side wrappers =============================

def vit_forward(patches, vp):
    bb, npatch, pd = patches.shape
    d, t, mlp, nlayer = VIT_DIM, N_TOK, VIT_MLP, VIT_DEPTH
    batch3 = lambda b, l: (b, 0, 0)
    shared2 = lambda b, l: (0, 0)
    layer3 = lambda b, l: (l, 0, 0)
    in_specs = [
        pl.BlockSpec((1, npatch, pd), batch3),
        pl.BlockSpec((pd, d), shared2),
        pl.BlockSpec((1, d), shared2),
        pl.BlockSpec((1, d), shared2),
        pl.BlockSpec((t, d), shared2),
        pl.BlockSpec((1, 1, d), layer3), pl.BlockSpec((1, 1, d), layer3),
        pl.BlockSpec((1, d, 3 * d), layer3), pl.BlockSpec((1, 1, 3 * d), layer3),
        pl.BlockSpec((1, d, d), layer3), pl.BlockSpec((1, 1, d), layer3),
        pl.BlockSpec((1, 1, d), layer3), pl.BlockSpec((1, 1, d), layer3),
        pl.BlockSpec((1, d, mlp), layer3), pl.BlockSpec((1, 1, mlp), layer3),
        pl.BlockSpec((1, mlp, d), layer3), pl.BlockSpec((1, 1, d), layer3),
    ]
    return pl.pallas_call(
        functools.partial(_vit_kernel, heads=VIT_HEADS, eps=1e-6),
        grid=(bb, nlayer),
        in_specs=in_specs,
        out_specs=pl.BlockSpec((1, t, d), batch3),
        out_shape=jax.ShapeDtypeStruct((bb, t, d), jnp.float32),
        compiler_params=pltpu.CompilerParams(
            dimension_semantics=("parallel", "arbitrary")),
    )(patches, vp['patch_w'], vp['patch_b'], vp['cls_token'], vp['pos_embed'],
      vp['ln1_g'], vp['ln1_b'], vp['qkvw'], vp['qkvb'],
      vp['projw'], vp['projb'], vp['ln2_g'], vp['ln2_b'],
      vp['fc1w'], vp['fc1b'], vp['fc2w'], vp['fc2b'])


def post_vit(vit_out, params, clip_feature, batch_text_embed):
    bb, t, dv = vit_out.shape
    e, hid = ENC_W, HID
    c, des = NUM_CLASS, DES_PER_CLASS
    cd = c * des
    nt = batch_text_embed.shape[0]
    tq = c + nt
    vp = params['vit']
    clip3 = clip_feature.reshape(bb, 1, e)
    batch3 = lambda b: (b, 0, 0)
    shared2 = lambda b: (0, 0)

    emb, qry, l1 = pl.pallas_call(
        functools.partial(_post_vit_kernel, eps=1e-6, nclass=c, des=des),
        grid=(bb,),
        in_specs=[
            pl.BlockSpec((1, 1), shared2),              # reweight scale
            pl.BlockSpec((1, t, dv), batch3),           # ViT tokens
            pl.BlockSpec((1, dv), shared2),             # final norm gamma
            pl.BlockSpec((1, dv), shared2),             # final norm beta
            pl.BlockSpec((dv, e), shared2),             # image_proj w
            pl.BlockSpec((1, e), shared2),              # image_proj b
            pl.BlockSpec((1, 1, e), batch3),            # clip_feature row
            pl.BlockSpec((e, cd), shared2),             # label_embed^T
            pl.BlockSpec((cd, e), shared2),             # label_embed
            pl.BlockSpec((e, hid), shared2),            # wordvec_proj w
            pl.BlockSpec((1, hid), shared2),            # wordvec_proj b
            pl.BlockSpec((nt, e), shared2),             # batch_text_embed
        ],
        out_specs=(
            pl.BlockSpec((1, t, e), batch3),
            pl.BlockSpec((1, tq, hid), batch3),
            pl.BlockSpec((1, 1, 1), batch3),
        ),
        out_shape=(
            jax.ShapeDtypeStruct((bb, t, e), jnp.float32),
            jax.ShapeDtypeStruct((bb, tq, hid), jnp.float32),
            jax.ShapeDtypeStruct((bb, 1, 1), jnp.float32),
        ),
        compiler_params=pltpu.CompilerParams(dimension_semantics=("parallel",)),
    )(params['reweight_scale'], vit_out, vp['norm_g'], vp['norm_b'],
      params['image_proj_w'], params['image_proj_b'], clip3,
      params['label_embed_t'], params['label_embed'],
      params['wordvec_w'], params['wordvec_b'], batch_text_embed)
    loss_dis = jnp.sum(l1) / jnp.float32(bb * e)        # F.l1_loss (mean)
    return emb, qry, loss_dis


def q2l_forward(queries, enc, qp):
    bb, tq, hid = queries.shape
    _, tk, e = enc.shape
    inter, nlayer = Q2L_INTER, Q2L_LAYERS
    batch3 = lambda b, l: (b, 0, 0)
    layer3 = lambda b, l: (l, 0, 0)
    in_specs = [
        pl.BlockSpec((1, tq, hid), batch3),
        pl.BlockSpec((1, tk, e), batch3),
        pl.BlockSpec((1, hid, hid), layer3), pl.BlockSpec((1, 1, hid), layer3),
        pl.BlockSpec((1, e, 2 * hid), layer3), pl.BlockSpec((1, 1, 2 * hid), layer3),
        pl.BlockSpec((1, hid, hid), layer3), pl.BlockSpec((1, 1, hid), layer3),
        pl.BlockSpec((1, 1, hid), layer3), pl.BlockSpec((1, 1, hid), layer3),
        pl.BlockSpec((1, hid, inter), layer3), pl.BlockSpec((1, 1, inter), layer3),
        pl.BlockSpec((1, inter, hid), layer3), pl.BlockSpec((1, 1, hid), layer3),
        pl.BlockSpec((1, 1, hid), layer3), pl.BlockSpec((1, 1, hid), layer3),
    ]
    return pl.pallas_call(
        functools.partial(_q2l_kernel, heads=Q2L_HEADS, eps=1e-12),
        grid=(bb, nlayer),
        in_specs=in_specs,
        out_specs=pl.BlockSpec((1, tq, hid), batch3),
        out_shape=jax.ShapeDtypeStruct((bb, tq, hid), jnp.float32),
        compiler_params=pltpu.CompilerParams(
            dimension_semantics=("parallel", "arbitrary")),
    )(queries, enc,
      qp['qw'], qp['qb'], qp['kvw'], qp['kvb'], qp['ow'], qp['ob'],
      qp['ln1_g'], qp['ln1_b'], qp['iw'], qp['ib'], qp['o2w'], qp['o2b'],
      qp['ln2_g'], qp['ln2_b'])


def fc_and_losses(hidden, params, image_tag):
    bb, tq, hid = hidden.shape
    c = image_tag.shape[1]
    nt = tq - c
    tag_pad = jnp.pad(image_tag.astype(jnp.float32),
                      ((0, 0), (0, nt))).reshape(bb, tq, 1)
    batch3 = lambda b: (b, 0, 0)
    shared2 = lambda b: (0, 0)
    lt, la = pl.pallas_call(
        functools.partial(_fc_loss_kernel, nclass=c),
        grid=(bb,),
        in_specs=[
            pl.BlockSpec((1, tq, hid), batch3),
            pl.BlockSpec((hid, 1), shared2),
            pl.BlockSpec((1, 1), shared2),
            pl.BlockSpec((1, tq, 1), batch3),
        ],
        out_specs=(pl.BlockSpec((1, 1, 1), batch3),
                   pl.BlockSpec((1, 1, 1), batch3)),
        out_shape=(jax.ShapeDtypeStruct((bb, 1, 1), jnp.float32),
                   jax.ShapeDtypeStruct((bb, 1, 1), jnp.float32)),
        compiler_params=pltpu.CompilerParams(dimension_semantics=("parallel",)),
    )(hidden, params['fc_w'], params['fc_b'], tag_pad)
    return -jnp.sum(lt), -jnp.sum(la)     # AsymmetricLoss returns -loss.sum()


# ============================== model forward ================================

def ram_plus_forward(params, image, image_tag, clip_feature, batch_text_embed):
    """Returns (loss_tag, loss_dis, loss_alignment).  The `caption` argument
    of the PyTorch forward is unused in its body and is therefore omitted."""
    bb = image.shape[0]
    gh = gw = IMG // PATCH
    # stride==patch Conv2d realized as patchify (C, ph, pw ordering preserved)
    patches = image.reshape(bb, IN_CH, gh, PATCH, gw, PATCH) \
                   .transpose(0, 2, 4, 1, 3, 5) \
                   .reshape(bb, gh * gw, IN_CH * PATCH * PATCH)

    x = vit_forward(patches, params['vit'])
    image_embeds, queries, loss_dis = post_vit(
        x, params, clip_feature, batch_text_embed)
    hidden = q2l_forward(queries, image_embeds, params['q2l'])
    loss_tag, loss_align = fc_and_losses(hidden, params, image_tag)
    return loss_tag, loss_dis, loss_align


# ============================== parameter init ===============================

def init_params(key):
    keys = iter(jax.random.split(key, 32))

    def nrm(shape, std=0.02, dtype=jnp.float32):
        return (jax.random.normal(next(keys), shape, jnp.float32) * std).astype(dtype)

    d, nl, mlp = VIT_DIM, VIT_DEPTH, VIT_MLP
    vit = {
        'patch_w': nrm((IN_CH * PATCH * PATCH, d), dtype=jnp.bfloat16),
        'patch_b': jnp.zeros((1, d), jnp.float32),
        'cls_token': nrm((1, d)),
        'pos_embed': nrm((N_TOK, d)),
        'ln1_g': jnp.ones((nl, 1, d), jnp.float32),
        'ln1_b': jnp.zeros((nl, 1, d), jnp.float32),
        'qkvw': nrm((nl, d, 3 * d), dtype=jnp.bfloat16),
        'qkvb': jnp.zeros((nl, 1, 3 * d), jnp.float32),
        'projw': nrm((nl, d, d), dtype=jnp.bfloat16),
        'projb': jnp.zeros((nl, 1, d), jnp.float32),
        'ln2_g': jnp.ones((nl, 1, d), jnp.float32),
        'ln2_b': jnp.zeros((nl, 1, d), jnp.float32),
        'fc1w': nrm((nl, d, mlp), dtype=jnp.bfloat16),
        'fc1b': jnp.zeros((nl, 1, mlp), jnp.float32),
        'fc2w': nrm((nl, mlp, d), dtype=jnp.bfloat16),
        'fc2b': jnp.zeros((nl, 1, d), jnp.float32),
        'norm_g': jnp.ones((1, d), jnp.float32),
        'norm_b': jnp.zeros((1, d), jnp.float32),
    }
    ql, h, e, it = Q2L_LAYERS, HID, ENC_W, Q2L_INTER
    q2l = {
        'qw': nrm((ql, h, h), dtype=jnp.bfloat16),
        'qb': jnp.zeros((ql, 1, h), jnp.float32),
        'kvw': nrm((ql, e, 2 * h), dtype=jnp.bfloat16),   # fused K|V
        'kvb': jnp.zeros((ql, 1, 2 * h), jnp.float32),
        'ow': nrm((ql, h, h), dtype=jnp.bfloat16),
        'ob': jnp.zeros((ql, 1, h), jnp.float32),
        'ln1_g': jnp.ones((ql, 1, h), jnp.float32),
        'ln1_b': jnp.zeros((ql, 1, h), jnp.float32),
        'iw': nrm((ql, h, it), dtype=jnp.bfloat16),
        'ib': jnp.zeros((ql, 1, it), jnp.float32),
        'o2w': nrm((ql, it, h), dtype=jnp.bfloat16),
        'o2b': jnp.zeros((ql, 1, h), jnp.float32),
        'ln2_g': jnp.ones((ql, 1, h), jnp.float32),
        'ln2_b': jnp.zeros((ql, 1, h), jnp.float32),
    }
    # zeros in the module's eval init; deterministic random here so the
    # description softmax is non-trivial.
    lab = jax.random.normal(next(keys), (NUM_CLASS * DES_PER_CLASS, e),
                            jnp.float32) * 0.02
    return {
        'vit': vit, 'q2l': q2l,
        'image_proj_w': nrm((d, e), dtype=jnp.bfloat16),
        'image_proj_b': jnp.zeros((1, e), jnp.float32),
        'label_embed': lab.astype(jnp.bfloat16),           # (C*des, E)
        'label_embed_t': lab.T.astype(jnp.bfloat16),       # (E, C*des)
        'wordvec_w': nrm((e, h), dtype=jnp.bfloat16),      # wordvec_proj
        'wordvec_b': jnp.zeros((1, h), jnp.float32),
        'fc_w': nrm((h, 1), dtype=jnp.bfloat16),
        'fc_b': jnp.zeros((1, 1), jnp.float32),
        'reweight_scale': jnp.full((1, 1), np.log(1.0 / 0.07), jnp.float32),
    }


# ================================== main =====================================

if __name__ == "__main__":
    key = jax.random.PRNGKey(0)
    kp, kim, ktag, kclip, ktext = jax.random.split(key, 5)
    params = init_params(kp)

    image = jax.random.normal(kim, (B, IN_CH, IMG, IMG), jnp.float32)   # NCHW
    image_tag = (jax.random.uniform(ktag, (B, NUM_CLASS)) > 0.5).astype(jnp.float32)
    clip_feature = jax.random.normal(kclip, (B, ENC_W), jnp.float32)
    batch_text_embed = jax.random.normal(ktext, (N_TEXT, ENC_W), jnp.float32)

    fwd = jax.jit(ram_plus_forward)
    loss_tag, loss_dis, loss_align = fwd(params, image, image_tag,
                                         clip_feature, batch_text_embed)
    jax.block_until_ready((loss_tag, loss_dis, loss_align))
    assert np.isfinite(float(loss_tag))
    assert np.isfinite(float(loss_dis))
    assert np.isfinite(float(loss_align))
    print("KERNEL_OK")
</pallas_src>

<mosaic_0001>
module attributes {stable_mosaic.version = 11 : i64} {
  func.func @_vit_kernel(%arg0: i32, %arg1: i32, %arg2: memref<1x4x768xf32, #tpu.memory_space<vmem>>, %arg3: memref<768x64xbf16, #tpu.memory_space<vmem>>, %arg4: memref<1x64xf32, #tpu.memory_space<vmem>>, %arg5: memref<1x64xf32, #tpu.memory_space<vmem>>, %arg6: memref<5x64xf32, #tpu.memory_space<vmem>>, %arg7: memref<1x1x64xf32, #tpu.memory_space<vmem>>, %arg8: memref<1x1x64xf32, #tpu.memory_space<vmem>>, %arg9: memref<1x64x192xbf16, #tpu.memory_space<vmem>>, %arg10: memref<1x1x192xf32, #tpu.memory_space<vmem>>, %arg11: memref<1x64x64xbf16, #tpu.memory_space<vmem>>, %arg12: memref<1x1x64xf32, #tpu.memory_space<vmem>>, %arg13: memref<1x1x64xf32, #tpu.memory_space<vmem>>, %arg14: memref<1x1x64xf32, #tpu.memory_space<vmem>>, %arg15: memref<1x64x256xbf16, #tpu.memory_space<vmem>>, %arg16: memref<1x1x256xf32, #tpu.memory_space<vmem>>, %arg17: memref<1x256x64xbf16, #tpu.memory_space<vmem>>, %arg18: memref<1x1x64xf32, #tpu.memory_space<vmem>>, %arg19: memref<1x5x64xf32, #tpu.memory_space<vmem>>) attributes {dimension_semantics = [#tpu.dimension_semantics<parallel>, #tpu.dimension_semantics<arbitrary>], iteration_bounds = array<i64: 2, 2>, scalar_prefetch = 0 : i64, scratch_operands = 0 : i64, tpu.core_type = #tpu.core_type<tc>, window_params = [{transform_indices = @transform_0, window_bounds = array<i64: 1, 4, 768>}, {pipeline_mode = #tpu.pipeline_mode<synchronous>, transform_indices = @transform_1, window_bounds = array<i64: 768, 64>}, {pipeline_mode = #tpu.pipeline_mode<synchronous>, transform_indices = @transform_2, window_bounds = array<i64: 1, 64>}, {pipeline_mode = #tpu.pipeline_mode<synchronous>, transform_indices = @transform_3, window_bounds = array<i64: 1, 64>}, {pipeline_mode = #tpu.pipeline_mode<synchronous>, transform_indices = @transform_4, window_bounds = array<i64: 5, 64>}, {transform_indices = @transform_5, window_bounds = array<i64: 1, 1, 64>}, {transform_indices = @transform_6, window_bounds = array<i64: 1, 1, 64>}, {transform_indices = @transform_7, window_bounds = array<i64: 1, 64, 192>}, {transform_indices = @transform_8, window_bounds = array<i64: 1, 1, 192>}, {transform_indices = @transform_9, window_bounds = array<i64: 1, 64, 64>}, {transform_indices = @transform_10, window_bounds = array<i64: 1, 1, 64>}, {transform_indices = @transform_11, window_bounds = array<i64: 1, 1, 64>}, {transform_indices = @transform_12, window_bounds = array<i64: 1, 1, 64>}, {transform_indices = @transform_13, window_bounds = array<i64: 1, 64, 256>}, {transform_indices = @transform_14, window_bounds = array<i64: 1, 1, 256>}, {transform_indices = @transform_15, window_bounds = array<i64: 1, 256, 64>}, {transform_indices = @transform_16, window_bounds = array<i64: 1, 1, 64>}, {transform_indices = @transform_17, window_bounds = array<i64: 1, 5, 64>}]} {
    %c0_i32 = arith.constant 0 : i32
    %0 = arith.cmpi eq, %arg1, %c0_i32 : i32
    %1 = arith.extui %0 : i1 to i32
    %c0_i32_0 = arith.constant 0 : i32
    %2 = arith.cmpi ne, %1, %c0_i32_0 : i32
    scf.if %2 {
      %c0_78 = arith.constant 0 : index
      %c0_79 = arith.constant 0 : index
      %c0_80 = arith.constant 0 : index
      %194 = vector.load %arg2[%c0_78, %c0_79, %c0_80] : memref<1x4x768xf32, #tpu.memory_space<vmem>>, vector<1x4x768xf32>
      %195 = vector.shape_cast %194 : vector<1x4x768xf32> to vector<4x768xf32>
      %196 = arith.truncf %195 : vector<4x768xf32> to vector<4x768xbf16>
      %c0_81 = arith.constant 0 : index
      %c0_82 = arith.constant 0 : index
      %197 = vector.load %arg3[%c0_81, %c0_82] : memref<768x64xbf16, #tpu.memory_space<vmem>>, vector<768x64xbf16>
      %cst_83 = arith.constant dense<0.000000e+00> : vector<4x64xf32>
      %198 = tpu.matmul %196, %197, %cst_83 {dimension_numbers = #tpu.dot_dimension_numbers<[1], [0], [0], [1], [0, 0, 1, 1], [], []>} : vector<4x768xbf16>, vector<768x64xbf16>, vector<4x64xf32> -> vector<4x64xf32>
      %c0_84 = arith.constant 0 : index
      %c0_85 = arith.constant 0 : index
      %199 = vector.load %arg4[%c0_84, %c0_85] : memref<1x64xf32, #tpu.memory_space<vmem>>, vector<1x64xf32>
      %200 = vector.broadcast %199 : vector<1x64xf32> to vector<4x64xf32>
      %201 = arith.addf %198, %200 : vector<4x64xf32>
      %c0_86 = arith.constant 0 : index
      %c0_87 = arith.constant 0 : index
      %202 = vector.load %arg5[%c0_86, %c0_87] : memref<1x64xf32, #tpu.memory_space<vmem>>, vector<1x64xf32>
      %203 = tpu.concatenate %202, %201 in 0 : vector<1x64xf32>, vector<4x64xf32> -> vector<5x64xf32>
      %c0_88 = arith.constant 0 : index
      %c0_89 = arith.constant 0 : index
      %204 = vector.load %arg6[%c0_88, %c0_89] : memref<5x64xf32, #tpu.memory_space<vmem>>, vector<5x64xf32>
      %205 = arith.addf %203, %204 : vector<5x64xf32>
      %c0_90 = arith.constant 0 : index
      %c0_91 = arith.constant 0 : index
      %c0_92 = arith.constant 0 : index
      %206 = vector.load %arg19[%c0_90, %c0_91, %c0_92] : memref<1x5x64xf32, #tpu.memory_space<vmem>>, vector<1x5x64xf32>
      %207 = vector.shape_cast %206 : vector<1x5x64xf32> to vector<5x64xf32>
      %208 = vector.shape_cast %205 : vector<5x64xf32> to vector<1x5x64xf32>
      tpu.vector_store %arg19[%c0_90, %c0_91, %c0_92], %208 {strides = array<i32>} : memref<1x5x64xf32, #tpu.memory_space<vmem>>, vector<1x5x64xf32>,
    } else {
    }
    %c0 = arith.constant 0 : index
    %c0_1 = arith.constant 0 : index
    %c0_2 = arith.constant 0 : index
    %3 = vector.load %arg19[%c0, %c0_1, %c0_2] : memref<1x5x64xf32, #tpu.memory_space<vmem>>, vector<1x5x64xf32>
    %4 = vector.shape_cast %3 : vector<1x5x64xf32> to vector<5x64xf32>
    %c0_3 = arith.constant 0 : index
    %c0_4 = arith.constant 0 : index
    %c0_5 = arith.constant 0 : index
    %5 = vector.load %arg7[%c0_3, %c0_4, %c0_5] : memref<1x1x64xf32, #tpu.memory_space<vmem>>, vector<1x1x64xf32>
    %6 = vector.shape_cast %5 : vector<1x1x64xf32> to vector<1x64xf32>
    %c0_6 = arith.constant 0 : index
    %c0_7 = arith.constant 0 : index
    %c0_8 = arith.constant 0 : index
    %7 = vector.load %arg8[%c0_6, %c0_7, %c0_8] : memref<1x1x64xf32, #tpu.memory_space<vmem>>, vector<1x1x64xf32>
    %8 = vector.shape_cast %7 : vector<1x1x64xf32> to vector<1x64xf32>
    %cst = arith.constant dense<0.000000e+00> : vector<5xf32>
    %9 = vector.multi_reduction <add>, %4, %cst [1] : vector<5x64xf32> to vector<5xf32>
    %10 = vector.shape_cast %9 : vector<5xf32> to vector<5x1xf32>
    %cst_9 = arith.constant 6.400000e+01 : f32
    %11 = vector.broadcast %cst_9 : f32 to vector<5x1xf32>
    %12 = arith.divf %10, %11 : vector<5x1xf32>
    %13 = vector.broadcast %12 : vector<5x1xf32> to vector<5x64xf32>
    %14 = arith.subf %4, %13 : vector<5x64xf32>
    %15 = vector.broadcast %12 : vector<5x1xf32> to vector<5x64xf32>
    %16 = arith.subf %4, %15 : vector<5x64xf32>
    %17 = arith.mulf %14, %16 : vector<5x64xf32>
    %cst_10 = arith.constant dense<0.000000e+00> : vector<5xf32>
    %18 = vector.multi_reduction <add>, %17, %cst_10 [1] : vector<5x64xf32> to vector<5xf32>
    %19 = vector.shape_cast %18 : vector<5xf32> to vector<5x1xf32>
    %cst_11 = arith.constant 6.400000e+01 : f32
    %20 = vector.broadcast %cst_11 : f32 to vector<5x1xf32>
    %21 = arith.divf %19, %20 : vector<5x1xf32>
    %22 = vector.broadcast %12 : vector<5x1xf32> to vector<5x64xf32>
    %23 = arith.subf %4, %22 : vector<5x64xf32>
    %cst_12 = arith.constant 9.99999997E-7 : f32
    %24 = vector.broadcast %cst_12 : f32 to vector<5x1xf32>
    %25 = arith.addf %21, %24 : vector<5x1xf32>
    %26 = math.rsqrt %25 : vector<5x1xf32>
    %27 = vector.broadcast %26 : vector<5x1xf32> to vector<5x64xf32>
    %28 = arith.mulf %23, %27 : vector<5x64xf32>
    %29 = vector.broadcast %6 : vector<1x64xf32> to vector<5x64xf32>
    %30 = arith.mulf %28, %29 : vector<5x64xf32>
    %31 = vector.broadcast %8 : vector<1x64xf32> to vector<5x64xf32>
    %32 = arith.addf %30, %31 : vector<5x64xf32>
    %33 = arith.truncf %32 : vector<5x64xf32> to vector<5x64xbf16>
    %c0_13 = arith.constant 0 : index
    %c0_14 = arith.constant 0 : index
    %c0_15 = arith.constant 0 : index
    %34 = vector.load %arg9[%c0_13, %c0_14, %c0_15] : memref<1x64x192xbf16, #tpu.memory_space<vmem>>, vector<1x64x192xbf16>
    %35 = vector.shape_cast %34 : vector<1x64x192xbf16> to vector<64x192xbf16>
    %cst_16 = arith.constant dense<0.000000e+00> : vector<5x192xf32>
    %36 = tpu.matmul %33, %35, %cst_16 {dimension_numbers = #tpu.dot_dimension_numbers<[1], [0], [0], [1], [0, 0, 1, 1], [], []>} : vector<5x64xbf16>, vector<64x192xbf16>, vector<5x192xf32> -> vector<5x192xf32>
    %c0_17 = arith.constant 0 : index
    %c0_18 = arith.constant 0 : index
    %c0_19 = arith.constant 0 : index
    %37 = vector.load %arg10[%c0_17, %c0_18, %c0_19] : memref<1x1x192xf32, #tpu.memory_space<vmem>>, vector<1x1x192xf32>
    %38 = vector.shape_cast %37 : vector<1x1x192xf32> to vector<1x192xf32>
    %39 = vector.broadcast %38 : vector<1x192xf32> to vector<5x192xf32>
    %40 = arith.addf %36, %39 : vector<5x192xf32>
    %41 = vector.extract_strided_slice %40 {offsets = [0, 0], sizes = [5, 64], strides = [1, 1]} : vector<5x192xf32> to vector<5x64xf32>
    %42 = vector.extract_strided_slice %40 {offsets = [0, 64], sizes = [5, 64], strides = [1, 1]} : vector<5x192xf32> to vector<5x64xf32>
    %43 = vector.extract_strided_slice %40 {offsets = [0, 128], sizes = [5, 64], strides = [1, 1]} : vector<5x192xf32> to vector<5x64xf32>
    %44 = vector.extract_strided_slice %41 {offsets = [0, 0], sizes = [5, 16], strides = [1, 1]} : vector<5x64xf32> to vector<5x16xf32>
    %45 = arith.truncf %44 : vector<5x16xf32> to vector<5x16xbf16>
    %46 = vector.extract_strided_slice %42 {offsets = [0, 0], sizes = [5, 16], strides = [1, 1]} : vector<5x64xf32> to vector<5x16xf32>
    %47 = arith.truncf %46 : vector<5x16xf32> to vector<5x16xbf16>
    %48 = vector.extract_strided_slice %43 {offsets = [0, 0], sizes = [5, 16], strides = [1, 1]} : vector<5x64xf32> to vector<5x16xf32>
    %49 = arith.truncf %48 : vector<5x16xf32> to vector<5x16xbf16>
    %cst_20 = arith.constant dense<0.000000e+00> : vector<5x5xf32>
    %50 = tpu.matmul %45, %47, %cst_20 {dimension_numbers = #tpu.dot_dimension_numbers<[1], [1], [0], [0], [0, 0, 1, 0], [], []>} : vector<5x16xbf16>, vector<5x16xbf16>, vector<5x5xf32> -> vector<5x5xf32>
    %cst_21 = arith.constant 2.500000e-01 : f32
    %51 = vector.broadcast %cst_21 : f32 to vector<5x5xf32>
    %52 = arith.mulf %50, %51 : vector<5x5xf32>
    %cst_22 = arith.constant dense<0xFF800000> : vector<5xf32>
    %53 = vector.multi_reduction <maximumf>, %52, %cst_22 [1] : vector<5x5xf32> to vector<5xf32>
    %54 = vector.shape_cast %53 : vector<5xf32> to vector<5x1xf32>
    %55 = vector.broadcast %54 : vector<5x1xf32> to vector<5x5xf32>
    %56 = arith.subf %52, %55 : vector<5x5xf32>
    %57 = math.exp %56 : vector<5x5xf32>
    %cst_23 = arith.constant dense<0.000000e+00> : vector<5xf32>
    %58 = vector.multi_reduction <add>, %57, %cst_23 [1] : vector<5x5xf32> to vector<5xf32>
    %59 = vector.shape_cast %58 : vector<5xf32> to vector<5x1xf32>
    %60 = tpu.reciprocal %59 {approx = true} : vector<5x1xf32> -> vector<5x1xf32>
    %61 = vector.broadcast %60 : vector<5x1xf32> to vector<5x5xf32>
    %62 = arith.mulf %57, %61 : vector<5x5xf32>
    %63 = arith.truncf %62 : vector<5x5xf32> to vector<5x5xbf16>
    %cst_24 = arith.constant dense<0.000000e+00> : vector<5x16xf32>
    %64 = tpu.matmul %63, %49, %cst_24 {dimension_numbers = #tpu.dot_dimension_numbers<[1], [0], [0], [1], [0, 0, 1, 1], [], []>} : vector<5x5xbf16>, vector<5x16xbf16>, vector<5x16xf32> -> vector<5x16xf32>
    %65 = vector.extract_strided_slice %41 {offsets = [0, 16], sizes = [5, 16], strides = [1, 1]} : vector<5x64xf32> to vector<5x16xf32>
    %66 = arith.truncf %65 : vector<5x16xf32> to vector<5x16xbf16>
    %67 = vector.extract_strided_slice %42 {offsets = [0, 16], sizes = [5, 16], strides = [1, 1]} : vector<5x64xf32> to vector<5x16xf32>
    %68 = arith.truncf %67 : vector<5x16xf32> to vector<5x16xbf16>
    %69 = vector.extract_strided_slice %43 {offsets = [0, 16], sizes = [5, 16], strides = [1, 1]} : vector<5x64xf32> to vector<5x16xf32>
    %70 = arith.truncf %69 : vector<5x16xf32> to vector<5x16xbf16>
    %cst_25 = arith.constant dense<0.000000e+00> : vector<5x5xf32>
    %71 = tpu.matmul %66, %68, %cst_25 {dimension_numbers = #tpu.dot_dimension_numbers<[1], [1], [0], [0], [0, 0, 1, 0], [], []>} : vector<5x16xbf16>, vector<5x16xbf16>, vector<5x5xf32> -> vector<5x5xf32>
    %cst_26 = arith.constant 2.500000e-01 : f32
    %72 = vector.broadcast %cst_26 : f32 to vector<5x5xf32>
    %73 = arith.mulf %71, %72 : vector<5x5xf32>
    %cst_27 = arith.constant dense<0xFF800000> : vector<5xf32>
    %74 = vector.multi_reduction <maximumf>, %73, %cst_27 [1] : vector<5x5xf32> to vector<5xf32>
    %75 = vector.shape_cast %74 : vector<5xf32> to vector<5x1xf32>
    %76 = vector.broadcast %75 : vector<5x1xf32> to vector<5x5xf32>
    %77 = arith.subf %73, %76 : vector<5x5xf32>
    %78 = math.exp %77 : vector<5x5xf32>
    %cst_28 = arith.constant dense<0.000000e+00> : vector<5xf32>
    %79 = vector.multi_reduction <add>, %78, %cst_28 [1] : vector<5x5xf32> to vector<5xf32>
    %80 = vector.shape_cast %79 : vector<5xf32> to vector<5x1xf32>
    %81 = tpu.reciprocal %80 {approx = true} : vector<5x1xf32> -> vector<5x1xf32>
    %82 = vector.broadcast %81 : vector<5x1xf32> to vector<5x5xf32>
    %83 = arith.mulf %78, %82 : vector<5x5xf32>
    %84 = arith.truncf %83 : vector<5x5xf32> to vector<5x5xbf16>
    %cst_29 = arith.constant dense<0.000000e+00> : vector<5x16xf32>
    %85 = tpu.matmul %84, %70, %cst_29 {dimension_numbers = #tpu.dot_dimension_numbers<[1], [0], [0], [1], [0, 0, 1, 1], [], []>} : vector<5x5xbf16>, vector<5x16xbf16>, vector<5x16xf32> -> vector<5x16xf32>
    %86 = vector.extract_strided_slice %41 {offsets = [0, 32], sizes = [5, 16], strides = [1, 1]} : vector<5x64xf32> to vector<5x16xf32>
    %87 = arith.truncf %86 : vector<5x16xf32> to vector<5x16xbf16>
    %88 = vector.extract_strided_slice %42 {offsets = [0, 32], sizes = [5, 16], strides = [1, 1]} : vector<5x64xf32> to vector<5x16xf32>
    %89 = arith.truncf %88 : vector<5x16xf32> to vector<5x16xbf16>
    %90 = vector.extract_strided_slice %43 {offsets = [0, 32], sizes = [5, 16], strides = [1, 1]} : vector<5x64xf32> to vector<5x16xf32>
    %91 = arith.truncf %90 : vector<5x16xf32> to vector<5x16xbf16>
    %cst_30 = arith.constant dense<0.000000e+00> : vector<5x5xf32>
    %92 = tpu.matmul %87, %89, %cst_30 {dimension_numbers = #tpu.dot_dimension_numbers<[1], [1], [0], [0], [0, 0, 1, 0], [], []>} : vector<5x16xbf16>, vector<5x16xbf16>, vector<5x5xf32> -> vector<5x5xf32>
    %cst_31 = arith.constant 2.500000e-01 : f32
    %93 = vector.broadcast %cst_31 : f32 to vector<5x5xf32>
    %94 = arith.mulf %92, %93 : vector<5x5xf32>
    %cst_32 = arith.constant dense<0xFF800000> : vector<5xf32>
    %95 = vector.multi_reduction <maximumf>, %94, %cst_32 [1] : vector<5x5xf32> to vector<5xf32>
    %96 = vector.shape_cast %95 : vector<5xf32> to vector<5x1xf32>
    %97 = vector.broadcast %96 : vector<5x1xf32> to vector<5x5xf32>
    %98 = arith.subf %94, %97 : vector<5x5xf32>
    %99 = math.exp %98 : vector<5x5xf32>
    %cst_33 = arith.constant dense<0.000000e+00> : vector<5xf32>
    %100 = vector.multi_reduction <add>, %99, %cst_33 [1] : vector<5x5xf32> to vector<5xf32>
    %101 = vector.shape_cast %100 : vector<5xf32> to vector<5x1xf32>
    %102 = tpu.reciprocal %101 {approx = true} : vector<5x1xf32> -> vector<5x1xf32>
    %103 = vector.broadcast %102 : vector<5x1xf32> to vector<5x5xf32>
    %104 = arith.mulf %99, %103 : vector<5x5xf32>
    %105 = arith.truncf %104 : vector<5x5xf32> to vector<5x5xbf16>
    %cst_34 = arith.constant dense<0.000000e+00> : vector<5x16xf32>
    %106 = tpu.matmul %105, %91, %cst_34 {dimension_numbers = #tpu.dot_dimension_numbers<[1], [0], [0], [1], [0, 0, 1, 1], [], []>} : vector<5x5xbf16>, vector<5x16xbf16>, vector<5x16xf32> -> vector<5x16xf32>
    %107 = vector.extract_strided_slice %41 {offsets = [0, 48], sizes = [5, 16], strides = [1, 1]} : vector<5x64xf32> to vector<5x16xf32>
    %108 = arith.truncf %107 : vector<5x16xf32> to vector<5x16xbf16>
    %109 = vector.extract_strided_slice %42 {offsets = [0, 48], sizes = [5, 16], strides = [1, 1]} : vector<5x64xf32> to vector<5x16xf32>
    %110 = arith.truncf %109 : vector<5x16xf32> to vector<5x16xbf16>
    %111 = vector.extract_strided_slice %43 {offsets = [0, 48], sizes = [5, 16], strides = [1, 1]} : vector<5x64xf32> to vector<5x16xf32>
    %112 = arith.truncf %111 : vector<5x16xf32> to vector<5x16xbf16>
    %cst_35 = arith.constant dense<0.000000e+00> : vector<5x5xf32>
    %113 = tpu.matmul %108, %110, %cst_35 {dimension_numbers = #tpu.dot_dimension_numbers<[1], [1], [0], [0], [0, 0, 1, 0], [], []>} : vector<5x16xbf16>, vector<5x16xbf16>, vector<5x5xf32> -> vector<5x5xf32>
    %cst_36 = arith.constant 2.500000e-01 : f32
    %114 = vector.broadcast %cst_36 : f32 to vector<5x5xf32>
    %115 = arith.mulf %113, %114 : vector<5x5xf32>
    %cst_37 = arith.constant dense<0xFF800000> : vector<5xf32>
    %116 = vector.multi_reduction <maximumf>, %115, %cst_37 [1] : vector<5x5xf32> to vector<5xf32>
    %117 = vector.shape_cast %116 : vector<5xf32> to vector<5x1xf32>
    %118 = vector.broadcast %117 : vector<5x1xf32> to vector<5x5xf32>
    %119 = arith.subf %115, %118 : vector<5x5xf32>
    %120 = math.exp %119 : vector<5x5xf32>
    %cst_38 = arith.constant dense<0.000000e+00> : vector<5xf32>
    %121 = vector.multi_reduction <add>, %120, %cst_38 [1] : vector<5x5xf32> to vector<5xf32>
    %122 = vector.shape_cast %121 : vector<5xf32> to vector<5x1xf32>
    %123 = tpu.reciprocal %122 {approx = true} : vector<5x1xf32> -> vector<5x1xf32>
    %124 = vector.broadcast %123 : vector<5x1xf32> to vector<5x5xf32>
    %125 = arith.mulf %120, %124 : vector<5x5xf32>
    %126 = arith.truncf %125 : vector<5x5xf32> to vector<5x5xbf16>
    %cst_39 = arith.constant dense<0.000000e+00> : vector<5x16xf32>
    %127 = tpu.matmul %126, %112, %cst_39 {dimension_numbers = #tpu.dot_dimension_numbers<[1], [0], [0], [1], [0, 0, 1, 1], [], []>} : vector<5x5xbf16>, vector<5x16xbf16>, vector<5x16xf32> -> vector<5x16xf32>
    %128 = tpu.concatenate %64, %85, %106, %127 in 1 : vector<5x16xf32>, vector<5x16xf32>, vector<5x16xf32>, vector<5x16xf32> -> vector<5x64xf32>
    %129 = arith.truncf %128 : vector<5x64xf32> to vector<5x64xbf16>
    %c0_40 = arith.constant 0 : index
    %c0_41 = arith.constant 0 : index
    %c0_42 = arith.constant 0 : index
    %130 = vector.load %arg11[%c0_40, %c0_41, %c0_42] : memref<1x64x64xbf16, #tpu.memory_space<vmem>>, vector<1x64x64xbf16>
    %131 = vector.shape_cast %130 : vector<1x64x64xbf16> to vector<64x64xbf16>
    %cst_43 = arith.constant dense<0.000000e+00> : vector<5x64xf32>
    %132 = tpu.matmul %129, %131, %cst_43 {dimension_numbers = #tpu.dot_dimension_numbers<[1], [0], [0], [1], [0, 0, 1, 1], [], []>} : vector<5x64xbf16>, vector<64x64xbf16>, vector<5x64xf32> -> vector<5x64xf32>
    %c0_44 = arith.constant 0 : index
    %c0_45 = arith.constant 0 : index
    %c0_46 = arith.constant 0 : index
    %133 = vector.load %arg12[%c0_44, %c0_45, %c0_46] : memref<1x1x64xf32, #tpu.memory_space<vmem>>, vector<1x1x64xf32>
    %134 = vector.shape_cast %133 : vector<1x1x64xf32> to vector<1x64xf32>
    %135 = vector.broadcast %134 : vector<1x64xf32> to vector<5x64xf32>
    %136 = arith.addf %132, %135 : vector<5x64xf32>
    %137 = arith.addf %4, %136 : vector<5x64xf32>
    %c0_47 = arith.constant 0 : index
    %c0_48 = arith.constant 0 : index
    %c0_49 = arith.constant 0 : index
    %138 = vector.load %arg13[%c0_47, %c0_48, %c0_49] : memref<1x1x64xf32, #tpu.memory_space<vmem>>, vector<1x1x64xf32>
    %139 = vector.shape_cast %138 : vector<1x1x64xf32> to vector<1x64xf32>
    %c0_50 = arith.constant 0 : index
    %c0_51 = arith.constant 0 : index
    %c0_52 = arith.constant 0 : index
    %140 = vector.load %arg14[%c0_50, %c0_51, %c0_52] : memref<1x1x64xf32, #tpu.memory_space<vmem>>, vector<1x1x64xf32>
    %141 = vector.shape_cast %140 : vector<1x1x64xf32> to vector<1x64xf32>
    %cst_53 = arith.constant dense<0.000000e+00> : vector<5xf32>
    %142 = vector.multi_reduction <add>, %137, %cst_53 [1] : vector<5x64xf32> to vector<5xf32>
    %143 = vector.shape_cast %142 : vector<5xf32> to vector<5x1xf32>
    %cst_54 = arith.constant 6.400000e+01 : f32
    %144 = vector.broadcast %cst_54 : f32 to vector<5x1xf32>
    %145 = arith.divf %143, %144 : vector<5x1xf32>
    %146 = vector.broadcast %145 : vector<5x1xf32> to vector<5x64xf32>
    %147 = arith.subf %137, %146 : vector<5x64xf32>
    %148 = vector.broadcast %145 : vector<5x1xf32> to vector<5x64xf32>
    %149 = arith.subf %137, %148 : vector<5x64xf32>
    %150 = arith.mulf %147, %149 : vector<5x64xf32>
    %cst_55 = arith.constant dense<0.000000e+00> : vector<5xf32>
    %151 = vector.multi_reduction <add>, %150, %cst_55 [1] : vector<5x64xf32> to vector<5xf32>
    %152 = vector.shape_cast %151 : vector<5xf32> to vector<5x1xf32>
    %cst_56 = arith.constant 6.400000e+01 : f32
    %153 = vector.broadcast %cst_56 : f32 to vector<5x1xf32>
    %154 = arith.divf %152, %153 : vector<5x1xf32>
    %155 = vector.broadcast %145 : vector<5x1xf32> to vector<5x64xf32>
    %156 = arith.subf %137, %155 : vector<5x64xf32>
    %cst_57 = arith.constant 9.99999997E-7 : f32
    %157 = vector.broadcast %cst_57 : f32 to vector<5x1xf32>
    %158 = arith.addf %154, %157 : vector<5x1xf32>
    %159 = math.rsqrt %158 : vector<5x1xf32>
    %160 = vector.broadcast %159 : vector<5x1xf32> to vector<5x64xf32>
    %161 = arith.mulf %156, %160 : vector<5x64xf32>
    %162 = vector.broadcast %139 : vector<1x64xf32> to vector<5x64xf32>
    %163 = arith.mulf %161, %162 : vector<5x64xf32>
    %164 = vector.broadcast %141 : vector<1x64xf32> to vector<5x64xf32>
    %165 = arith.addf %163, %164 : vector<5x64xf32>
    %166 = arith.truncf %165 : vector<5x64xf32> to vector<5x64xbf16>
    %c0_58 = arith.constant 0 : index
    %c0_59 = arith.constant 0 : index
    %c0_60 = arith.constant 0 : index
    %167 = vector.load %arg15[%c0_58, %c0_59, %c0_60] : memref<1x64x256xbf16, #tpu.memory_space<vmem>>, vector<1x64x256xbf16>
    %168 = vector.shape_cast %167 : vector<1x64x256xbf16> to vector<64x256xbf16>
    %cst_61 = arith.constant dense<0.000000e+00> : vector<5x256xf32>
    %169 = tpu.matmul %166, %168, %cst_61 {dimension_numbers = #tpu.dot_dimension_numbers<[1], [0], [0], [1], [0, 0, 1, 1], [], []>} : vector<5x64xbf16>, vector<64x256xbf16>, vector<5x256xf32> -> vector<5x256xf32>
    %c0_62 = arith.constant 0 : index
    %c0_63 = arith.constant 0 : index
    %c0_64 = arith.constant 0 : index
    %170 = vector.load %arg16[%c0_62, %c0_63, %c0_64] : memref<1x1x256xf32, #tpu.memory_space<vmem>>, vector<1x1x256xf32>
    %171 = vector.shape_cast %170 : vector<1x1x256xf32> to vector<1x256xf32>
    %172 = vector.broadcast %171 : vector<1x256xf32> to vector<5x256xf32>
    %173 = arith.addf %169, %172 : vector<5x256xf32>
    %cst_65 = arith.constant 5.000000e-01 : f32
    %174 = vector.broadcast %cst_65 : f32 to vector<5x256xf32>
    %175 = arith.mulf %174, %173 : vector<5x256xf32>
    %cst_66 = arith.constant 0.707106769 : f32
    %176 = vector.broadcast %cst_66 : f32 to vector<5x256xf32>
    %177 = arith.mulf %173, %176 : vector<5x256xf32>
    %178 = math.erf %177 : vector<5x256xf32>
    %cst_67 = arith.constant 1.000000e+00 : f32
    %179 = vector.broadcast %cst_67 : f32 to vector<5x256xf32>
    %180 = arith.addf %179, %178 : vector<5x256xf32>
    %181 = arith.mulf %175, %180 : vector<5x256xf32>
    %182 = arith.truncf %181 : vector<5x256xf32> to vector<5x256xbf16>
    %c0_68 = arith.constant 0 : index
    %c0_69 = arith.constant 0 : index
    %c0_70 = arith.constant 0 : index
    %183 = vector.load %arg17[%c0_68, %c0_69, %c0_70] : memref<1x256x64xbf16, #tpu.memory_space<vmem>>, vector<1x256x64xbf16>
    %184 = vector.shape_cast %183 : vector<1x256x64xbf16> to vector<256x64xbf16>
    %cst_71 = arith.constant dense<0.000000e+00> : vector<5x64xf32>
    %185 = tpu.matmul %182, %184, %cst_71 {dimension_numbers = #tpu.dot_dimension_numbers<[1], [0], [0], [1], [0, 0, 1, 1], [], []>} : vector<5x256xbf16>, vector<256x64xbf16>, vector<5x64xf32> -> vector<5x64xf32>
    %186 = arith.addf %137, %185 : vector<5x64xf32>
    %c0_72 = arith.constant 0 : index
    %c0_73 = arith.constant 0 : index
    %c0_74 = arith.constant 0 : index
    %187 = vector.load %arg18[%c0_72, %c0_73, %c0_74] : memref<1x1x64xf32, #tpu.memory_space<vmem>>, vector<1x1x64xf32>
    %188 = vector.shape_cast %187 : vector<1x1x64xf32> to vector<1x64xf32>
    %189 = vector.broadcast %188 : vector<1x64xf32> to vector<5x64xf32>
    %190 = arith.addf %186, %189 : vector<5x64xf32>
    %c0_75 = arith.constant 0 : index
    %c0_76 = arith.constant 0 : index
    %c0_77 = arith.constant 0 : index
    %191 = vector.load %arg19[%c0_75, %c0_76, %c0_77] : memref<1x5x64xf32, #tpu.memory_space<vmem>>, vector<1x5x64xf32>
    %192 = vector.shape_cast %191 : vector<1x5x64xf32> to vector<5x64xf32>
    %193 = vector.shape_cast %190 : vector<5x64xf32> to vector<1x5x64xf32>
    tpu.vector_store %arg19[%c0_75, %c0_76, %c0_77], %193 {strides = array<i32>} : memref<1x5x64xf32, #tpu.memory_space<vmem>>, vector<1x5x64xf32>,
    return
  }
  func.func @transform_0(%arg0: i32, %arg1: i32) -> (i32, i32, i32) {
    %c0_i32 = arith.constant 0 : i32
    %c0_i32_0 = arith.constant 0 : i32
    %c0_i32_1 = arith.constant 0 : i32
    return %arg0, %c0_i32, %c0_i32_0 : i32, i32, i32
  }
  func.func @transform_1(%arg0: i32, %arg1: i32) -> (i32, i32) {
    %c0_i32 = arith.constant 0 : i32
    %c0_i32_0 = arith.constant 0 : i32
    %c0_i32_1 = arith.constant 0 : i32
    return %c0_i32, %c0_i32_0 : i32, i32
  }
  func.func @transform_2(%arg0: i32, %arg1: i32) -> (i32, i32) {
    %c0_i32 = arith.constant 0 : i32
    %c0_i32_0 = arith.constant 0 : i32
    %c0_i32_1 = arith.constant 0 : i32
    return %c0_i32, %c0_i32_0 : i32, i32
  }
  func.func @transform_3(%arg0: i32, %arg1: i32) -> (i32, i32) {
    %c0_i32 = arith.constant 0 : i32
    %c0_i32_0 = arith.constant 0 : i32
    %c0_i32_1 = arith.constant 0 : i32
    return %c0_i32, %c0_i32_0 : i32, i32
  }
  func.func @transform_4(%arg0: i32, %arg1: i32) -> (i32, i32) {
    %c0_i32 = arith.constant 0 : i32
    %c0_i32_0 = arith.constant 0 : i32
    %c0_i32_1 = arith.constant 0 : i32
    return %c0_i32, %c0_i32_0 : i32, i32
  }
  func.func @transform_5(%arg0: i32, %arg1: i32) -> (i32, i32, i32) {
    %c0_i32 = arith.constant 0 : i32
    %c0_i32_0 = arith.constant 0 : i32
    %c0_i32_1 = arith.constant 0 : i32
    return %arg1, %c0_i32, %c0_i32_0 : i32, i32, i32
  }
  func.func @transform_6(%arg0: i32, %arg1: i32) -> (i32, i32, i32) {
    %c0_i32 = arith.constant 0 : i32
    %c0_i32_0 = arith.constant 0 : i32
    %c0_i32_1 = arith.constant 0 : i32
    return %arg1, %c0_i32, %c0_i32_0 : i32, i32, i32
  }
  func.func @transform_7(%arg0: i32, %arg1: i32) -> (i32, i32, i32) {
    %c0_i32 = arith.constant 0 : i32
    %c0_i32_0 = arith.constant 0 : i32
    %c0_i32_1 = arith.constant 0 : i32
    return %arg1, %c0_i32, %c0_i32_0 : i32, i32, i32
  }
  func.func @transform_8(%arg0: i32, %arg1: i32) -> (i32, i32, i32) {
    %c0_i32 = arith.constant 0 : i32
    %c0_i32_0 = arith.constant 0 : i32
    %c0_i32_1 = arith.constant 0 : i32
    return %arg1, %c0_i32, %c0_i32_0 : i32, i32, i32
  }
  func.func @transform_9(%arg0: i32, %arg1: i32) -> (i32, i32, i32) {
    %c0_i32 = arith.constant 0 : i32
    %c0_i32_0 = arith.constant 0 : i32
    %c0_i32_1 = arith.constant 0 : i32
    return %arg1, %c0_i32, %c0_i32_0 : i32, i32, i32
  }
  func.func @transform_10(%arg0: i32, %arg1: i32) -> (i32, i32, i32) {
    %c0_i32 = arith.constant 0 : i32
    %c0_i32_0 = arith.constant 0 : i32
    %c0_i32_1 = arith.constant 0 : i32
    return %arg1, %c0_i32, %c0_i32_0 : i32, i32, i32
  }
  func.func @transform_11(%arg0: i32, %arg1: i32) -> (i32, i32, i32) {
    %c0_i32 = arith.constant 0 : i32
    %c0_i32_0 = arith.constant 0 : i32
    %c0_i32_1 = arith.constant 0 : i32
    return %arg1, %c0_i32, %c0_i32_0 : i32, i32, i32
  }
  func.func @transform_12(%arg0: i32, %arg1: i32) -> (i32, i32, i32) {
    %c0_i32 = arith.constant 0 : i32
    %c0_i32_0 = arith.constant 0 : i32
    %c0_i32_1 = arith.constant 0 : i32
    return %arg1, %c0_i32, %c0_i32_0 : i32, i32, i32
  }
  func.func @transform_13(%arg0: i32, %arg1: i32) -> (i32, i32, i32) {
    %c0_i32 = arith.constant 0 : i32
    %c0_i32_0 = arith.constant 0 : i32
    %c0_i32_1 = arith.constant 0 : i32
    return %arg1, %c0_i32, %c0_i32_0 : i32, i32, i32
  }
  func.func @transform_14(%arg0: i32, %arg1: i32) -> (i32, i32, i32) {
    %c0_i32 = arith.constant 0 : i32
    %c0_i32_0 = arith.constant 0 : i32
    %c0_i32_1 = arith.constant 0 : i32
    return %arg1, %c0_i32, %c0_i32_0 : i32, i32, i32
  }
  func.func @transform_15(%arg0: i32, %arg1: i32) -> (i32, i32, i32) {
    %c0_i32 = arith.constant 0 : i32
    %c0_i32_0 = arith.constant 0 : i32
    %c0_i32_1 = arith.constant 0 : i32
    return %arg1, %c0_i32, %c0_i32_0 : i32, i32, i32
  }
  func.func @transform_16(%arg0: i32, %arg1: i32) -> (i32, i32, i32) {
    %c0_i32 = arith.constant 0 : i32
    %c0_i32_0 = arith.constant 0 : i32
    %c0_i32_1 = arith.constant 0 : i32
    return %arg1, %c0_i32, %c0_i32_0 : i32, i32, i32
  }
  func.func @transform_17(%arg0: i32, %arg1: i32) -> (i32, i32, i32) {
    %c0_i32 = arith.constant 0 : i32
    %c0_i32_0 = arith.constant 0 : i32
    %c0_i32_1 = arith.constant 0 : i32
    return %arg0, %c0_i32, %c0_i32_0 : i32, i32, i32
  }
}

module attributes {stable_mosaic.version = 11 : i64} {
  func.func @_post_vit_kernel(%arg0: i32, %arg1: memref<1x1xf32, #tpu.memory_space<vmem>>, %arg2: memref<1x5x64xf32, #tpu.memory_space<vmem>>, %arg3: memref<1x64xf32, #tpu.memory_space<vmem>>, %arg4: memref<1x64xf32, #tpu.memory_space<vmem>>, %arg5: memref<64x64xbf16, #tpu.memory_space<vmem>>, %arg6: memref<1x64xf32, #tpu.memory_space<vmem>>, %arg7: memref<1x1x64xf32, #tpu.memory_space<vmem>>, %arg8: memref<64x24xbf16, #tpu.memory_space<vmem>>, %arg9: memref<24x64xbf16, #tpu.memory_space<vmem>>, %arg10: memref<64x128xbf16, #tpu.memory_space<vmem>>, %arg11: memref<1x128xf32, #tpu.memory_space<vmem>>, %arg12: memref<2x64xf32, #tpu.memory_space<vmem>>, %arg13: memref<1x5x64xf32, #tpu.memory_space<vmem>>, %arg14: memref<1x10x128xf32, #tpu.memory_space<vmem>>, %arg15: memref<1x1x1xf32, #tpu.memory_space<vmem>>) attributes {dimension_semantics = [#tpu.dimension_semantics<parallel>], iteration_bounds = array<i64: 2>, scalar_prefetch = 0 : i64, scratch_operands = 0 : i64, tpu.core_type = #tpu.core_type<tc>, window_params = [{pipeline_mode = #tpu.pipeline_mode<synchronous>, transform_indices = @transform_0, window_bounds = array<i64: 1, 1>}, {transform_indices = @transform_1, window_bounds = array<i64: 1, 5, 64>}, {pipeline_mode = #tpu.pipeline_mode<synchronous>, transform_indices = @transform_2, window_bounds = array<i64: 1, 64>}, {pipeline_mode = #tpu.pipeline_mode<synchronous>, transform_indices = @transform_3, window_bounds = array<i64: 1, 64>}, {pipeline_mode = #tpu.pipeline_mode<synchronous>, transform_indices = @transform_4, window_bounds = array<i64: 64, 64>}, {pipeline_mode = #tpu.pipeline_mode<synchronous>, transform_indices = @transform_5, window_bounds = array<i64: 1, 64>}, {transform_indices = @transform_6, window_bounds = array<i64: 1, 1, 64>}, {pipeline_mode = #tpu.pipeline_mode<synchronous>, transform_indices = @transform_7, window_bounds = array<i64: 64, 24>}, {pipeline_mode = #tpu.pipeline_mode<synchronous>, transform_indices = @transform_8, window_bounds = array<i64: 24, 64>}, {pipeline_mode = #tpu.pipeline_mode<synchronous>, transform_indices = @transform_9, window_bounds = array<i64: 64, 128>}, {pipeline_mode = #tpu.pipeline_mode<synchronous>, transform_indices = @transform_10, window_bounds = array<i64: 1, 128>}, {pipeline_mode = #tpu.pipeline_mode<synchronous>, transform_indices = @transform_11, window_bounds = array<i64: 2, 64>}, {transform_indices = @transform_12, window_bounds = array<i64: 1, 5, 64>}, {transform_indices = @transform_13, window_bounds = array<i64: 1, 10, 128>}, {transform_indices = @transform_14, window_bounds = array<i64: 1, 1, 1>}]} {
    %c0 = arith.constant 0 : index
    %c0_0 = arith.constant 0 : index
    %c0_1 = arith.constant 0 : index
    %0 = vector.load %arg2[%c0, %c0_0, %c0_1] : memref<1x5x64xf32, #tpu.memory_space<vmem>>, vector<1x5x64xf32>
    %1 = vector.shape_cast %0 : vector<1x5x64xf32> to vector<5x64xf32>
    %c0_2 = arith.constant 0 : index
    %c0_3 = arith.constant 0 : index
    %2 = vector.load %arg3[%c0_2, %c0_3] : memref<1x64xf32, #tpu.memory_space<vmem>>, vector<1x64xf32>
    %c0_4 = arith.constant 0 : index
    %c0_5 = arith.constant 0 : index
    %3 = vector.load %arg4[%c0_4, %c0_5] : memref<1x64xf32, #tpu.memory_space<vmem>>, vector<1x64xf32>
    %cst = arith.constant dense<0.000000e+00> : vector<5xf32>
    %4 = vector.multi_reduction <add>, %1, %cst [1] : vector<5x64xf32> to vector<5xf32>
    %5 = vector.shape_cast %4 : vector<5xf32> to vector<5x1xf32>
    %cst_6 = arith.constant 6.400000e+01 : f32
    %6 = vector.broadcast %cst_6 : f32 to vector<5x1xf32>
    %7 = arith.divf %5, %6 : vector<5x1xf32>
    %8 = vector.broadcast %7 : vector<5x1xf32> to vector<5x64xf32>
    %9 = arith.subf %1, %8 : vector<5x64xf32>
    %10 = vector.broadcast %7 : vector<5x1xf32> to vector<5x64xf32>
    %11 = arith.subf %1, %10 : vector<5x64xf32>
    %12 = arith.mulf %9, %11 : vector<5x64xf32>
    %cst_7 = arith.constant dense<0.000000e+00> : vector<5xf32>
    %13 = vector.multi_reduction <add>, %12, %cst_7 [1] : vector<5x64xf32> to vector<5xf32>
    %14 = vector.shape_cast %13 : vector<5xf32> to vector<5x1xf32>
    %cst_8 = arith.constant 6.400000e+01 : f32
    %15 = vector.broadcast %cst_8 : f32 to vector<5x1xf32>
    %16 = arith.divf %14, %15 : vector<5x1xf32>
    %17 = vector.broadcast %7 : vector<5x1xf32> to vector<5x64xf32>
    %18 = arith.subf %1, %17 : vector<5x64xf32>
    %cst_9 = arith.constant 9.99999997E-7 : f32
    %19 = vector.broadcast %cst_9 : f32 to vector<5x1xf32>
    %20 = arith.addf %16, %19 : vector<5x1xf32>
    %21 = math.rsqrt %20 : vector<5x1xf32>
    %22 = vector.broadcast %21 : vector<5x1xf32> to vector<5x64xf32>
    %23 = arith.mulf %18, %22 : vector<5x64xf32>
    %24 = vector.broadcast %2 : vector<1x64xf32> to vector<5x64xf32>
    %25 = arith.mulf %23, %24 : vector<5x64xf32>
    %26 = vector.broadcast %3 : vector<1x64xf32> to vector<5x64xf32>
    %27 = arith.addf %25, %26 : vector<5x64xf32>
    %28 = arith.truncf %27 : vector<5x64xf32> to vector<5x64xbf16>
    %c0_10 = arith.constant 0 : index
    %c0_11 = arith.constant 0 : index
    %29 = vector.load %arg5[%c0_10, %c0_11] : memref<64x64xbf16, #tpu.memory_space<vmem>>, vector<64x64xbf16>
    %cst_12 = arith.constant dense<0.000000e+00> : vector<5x64xf32>
    %30 = tpu.matmul %28, %29, %cst_12 {dimension_numbers = #tpu.dot_dimension_numbers<[1], [0], [0], [1], [0, 0, 1, 1], [], []>} : vector<5x64xbf16>, vector<64x64xbf16>, vector<5x64xf32> -> vector<5x64xf32>
    %c0_13 = arith.constant 0 : index
    %c0_14 = arith.constant 0 : index
    %31 = vector.load %arg6[%c0_13, %c0_14] : memref<1x64xf32, #tpu.memory_space<vmem>>, vector<1x64xf32>
    %32 = vector.broadcast %31 : vector<1x64xf32> to vector<5x64xf32>
    %33 = arith.addf %30, %32 : vector<5x64xf32>
    %c0_15 = arith.constant 0 : index
    %c0_16 = arith.constant 0 : index
    %c0_17 = arith.constant 0 : index
    %34 = vector.load %arg13[%c0_15, %c0_16, %c0_17] : memref<1x5x64xf32, #tpu.memory_space<vmem>>, vector<1x5x64xf32>
    %35 = vector.shape_cast %34 : vector<1x5x64xf32> to vector<5x64xf32>
    %36 = vector.shape_cast %33 : vector<5x64xf32> to vector<1x5x64xf32>
    tpu.vector_store %arg13[%c0_15, %c0_16, %c0_17], %36 {strides = array<i32>} : memref<1x5x64xf32, #tpu.memory_space<vmem>>, vector<1x5x64xf32>,
    %37 = vector.extract_strided_slice %33 {offsets = [0, 0], sizes = [1, 64], strides = [1, 1]} : vector<5x64xf32> to vector<1x64xf32>
    %c0_18 = arith.constant 0 : index
    %c0_19 = arith.constant 0 : index
    %c0_20 = arith.constant 0 : index
    %38 = vector.load %arg7[%c0_18, %c0_19, %c0_20] : memref<1x1x64xf32, #tpu.memory_space<vmem>>, vector<1x1x64xf32>
    %39 = vector.shape_cast %38 : vector<1x1x64xf32> to vector<1x64xf32>
    %40 = arith.subf %37, %39 : vector<1x64xf32>
    %41 = math.absf %40 : vector<1x64xf32>
    %42 = vector.shape_cast %41 : vector<1x64xf32> to vector<1x1x64xf32>
    %cst_21 = arith.constant dense<0.000000e+00> : vector<1xf32>
    %43 = vector.multi_reduction <add>, %42, %cst_21 [1, 2] : vector<1x1x64xf32> to vector<1xf32>
    %44 = vector.shape_cast %43 : vector<1xf32> to vector<1x1x1xf32>
    %45 = vector.extract %44[0, 0, 0] : f32 from vector<1x1x1xf32>
    %46 = vector.broadcast %45 : f32 to vector<1x1xf32>
    %c0_22 = arith.constant 0 : index
    %c0_23 = arith.constant 0 : index
    %c0_24 = arith.constant 0 : index
    %47 = vector.load %arg15[%c0_22, %c0_23, %c0_24] : memref<1x1x1xf32, #tpu.memory_space<vmem>>, vector<1x1x1xf32>
    %48 = vector.shape_cast %47 : vector<1x1x1xf32> to vector<1x1xf32>
    %49 = vector.shape_cast %46 : vector<1x1xf32> to vector<1x1x1xf32>
    tpu.vector_store %arg15[%c0_22, %c0_23, %c0_24], %49 {strides = array<i32>} : memref<1x1x1xf32, #tpu.memory_space<vmem>>, vector<1x1x1xf32>,
    %50 = arith.mulf %37, %37 : vector<1x64xf32>
    %cst_25 = arith.constant dense<0.000000e+00> : vector<1xf32>
    %51 = vector.multi_reduction <add>, %50, %cst_25 [1] : vector<1x64xf32> to vector<1xf32>
    %52 = vector.shape_cast %51 : vector<1xf32> to vector<1x1xf32>
    %53 = math.rsqrt %52 : vector<1x1xf32>
    %54 = vector.broadcast %53 : vector<1x1xf32> to vector<1x64xf32>
    %55 = arith.mulf %37, %54 : vector<1x64xf32>
    %c0_26 = arith.constant 0 : index
    %c0_27 = arith.constant 0 : index
    %56 = vector.load %arg1[%c0_26, %c0_27] : memref<1x1xf32, #tpu.memory_space<vmem>>, vector<1x1xf32>
    %57 = math.exp %56 : vector<1x1xf32>
    %58 = arith.truncf %55 : vector<1x64xf32> to vector<1x64xbf16>
    %c0_28 = arith.constant 0 : index
    %c0_29 = arith.constant 0 : index
    %59 = vector.load %arg8[%c0_28, %c0_29] : memref<64x24xbf16, #tpu.memory_space<vmem>>, vector<64x24xbf16>
    %cst_30 = arith.constant dense<0.000000e+00> : vector<1x24xf32>
    %60 = tpu.matmul %58, %59, %cst_30 {dimension_numbers = #tpu.dot_dimension_numbers<[1], [0], [0], [1], [0, 0, 1, 1], [], []>} : vector<1x64xbf16>, vector<64x24xbf16>, vector<1x24xf32> -> vector<1x24xf32>
    %61 = vector.broadcast %57 : vector<1x1xf32> to vector<1x24xf32>
    %62 = arith.mulf %61, %60 : vector<1x24xf32>
    %cst_31 = arith.constant dense<0xFF800000> : vector<1xf32>
    %63 = vector.multi_reduction <maximumf>, %62, %cst_31 [1] : vector<1x24xf32> to vector<1xf32>
    %64 = vector.shape_cast %63 : vector<1xf32> to vector<1x1xf32>
    %65 = vector.broadcast %64 : vector<1x1xf32> to vector<1x24xf32>
    %66 = arith.subf %62, %65 : vector<1x24xf32>
    %67 = math.exp %66 : vector<1x24xf32>
    %68 = tpu.iota {dimensions = array<i32: 0>} : vector<24x8xi32>
    %69 = tpu.iota {dimensions = array<i32: 1>} : vector<24x8xi32>
    %c3_i32 = arith.constant 3 : i32
    %70 = vector.broadcast %c3_i32 : i32 to vector<24x8xi32>
    %71 = arith.muli %69, %70 : vector<24x8xi32>
    %72 = arith.cmpi sge, %68, %71 : vector<24x8xi32>
    %c1_i32 = arith.constant 1 : i32
    %73 = vector.broadcast %c1_i32 : i32 to vector<24x8xi32>
    %74 = arith.addi %69, %73 : vector<24x8xi32>
    %c3_i32_32 = arith.constant 3 : i32
    %75 = vector.broadcast %c3_i32_32 : i32 to vector<24x8xi32>
    %76 = arith.muli %74, %75 : vector<24x8xi32>
    %77 = arith.cmpi slt, %68, %76 : vector<24x8xi32>
    %78 = arith.andi %72, %77 : vector<24x8xi1>
    %79 = arith.extui %78 : vector<24x8xi1> to vector<24x8xi32>
    %80 = arith.sitofp %79 : vector<24x8xi32> to vector<24x8xf32>
    %81 = tpu.iota {dimensions = array<i32: 0>} : vector<8x24xi32>
    %82 = tpu.iota {dimensions = array<i32: 1>} : vector<8x24xi32>
    %c3_i32_33 = arith.constant 3 : i32
    %83 = vector.broadcast %c3_i32_33 : i32 to vector<8x24xi32>
    %84 = arith.muli %81, %83 : vector<8x24xi32>
    %85 = arith.cmpi sge, %82, %84 : vector<8x24xi32>
    %c1_i32_34 = arith.constant 1 : i32
    %86 = vector.broadcast %c1_i32_34 : i32 to vector<8x24xi32>
    %87 = arith.addi %81, %86 : vector<8x24xi32>
    %c3_i32_35 = arith.constant 3 : i32
    %88 = vector.broadcast %c3_i32_35 : i32 to vector<8x24xi32>
    %89 = arith.muli %87, %88 : vector<8x24xi32>
    %90 = arith.cmpi slt, %82, %89 : vector<8x24xi32>
    %91 = arith.andi %85, %90 : vector<8x24xi1>
    %92 = arith.extui %91 : vector<8x24xi1> to vector<8x24xi32>
    %93 = arith.sitofp %92 : vector<8x24xi32> to vector<8x24xf32>
    %cst_36 = arith.constant dense<0.000000e+00> : vector<1x8xf32>
    %94 = tpu.matmul %67, %80, %cst_36 {dimension_numbers = #tpu.dot_dimension_numbers<[1], [0], [0], [1], [0, 0, 1, 1], [], []>} : vector<1x24xf32>, vector<24x8xf32>, vector<1x8xf32> -> vector<1x8xf32>
    %cst_37 = arith.constant dense<0.000000e+00> : vector<1x24xf32>
    %95 = tpu.matmul %94, %93, %cst_37 {dimension_numbers = #tpu.dot_dimension_numbers<[1], [0], [0], [1], [0, 0, 1, 1], [], []>} : vector<1x8xf32>, vector<8x24xf32>, vector<1x24xf32> -> vector<1x24xf32>
    %96 = arith.divf %67, %95 : vector<1x24xf32>
    %97 = vector.broadcast %96 : vector<1x24xf32> to vector<8x24xf32>
    %98 = arith.mulf %93, %97 : vector<8x24xf32>
    %99 = arith.truncf %98 : vector<8x24xf32> to vector<8x24xbf16>
    %c0_38 = arith.constant 0 : index
    %c0_39 = arith.constant 0 : index
    %100 = vector.load %arg9[%c0_38, %c0_39] : memref<24x64xbf16, #tpu.memory_space<vmem>>, vector<24x64xbf16>
    %cst_40 = arith.constant dense<0.000000e+00> : vector<8x64xf32>
    %101 = tpu.matmul %99, %100, %cst_40 {dimension_numbers = #tpu.dot_dimension_numbers<[1], [0], [0], [1], [0, 0, 1, 1], [], []>} : vector<8x24xbf16>, vector<24x64xbf16>, vector<8x64xf32> -> vector<8x64xf32>
    %102 = arith.truncf %101 : vector<8x64xf32> to vector<8x64xbf16>
    %c0_41 = arith.constant 0 : index
    %c0_42 = arith.constant 0 : index
    %103 = vector.load %arg10[%c0_41, %c0_42] : memref<64x128xbf16, #tpu.memory_space<vmem>>, vector<64x128xbf16>
    %cst_43 = arith.constant dense<0.000000e+00> : vector<8x128xf32>
    %104 = tpu.matmul %102, %103, %cst_43 {dimension_numbers = #tpu.dot_dimension_numbers<[1], [0], [0], [1], [0, 0, 1, 1], [], []>} : vector<8x64xbf16>, vector<64x128xbf16>, vector<8x128xf32> -> vector<8x128xf32>
    %c0_44 = arith.constant 0 : index
    %c0_45 = arith.constant 0 : index
    %105 = vector.load %arg11[%c0_44, %c0_45] : memref<1x128xf32, #tpu.memory_space<vmem>>, vector<1x128xf32>
    %106 = vector.broadcast %105 : vector<1x128xf32> to vector<8x128xf32>
    %107 = arith.addf %104, %106 : vector<8x128xf32>
    %cst_46 = arith.constant 0.000000e+00 : f32
    %108 = vector.broadcast %cst_46 : f32 to vector<8x128xf32>
    %109 = arith.maximumf %107, %108 : vector<8x128xf32>
    %c0_47 = arith.constant 0 : index
    %c0_48 = arith.constant 0 : index
    %110 = vector.load %arg12[%c0_47, %c0_48] : memref<2x64xf32, #tpu.memory_space<vmem>>, vector<2x64xf32>
    %111 = arith.truncf %110 : vector<2x64xf32> to vector<2x64xbf16>
    %c0_49 = arith.constant 0 : index
    %c0_50 = arith.constant 0 : index
    %112 = vector.load %arg10[%c0_49, %c0_50] : memref<64x128xbf16, #tpu.memory_space<vmem>>, vector<64x128xbf16>
    %cst_51 = arith.constant dense<0.000000e+00> : vector<2x128xf32>
    %113 = tpu.matmul %111, %112, %cst_51 {dimension_numbers = #tpu.dot_dimension_numbers<[1], [0], [0], [1], [0, 0, 1, 1], [], []>} : vector<2x64xbf16>, vector<64x128xbf16>, vector<2x128xf32> -> vector<2x128xf32>
    %c0_52 = arith.constant 0 : index
    %c0_53 = arith.constant 0 : index
    %114 = vector.load %arg11[%c0_52, %c0_53] : memref<1x128xf32, #tpu.memory_space<vmem>>, vector<1x128xf32>
    %115 = vector.broadcast %114 : vector<1x128xf32> to vector<2x128xf32>
    %116 = arith.addf %113, %115 : vector<2x128xf32>
    %cst_54 = arith.constant 0.000000e+00 : f32
    %117 = vector.broadcast %cst_54 : f32 to vector<2x128xf32>
    %118 = arith.maximumf %116, %117 : vector<2x128xf32>
    %119 = tpu.concatenate %109, %118 in 0 : vector<8x128xf32>, vector<2x128xf32> -> vector<10x128xf32>
    %c0_55 = arith.constant 0 : index
    %c0_56 = arith.constant 0 : index
    %c0_57 = arith.constant 0 : index
    %120 = vector.load %arg14[%c0_55, %c0_56, %c0_57] : memref<1x10x128xf32, #tpu.memory_space<vmem>>, vector<1x10x128xf32>
    %121 = vector.shape_cast %120 : vector<1x10x128xf32> to vector<10x128xf32>
    %122 = vector.shape_cast %119 : vector<10x128xf32> to vector<1x10x128xf32>
    tpu.vector_store %arg14[%c0_55, %c0_56, %c0_57], %122 {strides = array<i32>} : memref<1x10x128xf32, #tpu.memory_space<vmem>>, vector<1x10x128xf32>,
    return
  }
  func.func @transform_0(%arg0: i32) -> (i32, i32) {
    %c0_i32 = arith.constant 0 : i32
    %c0_i32_0 = arith.constant 0 : i32
    %c0_i32_1 = arith.constant 0 : i32
    return %c0_i32, %c0_i32_0 : i32, i32
  }
  func.func @transform_1(%arg0: i32) -> (i32, i32, i32) {
    %c0_i32 = arith.constant 0 : i32
    %c0_i32_0 = arith.constant 0 : i32
    %c0_i32_1 = arith.constant 0 : i32
    return %arg0, %c0_i32, %c0_i32_0 : i32, i32, i32
  }
  func.func @transform_2(%arg0: i32) -> (i32, i32) {
    %c0_i32 = arith.constant 0 : i32
    %c0_i32_0 = arith.constant 0 : i32
    %c0_i32_1 = arith.constant 0 : i32
    return %c0_i32, %c0_i32_0 : i32, i32
  }
  func.func @transform_3(%arg0: i32) -> (i32, i32) {
    %c0_i32 = arith.constant 0 : i32
    %c0_i32_0 = arith.constant 0 : i32
    %c0_i32_1 = arith.constant 0 : i32
    return %c0_i32, %c0_i32_0 : i32, i32
  }
  func.func @transform_4(%arg0: i32) -> (i32, i32) {
    %c0_i32 = arith.constant 0 : i32
    %c0_i32_0 = arith.constant 0 : i32
    %c0_i32_1 = arith.constant 0 : i32
    return %c0_i32, %c0_i32_0 : i32, i32
  }
  func.func @transform_5(%arg0: i32) -> (i32, i32) {
    %c0_i32 = arith.constant 0 : i32
    %c0_i32_0 = arith.constant 0 : i32
    %c0_i32_1 = arith.constant 0 : i32
    return %c0_i32, %c0_i32_0 : i32, i32
  }
  func.func @transform_6(%arg0: i32) -> (i32, i32, i32) {
    %c0_i32 = arith.constant 0 : i32
    %c0_i32_0 = arith.constant 0 : i32
    %c0_i32_1 = arith.constant 0 : i32
    return %arg0, %c0_i32, %c0_i32_0 : i32, i32, i32
  }
  func.func @transform_7(%arg0: i32) -> (i32, i32) {
    %c0_i32 = arith.constant 0 : i32
    %c0_i32_0 = arith.constant 0 : i32
    %c0_i32_1 = arith.constant 0 : i32
    return %c0_i32, %c0_i32_0 : i32, i32
  }
  func.func @transform_8(%arg0: i32) -> (i32, i32) {
    %c0_i32 = arith.constant 0 : i32
    %c0_i32_0 = arith.constant 0 : i32
    %c0_i32_1 = arith.constant 0 : i32
    return %c0_i32, %c0_i32_0 : i32, i32
  }
  func.func @transform_9(%arg0: i32) -> (i32, i32) {
    %c0_i32 = arith.constant 0 : i32
    %c0_i32_0 = arith.constant 0 : i32
    %c0_i32_1 = arith.constant 0 : i32
    return %c0_i32, %c0_i32_0 : i32, i32
  }
  func.func @transform_10(%arg0: i32) -> (i32, i32) {
    %c0_i32 = arith.constant 0 : i32
    %c0_i32_0 = arith.constant 0 : i32
    %c0_i32_1 = arith.constant 0 : i32
    return %c0_i32, %c0_i32_0 : i32, i32
  }
  func.func @transform_11(%arg0: i32) -> (i32, i32) {
    %c0_i32 = arith.constant 0 : i32
    %c0_i32_0 = arith.constant 0 : i32
    %c0_i32_1 = arith.constant 0 : i32
    return %c0_i32, %c0_i32_0 : i32, i32
  }
  func.func @transform_12(%arg0: i32) -> (i32, i32, i32) {
    %c0_i32 = arith.constant 0 : i32
    %c0_i32_0 = arith.constant 0 : i32
    %c0_i32_1 = arith.constant 0 : i32
    return %arg0, %c0_i32, %c0_i32_0 : i32, i32, i32
  }
  func.func @transform_13(%arg0: i32) -> (i32, i32, i32) {
    %c0_i32 = arith.constant 0 : i32
    %c0_i32_0 = arith.constant 0 : i32
    %c0_i32_1 = arith.constant 0 : i32
    return %arg0, %c0_i32, %c0_i32_0 : i32, i32, i32
  }
  func.func @transform_14(%arg0: i32) -> (i32, i32, i32) {
    %c0_i32 = arith.constant 0 : i32
    %c0_i32_0 = arith.constant 0 : i32
    %c0_i32_1 = arith.constant 0 : i32
    return %arg0, %c0_i32, %c0_i32_0 : i32, i32, i32
  }
}

module attributes {stable_mosaic.version = 11 : i64} {
  func.func @_q2l_kernel(%arg0: i32, %arg1: i32, %arg2: memref<1x10x128xf32, #tpu.memory_space<vmem>>, %arg3: memref<1x5x64xf32, #tpu.memory_space<vmem>>, %arg4: memref<1x128x128xbf16, #tpu.memory_space<vmem>>, %arg5: memref<1x1x128xf32, #tpu.memory_space<vmem>>, %arg6: memref<1x64x256xbf16, #tpu.memory_space<vmem>>, %arg7: memref<1x1x256xf32, #tpu.memory_space<vmem>>, %arg8: memref<1x128x128xbf16, #tpu.memory_space<vmem>>, %arg9: memref<1x1x128xf32, #tpu.memory_space<vmem>>, %arg10: memref<1x1x128xf32, #tpu.memory_space<vmem>>, %arg11: memref<1x1x128xf32, #tpu.memory_space<vmem>>, %arg12: memref<1x128x512xbf16, #tpu.memory_space<vmem>>, %arg13: memref<1x1x512xf32, #tpu.memory_space<vmem>>, %arg14: memref<1x512x128xbf16, #tpu.memory_space<vmem>>, %arg15: memref<1x1x128xf32, #tpu.memory_space<vmem>>, %arg16: memref<1x1x128xf32, #tpu.memory_space<vmem>>, %arg17: memref<1x1x128xf32, #tpu.memory_space<vmem>>, %arg18: memref<1x10x128xf32, #tpu.memory_space<vmem>>) attributes {dimension_semantics = [#tpu.dimension_semantics<parallel>, #tpu.dimension_semantics<arbitrary>], iteration_bounds = array<i64: 2, 2>, scalar_prefetch = 0 : i64, scratch_operands = 0 : i64, tpu.core_type = #tpu.core_type<tc>, window_params = [{transform_indices = @transform_0, window_bounds = array<i64: 1, 10, 128>}, {transform_indices = @transform_1, window_bounds = array<i64: 1, 5, 64>}, {transform_indices = @transform_2, window_bounds = array<i64: 1, 128, 128>}, {transform_indices = @transform_3, window_bounds = array<i64: 1, 1, 128>}, {transform_indices = @transform_4, window_bounds = array<i64: 1, 64, 256>}, {transform_indices = @transform_5, window_bounds = array<i64: 1, 1, 256>}, {transform_indices = @transform_6, window_bounds = array<i64: 1, 128, 128>}, {transform_indices = @transform_7, window_bounds = array<i64: 1, 1, 128>}, {transform_indices = @transform_8, window_bounds = array<i64: 1, 1, 128>}, {transform_indices = @transform_9, window_bounds = array<i64: 1, 1, 128>}, {transform_indices = @transform_10, window_bounds = array<i64: 1, 128, 512>}, {transform_indices = @transform_11, window_bounds = array<i64: 1, 1, 512>}, {transform_indices = @transform_12, window_bounds = array<i64: 1, 512, 128>}, {transform_indices = @transform_13, window_bounds = array<i64: 1, 1, 128>}, {transform_indices = @transform_14, window_bounds = array<i64: 1, 1, 128>}, {transform_indices = @transform_15, window_bounds = array<i64: 1, 1, 128>}, {transform_indices = @transform_16, window_bounds = array<i64: 1, 10, 128>}]} {
    %c0_i32 = arith.constant 0 : i32
    %0 = arith.cmpi eq, %arg1, %c0_i32 : i32
    %1 = arith.extui %0 : i1 to i32
    %c0_i32_0 = arith.constant 0 : i32
    %2 = arith.cmpi ne, %1, %c0_i32_0 : i32
    scf.if %2 {
      %c0_88 = arith.constant 0 : index
      %c0_89 = arith.constant 0 : index
      %c0_90 = arith.constant 0 : index
      %203 = vector.load %arg2[%c0_88, %c0_89, %c0_90] : memref<1x10x128xf32, #tpu.memory_space<vmem>>, vector<1x10x128xf32>
      %c0_91 = arith.constant 0 : index
      %c0_92 = arith.constant 0 : index
      %c0_93 = arith.constant 0 : index
      %204 = vector.load %arg18[%c0_91, %c0_92, %c0_93] : memref<1x10x128xf32, #tpu.memory_space<vmem>>, vector<1x10x128xf32>
      tpu.vector_store %arg18[%c0_91, %c0_92, %c0_93], %203 {strides = array<i32>} : memref<1x10x128xf32, #tpu.memory_space<vmem>>, vector<1x10x128xf32>,
    } else {
    }
    %c0 = arith.constant 0 : index
    %c0_1 = arith.constant 0 : index
    %c0_2 = arith.constant 0 : index
    %3 = vector.load %arg18[%c0, %c0_1, %c0_2] : memref<1x10x128xf32, #tpu.memory_space<vmem>>, vector<1x10x128xf32>
    %4 = vector.shape_cast %3 : vector<1x10x128xf32> to vector<10x128xf32>
    %c0_3 = arith.constant 0 : index
    %c0_4 = arith.constant 0 : index
    %c0_5 = arith.constant 0 : index
    %5 = vector.load %arg3[%c0_3, %c0_4, %c0_5] : memref<1x5x64xf32, #tpu.memory_space<vmem>>, vector<1x5x64xf32>
    %6 = vector.shape_cast %5 : vector<1x5x64xf32> to vector<5x64xf32>
    %7 = arith.truncf %6 : vector<5x64xf32> to vector<5x64xbf16>
    %8 = arith.truncf %4 : vector<10x128xf32> to vector<10x128xbf16>
    %c0_6 = arith.constant 0 : index
    %c0_7 = arith.constant 0 : index
    %c0_8 = arith.constant 0 : index
    %9 = vector.load %arg4[%c0_6, %c0_7, %c0_8] : memref<1x128x128xbf16, #tpu.memory_space<vmem>>, vector<1x128x128xbf16>
    %10 = vector.shape_cast %9 : vector<1x128x128xbf16> to vector<128x128xbf16>
    %cst = arith.constant dense<0.000000e+00> : vector<10x128xf32>
    %11 = tpu.matmul %8, %10, %cst {dimension_numbers = #tpu.dot_dimension_numbers<[1], [0], [0], [1], [0, 0, 1, 1], [], []>} : vector<10x128xbf16>, vector<128x128xbf16>, vector<10x128xf32> -> vector<10x128xf32>
    %c0_9 = arith.constant 0 : index
    %c0_10 = arith.constant 0 : index
    %c0_11 = arith.constant 0 : index
    %12 = vector.load %arg5[%c0_9, %c0_10, %c0_11] : memref<1x1x128xf32, #tpu.memory_space<vmem>>, vector<1x1x128xf32>
    %13 = vector.shape_cast %12 : vector<1x1x128xf32> to vector<1x128xf32>
    %14 = vector.broadcast %13 : vector<1x128xf32> to vector<10x128xf32>
    %15 = arith.addf %11, %14 : vector<10x128xf32>
    %c0_12 = arith.constant 0 : index
    %c0_13 = arith.constant 0 : index
    %c0_14 = arith.constant 0 : index
    %16 = vector.load %arg6[%c0_12, %c0_13, %c0_14] : memref<1x64x256xbf16, #tpu.memory_space<vmem>>, vector<1x64x256xbf16>
    %17 = vector.shape_cast %16 : vector<1x64x256xbf16> to vector<64x256xbf16>
    %cst_15 = arith.constant dense<0.000000e+00> : vector<5x256xf32>
    %18 = tpu.matmul %7, %17, %cst_15 {dimension_numbers = #tpu.dot_dimension_numbers<[1], [0], [0], [1], [0, 0, 1, 1], [], []>} : vector<5x64xbf16>, vector<64x256xbf16>, vector<5x256xf32> -> vector<5x256xf32>
    %c0_16 = arith.constant 0 : index
    %c0_17 = arith.constant 0 : index
    %c0_18 = arith.constant 0 : index
    %19 = vector.load %arg7[%c0_16, %c0_17, %c0_18] : memref<1x1x256xf32, #tpu.memory_space<vmem>>, vector<1x1x256xf32>
    %20 = vector.shape_cast %19 : vector<1x1x256xf32> to vector<1x256xf32>
    %21 = vector.broadcast %20 : vector<1x256xf32> to vector<5x256xf32>
    %22 = arith.addf %18, %21 : vector<5x256xf32>
    %23 = vector.extract_strided_slice %22 {offsets = [0, 0], sizes = [5, 128], strides = [1, 1]} : vector<5x256xf32> to vector<5x128xf32>
    %24 = vector.extract_strided_slice %22 {offsets = [0, 128], sizes = [5, 128], strides = [1, 1]} : vector<5x256xf32> to vector<5x128xf32>
    %25 = vector.extract_strided_slice %15 {offsets = [0, 0], sizes = [10, 32], strides = [1, 1]} : vector<10x128xf32> to vector<10x32xf32>
    %26 = arith.truncf %25 : vector<10x32xf32> to vector<10x32xbf16>
    %27 = vector.extract_strided_slice %23 {offsets = [0, 0], sizes = [5, 32], strides = [1, 1]} : vector<5x128xf32> to vector<5x32xf32>
    %28 = arith.truncf %27 : vector<5x32xf32> to vector<5x32xbf16>
    %29 = vector.extract_strided_slice %24 {offsets = [0, 0], sizes = [5, 32], strides = [1, 1]} : vector<5x128xf32> to vector<5x32xf32>
    %30 = arith.truncf %29 : vector<5x32xf32> to vector<5x32xbf16>
    %cst_19 = arith.constant dense<0.000000e+00> : vector<10x5xf32>
    %31 = tpu.matmul %26, %28, %cst_19 {dimension_numbers = #tpu.dot_dimension_numbers<[1], [1], [0], [0], [0, 0, 1, 0], [], []>} : vector<10x32xbf16>, vector<5x32xbf16>, vector<10x5xf32> -> vector<10x5xf32>
    %cst_20 = arith.constant 0.176776692 : f32
    %32 = vector.broadcast %cst_20 : f32 to vector<10x5xf32>
    %33 = arith.mulf %31, %32 : vector<10x5xf32>
    %cst_21 = arith.constant dense<0xFF800000> : vector<10xf32>
    %34 = vector.multi_reduction <maximumf>, %33, %cst_21 [1] : vector<10x5xf32> to vector<10xf32>
    %35 = vector.shape_cast %34 : vector<10xf32> to vector<10x1xf32>
    %36 = vector.broadcast %35 : vector<10x1xf32> to vector<10x5xf32>
    %37 = arith.subf %33, %36 : vector<10x5xf32>
    %38 = math.exp %37 : vector<10x5xf32>
    %cst_22 = arith.constant dense<0.000000e+00> : vector<10xf32>
    %39 = vector.multi_reduction <add>, %38, %cst_22 [1] : vector<10x5xf32> to vector<10xf32>
    %40 = vector.shape_cast %39 : vector<10xf32> to vector<10x1xf32>
    %41 = tpu.reciprocal %40 {approx = true} : vector<10x1xf32> -> vector<10x1xf32>
    %42 = vector.broadcast %41 : vector<10x1xf32> to vector<10x5xf32>
    %43 = arith.mulf %38, %42 : vector<10x5xf32>
    %44 = arith.truncf %43 : vector<10x5xf32> to vector<10x5xbf16>
    %cst_23 = arith.constant dense<0.000000e+00> : vector<10x32xf32>
    %45 = tpu.matmul %44, %30, %cst_23 {dimension_numbers = #tpu.dot_dimension_numbers<[1], [0], [0], [1], [0, 0, 1, 1], [], []>} : vector<10x5xbf16>, vector<5x32xbf16>, vector<10x32xf32> -> vector<10x32xf32>
    %46 = vector.extract_strided_slice %15 {offsets = [0, 32], sizes = [10, 32], strides = [1, 1]} : vector<10x128xf32> to vector<10x32xf32>
    %47 = arith.truncf %46 : vector<10x32xf32> to vector<10x32xbf16>
    %48 = vector.extract_strided_slice %23 {offsets = [0, 32], sizes = [5, 32], strides = [1, 1]} : vector<5x128xf32> to vector<5x32xf32>
    %49 = arith.truncf %48 : vector<5x32xf32> to vector<5x32xbf16>
    %50 = vector.extract_strided_slice %24 {offsets = [0, 32], sizes = [5, 32], strides = [1, 1]} : vector<5x128xf32> to vector<5x32xf32>
    %51 = arith.truncf %50 : vector<5x32xf32> to vector<5x32xbf16>
    %cst_24 = arith.constant dense<0.000000e+00> : vector<10x5xf32>
    %52 = tpu.matmul %47, %49, %cst_24 {dimension_numbers = #tpu.dot_dimension_numbers<[1], [1], [0], [0], [0, 0, 1, 0], [], []>} : vector<10x32xbf16>, vector<5x32xbf16>, vector<10x5xf32> -> vector<10x5xf32>
    %cst_25 = arith.constant 0.176776692 : f32
    %53 = vector.broadcast %cst_25 : f32 to vector<10x5xf32>
    %54 = arith.mulf %52, %53 : vector<10x5xf32>
    %cst_26 = arith.constant dense<0xFF800000> : vector<10xf32>
    %55 = vector.multi_reduction <maximumf>, %54, %cst_26 [1] : vector<10x5xf32> to vector<10xf32>
    %56 = vector.shape_cast %55 : vector<10xf32> to vector<10x1xf32>
    %57 = vector.broadcast %56 : vector<10x1xf32> to vector<10x5xf32>
    %58 = arith.subf %54, %57 : vector<10x5xf32>
    %59 = math.exp %58 : vector<10x5xf32>
    %cst_27 = arith.constant dense<0.000000e+00> : vector<10xf32>
    %60 = vector.multi_reduction <add>, %59, %cst_27 [1] : vector<10x5xf32> to vector<10xf32>
    %61 = vector.shape_cast %60 : vector<10xf32> to vector<10x1xf32>
    %62 = tpu.reciprocal %61 {approx = true} : vector<10x1xf32> -> vector<10x1xf32>
    %63 = vector.broadcast %62 : vector<10x1xf32> to vector<10x5xf32>
    %64 = arith.mulf %59, %63 : vector<10x5xf32>
    %65 = arith.truncf %64 : vector<10x5xf32> to vector<10x5xbf16>
    %cst_28 = arith.constant dense<0.000000e+00> : vector<10x32xf32>
    %66 = tpu.matmul %65, %51, %cst_28 {dimension_numbers = #tpu.dot_dimension_numbers<[1], [0], [0], [1], [0, 0, 1, 1], [], []>} : vector<10x5xbf16>, vector<5x32xbf16>, vector<10x32xf32> -> vector<10x32xf32>
    %67 = vector.extract_strided_slice %15 {offsets = [0, 64], sizes = [10, 32], strides = [1, 1]} : vector<10x128xf32> to vector<10x32xf32>
    %68 = arith.truncf %67 : vector<10x32xf32> to vector<10x32xbf16>
    %69 = vector.extract_strided_slice %23 {offsets = [0, 64], sizes = [5, 32], strides = [1, 1]} : vector<5x128xf32> to vector<5x32xf32>
    %70 = arith.truncf %69 : vector<5x32xf32> to vector<5x32xbf16>
    %71 = vector.extract_strided_slice %24 {offsets = [0, 64], sizes = [5, 32], strides = [1, 1]} : vector<5x128xf32> to vector<5x32xf32>
    %72 = arith.truncf %71 : vector<5x32xf32> to vector<5x32xbf16>
    %cst_29 = arith.constant dense<0.000000e+00> : vector<10x5xf32>
    %73 = tpu.matmul %68, %70, %cst_29 {dimension_numbers = #tpu.dot_dimension_numbers<[1], [1], [0], [0], [0, 0, 1, 0], [], []>} : vector<10x32xbf16>, vector<5x32xbf16>, vector<10x5xf32> -> vector<10x5xf32>
    %cst_30 = arith.constant 0.176776692 : f32
    %74 = vector.broadcast %cst_30 : f32 to vector<10x5xf32>
    %75 = arith.mulf %73, %74 : vector<10x5xf32>
    %cst_31 = arith.constant dense<0xFF800000> : vector<10xf32>
    %76 = vector.multi_reduction <maximumf>, %75, %cst_31 [1] : vector<10x5xf32> to vector<10xf32>
    %77 = vector.shape_cast %76 : vector<10xf32> to vector<10x1xf32>
    %78 = vector.broadcast %77 : vector<10x1xf32> to vector<10x5xf32>
    %79 = arith.subf %75, %78 : vector<10x5xf32>
    %80 = math.exp %79 : vector<10x5xf32>
    %cst_32 = arith.constant dense<0.000000e+00> : vector<10xf32>
    %81 = vector.multi_reduction <add>, %80, %cst_32 [1] : vector<10x5xf32> to vector<10xf32>
    %82 = vector.shape_cast %81 : vector<10xf32> to vector<10x1xf32>
    %83 = tpu.reciprocal %82 {approx = true} : vector<10x1xf32> -> vector<10x1xf32>
    %84 = vector.broadcast %83 : vector<10x1xf32> to vector<10x5xf32>
    %85 = arith.mulf %80, %84 : vector<10x5xf32>
    %86 = arith.truncf %85 : vector<10x5xf32> to vector<10x5xbf16>
    %cst_33 = arith.constant dense<0.000000e+00> : vector<10x32xf32>
    %87 = tpu.matmul %86, %72, %cst_33 {dimension_numbers = #tpu.dot_dimension_numbers<[1], [0], [0], [1], [0, 0, 1, 1], [], []>} : vector<10x5xbf16>, vector<5x32xbf16>, vector<10x32xf32> -> vector<10x32xf32>
    %88 = vector.extract_strided_slice %15 {offsets = [0, 96], sizes = [10, 32], strides = [1, 1]} : vector<10x128xf32> to vector<10x32xf32>
    %89 = arith.truncf %88 : vector<10x32xf32> to vector<10x32xbf16>
    %90 = vector.extract_strided_slice %23 {offsets = [0, 96], sizes = [5, 32], strides = [1, 1]} : vector<5x128xf32> to vector<5x32xf32>
    %91 = arith.truncf %90 : vector<5x32xf32> to vector<5x32xbf16>
    %92 = vector.extract_strided_slice %24 {offsets = [0, 96], sizes = [5, 32], strides = [1, 1]} : vector<5x128xf32> to vector<5x32xf32>
    %93 = arith.truncf %92 : vector<5x32xf32> to vector<5x32xbf16>
    %cst_34 = arith.constant dense<0.000000e+00> : vector<10x5xf32>
    %94 = tpu.matmul %89, %91, %cst_34 {dimension_numbers = #tpu.dot_dimension_numbers<[1], [1], [0], [0], [0, 0, 1, 0], [], []>} : vector<10x32xbf16>, vector<5x32xbf16>, vector<10x5xf32> -> vector<10x5xf32>
    %cst_35 = arith.constant 0.176776692 : f32
    %95 = vector.broadcast %cst_35 : f32 to vector<10x5xf32>
    %96 = arith.mulf %94, %95 : vector<10x5xf32>
    %cst_36 = arith.constant dense<0xFF800000> : vector<10xf32>
    %97 = vector.multi_reduction <maximumf>, %96, %cst_36 [1] : vector<10x5xf32> to vector<10xf32>
    %98 = vector.shape_cast %97 : vector<10xf32> to vector<10x1xf32>
    %99 = vector.broadcast %98 : vector<10x1xf32> to vector<10x5xf32>
    %100 = arith.subf %96, %99 : vector<10x5xf32>
    %101 = math.exp %100 : vector<10x5xf32>
    %cst_37 = arith.constant dense<0.000000e+00> : vector<10xf32>
    %102 = vector.multi_reduction <add>, %101, %cst_37 [1] : vector<10x5xf32> to vector<10xf32>
    %103 = vector.shape_cast %102 : vector<10xf32> to vector<10x1xf32>
    %104 = tpu.reciprocal %103 {approx = true} : vector<10x1xf32> -> vector<10x1xf32>
    %105 = vector.broadcast %104 : vector<10x1xf32> to vector<10x5xf32>
    %106 = arith.mulf %101, %105 : vector<10x5xf32>
    %107 = arith.truncf %106 : vector<10x5xf32> to vector<10x5xbf16>
    %cst_38 = arith.constant dense<0.000000e+00> : vector<10x32xf32>
    %108 = tpu.matmul %107, %93, %cst_38 {dimension_numbers = #tpu.dot_dimension_numbers<[1], [0], [0], [1], [0, 0, 1, 1], [], []>} : vector<10x5xbf16>, vector<5x32xbf16>, vector<10x32xf32> -> vector<10x32xf32>
    %109 = tpu.concatenate %45, %66, %87, %108 in 1 : vector<10x32xf32>, vector<10x32xf32>, vector<10x32xf32>, vector<10x32xf32> -> vector<10x128xf32>
    %110 = arith.truncf %109 : vector<10x128xf32> to vector<10x128xbf16>
    %c0_39 = arith.constant 0 : index
    %c0_40 = arith.constant 0 : index
    %c0_41 = arith.constant 0 : index
    %111 = vector.load %arg8[%c0_39, %c0_40, %c0_41] : memref<1x128x128xbf16, #tpu.memory_space<vmem>>, vector<1x128x128xbf16>
    %112 = vector.shape_cast %111 : vector<1x128x128xbf16> to vector<128x128xbf16>
    %cst_42 = arith.constant dense<0.000000e+00> : vector<10x128xf32>
    %113 = tpu.matmul %110, %112, %cst_42 {dimension_numbers = #tpu.dot_dimension_numbers<[1], [0], [0], [1], [0, 0, 1, 1], [], []>} : vector<10x128xbf16>, vector<128x128xbf16>, vector<10x128xf32> -> vector<10x128xf32>
    %c0_43 = arith.constant 0 : index
    %c0_44 = arith.constant 0 : index
    %c0_45 = arith.constant 0 : index
    %114 = vector.load %arg9[%c0_43, %c0_44, %c0_45] : memref<1x1x128xf32, #tpu.memory_space<vmem>>, vector<1x1x128xf32>
    %115 = vector.shape_cast %114 : vector<1x1x128xf32> to vector<1x128xf32>
    %116 = vector.broadcast %115 : vector<1x128xf32> to vector<10x128xf32>
    %117 = arith.addf %113, %116 : vector<10x128xf32>
    %118 = arith.addf %117, %4 : vector<10x128xf32>
    %c0_46 = arith.constant 0 : index
    %c0_47 = arith.constant 0 : index
    %c0_48 = arith.constant 0 : index
    %119 = vector.load %arg10[%c0_46, %c0_47, %c0_48] : memref<1x1x128xf32, #tpu.memory_space<vmem>>, vector<1x1x128xf32>
    %120 = vector.shape_cast %119 : vector<1x1x128xf32> to vector<1x128xf32>
    %c0_49 = arith.constant 0 : index
    %c0_50 = arith.constant 0 : index
    %c0_51 = arith.constant 0 : index
    %121 = vector.load %arg11[%c0_49, %c0_50, %c0_51] : memref<1x1x128xf32, #tpu.memory_space<vmem>>, vector<1x1x128xf32>
    %122 = vector.shape_cast %121 : vector<1x1x128xf32> to vector<1x128xf32>
    %cst_52 = arith.constant dense<0.000000e+00> : vector<10xf32>
    %123 = vector.multi_reduction <add>, %118, %cst_52 [1] : vector<10x128xf32> to vector<10xf32>
    %124 = vector.shape_cast %123 : vector<10xf32> to vector<10x1xf32>
    %cst_53 = arith.constant 1.280000e+02 : f32
    %125 = vector.broadcast %cst_53 : f32 to vector<10x1xf32>
    %126 = arith.divf %124, %125 : vector<10x1xf32>
    %127 = vector.broadcast %126 : vector<10x1xf32> to vector<10x128xf32>
    %128 = arith.subf %118, %127 : vector<10x128xf32>
    %129 = vector.broadcast %126 : vector<10x1xf32> to vector<10x128xf32>
    %130 = arith.subf %118, %129 : vector<10x128xf32>
    %131 = arith.mulf %128, %130 : vector<10x128xf32>
    %cst_54 = arith.constant dense<0.000000e+00> : vector<10xf32>
    %132 = vector.multi_reduction <add>, %131, %cst_54 [1] : vector<10x128xf32> to vector<10xf32>
    %133 = vector.shape_cast %132 : vector<10xf32> to vector<10x1xf32>
    %cst_55 = arith.constant 1.280000e+02 : f32
    %134 = vector.broadcast %cst_55 : f32 to vector<10x1xf32>
    %135 = arith.divf %133, %134 : vector<10x1xf32>
    %136 = vector.broadcast %126 : vector<10x1xf32> to vector<10x128xf32>
    %137 = arith.subf %118, %136 : vector<10x128xf32>
    %cst_56 = arith.constant 9.99999996E-13 : f32
    %138 = vector.broadcast %cst_56 : f32 to vector<10x1xf32>
    %139 = arith.addf %135, %138 : vector<10x1xf32>
    %140 = math.rsqrt %139 : vector<10x1xf32>
    %141 = vector.broadcast %140 : vector<10x1xf32> to vector<10x128xf32>
    %142 = arith.mulf %137, %141 : vector<10x128xf32>
    %143 = vector.broadcast %120 : vector<1x128xf32> to vector<10x128xf32>
    %144 = arith.mulf %142, %143 : vector<10x128xf32>
    %145 = vector.broadcast %122 : vector<1x128xf32> to vector<10x128xf32>
    %146 = arith.addf %144, %145 : vector<10x128xf32>
    %147 = arith.truncf %146 : vector<10x128xf32> to vector<10x128xbf16>
    %c0_57 = arith.constant 0 : index
    %c0_58 = arith.constant 0 : index
    %c0_59 = arith.constant 0 : index
    %148 = vector.load %arg12[%c0_57, %c0_58, %c0_59] : memref<1x128x512xbf16, #tpu.memory_space<vmem>>, vector<1x128x512xbf16>
    %149 = vector.shape_cast %148 : vector<1x128x512xbf16> to vector<128x512xbf16>
    %cst_60 = arith.constant dense<0.000000e+00> : vector<10x512xf32>
    %150 = tpu.matmul %147, %149, %cst_60 {dimension_numbers = #tpu.dot_dimension_numbers<[1], [0], [0], [1], [0, 0, 1, 1], [], []>} : vector<10x128xbf16>, vector<128x512xbf16>, vector<10x512xf32> -> vector<10x512xf32>
    %c0_61 = arith.constant 0 : index
    %c0_62 = arith.constant 0 : index
    %c0_63 = arith.constant 0 : index
    %151 = vector.load %arg13[%c0_61, %c0_62, %c0_63] : memref<1x1x512xf32, #tpu.memory_space<vmem>>, vector<1x1x512xf32>
    %152 = vector.shape_cast %151 : vector<1x1x512xf32> to vector<1x512xf32>
    %153 = vector.broadcast %152 : vector<1x512xf32> to vector<10x512xf32>
    %154 = arith.addf %150, %153 : vector<10x512xf32>
    %cst_64 = arith.constant 5.000000e-01 : f32
    %155 = vector.broadcast %cst_64 : f32 to vector<10x512xf32>
    %156 = arith.mulf %155, %154 : vector<10x512xf32>
    %cst_65 = arith.constant 0.707106769 : f32
    %157 = vector.broadcast %cst_65 : f32 to vector<10x512xf32>
    %158 = arith.mulf %154, %157 : vector<10x512xf32>
    %159 = math.erf %158 : vector<10x512xf32>
    %cst_66 = arith.constant 1.000000e+00 : f32
    %160 = vector.broadcast %cst_66 : f32 to vector<10x512xf32>
    %161 = arith.addf %160, %159 : vector<10x512xf32>
    %162 = arith.mulf %156, %161 : vector<10x512xf32>
    %163 = arith.truncf %162 : vector<10x512xf32> to vector<10x512xbf16>
    %c0_67 = arith.constant 0 : index
    %c0_68 = arith.constant 0 : index
    %c0_69 = arith.constant 0 : index
    %164 = vector.load %arg14[%c0_67, %c0_68, %c0_69] : memref<1x512x128xbf16, #tpu.memory_space<vmem>>, vector<1x512x128xbf16>
    %165 = vector.shape_cast %164 : vector<1x512x128xbf16> to vector<512x128xbf16>
    %cst_70 = arith.constant dense<0.000000e+00> : vector<10x128xf32>
    %166 = tpu.matmul %163, %165, %cst_70 {dimension_numbers = #tpu.dot_dimension_numbers<[1], [0], [0], [1], [0, 0, 1, 1], [], []>} : vector<10x512xbf16>, vector<512x128xbf16>, vector<10x128xf32> -> vector<10x128xf32>
    %c0_71 = arith.constant 0 : index
    %c0_72 = arith.constant 0 : index
    %c0_73 = arith.constant 0 : index
    %167 = vector.load %arg15[%c0_71, %c0_72, %c0_73] : memref<1x1x128xf32, #tpu.memory_space<vmem>>, vector<1x1x128xf32>
    %168 = vector.shape_cast %167 : vector<1x1x128xf32> to vector<1x128xf32>
    %169 = vector.broadcast %168 : vector<1x128xf32> to vector<10x128xf32>
    %170 = arith.addf %166, %169 : vector<10x128xf32>
    %171 = arith.addf %170, %146 : vector<10x128xf32>
    %c0_74 = arith.constant 0 : index
    %c0_75 = arith.constant 0 : index
    %c0_76 = arith.constant 0 : index
    %172 = vector.load %arg16[%c0_74, %c0_75, %c0_76] : memref<1x1x128xf32, #tpu.memory_space<vmem>>, vector<1x1x128xf32>
    %173 = vector.shape_cast %172 : vector<1x1x128xf32> to vector<1x128xf32>
    %c0_77 = arith.constant 0 : index
    %c0_78 = arith.constant 0 : index
    %c0_79 = arith.constant 0 : index
    %174 = vector.load %arg17[%c0_77, %c0_78, %c0_79] : memref<1x1x128xf32, #tpu.memory_space<vmem>>, vector<1x1x128xf32>
    %175 = vector.shape_cast %174 : vector<1x1x128xf32> to vector<1x128xf32>
    %cst_80 = arith.constant dense<0.000000e+00> : vector<10xf32>
    %176 = vector.multi_reduction <add>, %171, %cst_80 [1] : vector<10x128xf32> to vector<10xf32>
    %177 = vector.shape_cast %176 : vector<10xf32> to vector<10x1xf32>
    %cst_81 = arith.constant 1.280000e+02 : f32
    %178 = vector.broadcast %cst_81 : f32 to vector<10x1xf32>
    %179 = arith.divf %177, %178 : vector<10x1xf32>
    %180 = vector.broadcast %179 : vector<10x1xf32> to vector<10x128xf32>
    %181 = arith.subf %171, %180 : vector<10x128xf32>
    %182 = vector.broadcast %179 : vector<10x1xf32> to vector<10x128xf32>
    %183 = arith.subf %171, %182 : vector<10x128xf32>
    %184 = arith.mulf %181, %183 : vector<10x128xf32>
    %cst_82 = arith.constant dense<0.000000e+00> : vector<10xf32>
    %185 = vector.multi_reduction <add>, %184, %cst_82 [1] : vector<10x128xf32> to vector<10xf32>
    %186 = vector.shape_cast %185 : vector<10xf32> to vector<10x1xf32>
    %cst_83 = arith.constant 1.280000e+02 : f32
    %187 = vector.broadcast %cst_83 : f32 to vector<10x1xf32>
    %188 = arith.divf %186, %187 : vector<10x1xf32>
    %189 = vector.broadcast %179 : vector<10x1xf32> to vector<10x128xf32>
    %190 = arith.subf %171, %189 : vector<10x128xf32>
    %cst_84 = arith.constant 9.99999996E-13 : f32
    %191 = vector.broadcast %cst_84 : f32 to vector<10x1xf32>
    %192 = arith.addf %188, %191 : vector<10x1xf32>
    %193 = math.rsqrt %192 : vector<10x1xf32>
    %194 = vector.broadcast %193 : vector<10x1xf32> to vector<10x128xf32>
    %195 = arith.mulf %190, %194 : vector<10x128xf32>
    %196 = vector.broadcast %173 : vector<1x128xf32> to vector<10x128xf32>
    %197 = arith.mulf %195, %196 : vector<10x128xf32>
    %198 = vector.broadcast %175 : vector<1x128xf32> to vector<10x128xf32>
    %199 = arith.addf %197, %198 : vector<10x128xf32>
    %c0_85 = arith.constant 0 : index
    %c0_86 = arith.constant 0 : index
    %c0_87 = arith.constant 0 : index
    %200 = vector.load %arg18[%c0_85, %c0_86, %c0_87] : memref<1x10x128xf32, #tpu.memory_space<vmem>>, vector<1x10x128xf32>
    %201 = vector.shape_cast %200 : vector<1x10x128xf32> to vector<10x128xf32>
    %202 = vector.shape_cast %199 : vector<10x128xf32> to vector<1x10x128xf32>
    tpu.vector_store %arg18[%c0_85, %c0_86, %c0_87], %202 {strides = array<i32>} : memref<1x10x128xf32, #tpu.memory_space<vmem>>, vector<1x10x128xf32>,
    return
  }
  func.func @transform_0(%arg0: i32, %arg1: i32) -> (i32, i32, i32) {
    %c0_i32 = arith.constant 0 : i32
    %c0_i32_0 = arith.constant 0 : i32
    %c0_i32_1 = arith.constant 0 : i32
    return %arg0, %c0_i32, %c0_i32_0 : i32, i32, i32
  }
  func.func @transform_1(%arg0: i32, %arg1: i32) -> (i32, i32, i32) {
    %c0_i32 = arith.constant 0 : i32
    %c0_i32_0 = arith.constant 0 : i32
    %c0_i32_1 = arith.constant 0 : i32
    return %arg0, %c0_i32, %c0_i32_0 : i32, i32, i32
  }
  func.func @transform_2(%arg0: i32, %arg1: i32) -> (i32, i32, i32) {
    %c0_i32 = arith.constant 0 : i32
    %c0_i32_0 = arith.constant 0 : i32
    %c0_i32_1 = arith.constant 0 : i32
    return %arg1, %c0_i32, %c0_i32_0 : i32, i32, i32
  }
  func.func @transform_3(%arg0: i32, %arg1: i32) -> (i32, i32, i32) {
    %c0_i32 = arith.constant 0 : i32
    %c0_i32_0 = arith.constant 0 : i32
    %c0_i32_1 = arith.constant 0 : i32
    return %arg1, %c0_i32, %c0_i32_0 : i32, i32, i32
  }
  func.func @transform_4(%arg0: i32, %arg1: i32) -> (i32, i32, i32) {
    %c0_i32 = arith.constant 0 : i32
    %c0_i32_0 = arith.constant 0 : i32
    %c0_i32_1 = arith.constant 0 : i32
    return %arg1, %c0_i32, %c0_i32_0 : i32, i32, i32
  }
  func.func @transform_5(%arg0: i32, %arg1: i32) -> (i32, i32, i32) {
    %c0_i32 = arith.constant 0 : i32
    %c0_i32_0 = arith.constant 0 : i32
    %c0_i32_1 = arith.constant 0 : i32
    return %arg1, %c0_i32, %c0_i32_0 : i32, i32, i32
  }
  func.func @transform_6(%arg0: i32, %arg1: i32) -> (i32, i32, i32) {
    %c0_i32 = arith.constant 0 : i32
    %c0_i32_0 = arith.constant 0 : i32
    %c0_i32_1 = arith.constant 0 : i32
    return %arg1, %c0_i32, %c0_i32_0 : i32, i32, i32
  }
  func.func @transform_7(%arg0: i32, %arg1: i32) -> (i32, i32, i32) {
    %c0_i32 = arith.constant 0 : i32
    %c0_i32_0 = arith.constant 0 : i32
    %c0_i32_1 = arith.constant 0 : i32
    return %arg1, %c0_i32, %c0_i32_0 : i32, i32, i32
  }
  func.func @transform_8(%arg0: i32, %arg1: i32) -> (i32, i32, i32) {
    %c0_i32 = arith.constant 0 : i32
    %c0_i32_0 = arith.constant 0 : i32
    %c0_i32_1 = arith.constant 0 : i32
    return %arg1, %c0_i32, %c0_i32_0 : i32, i32, i32
  }
  func.func @transform_9(%arg0: i32, %arg1: i32) -> (i32, i32, i32) {
    %c0_i32 = arith.constant 0 : i32
    %c0_i32_0 = arith.constant 0 : i32
    %c0_i32_1 = arith.constant 0 : i32
    return %arg1, %c0_i32, %c0_i32_0 : i32, i32, i32
  }
  func.func @transform_10(%arg0: i32, %arg1: i32) -> (i32, i32, i32) {
    %c0_i32 = arith.constant 0 : i32
    %c0_i32_0 = arith.constant 0 : i32
    %c0_i32_1 = arith.constant 0 : i32
    return %arg1, %c0_i32, %c0_i32_0 : i32, i32, i32
  }
  func.func @transform_11(%arg0: i32, %arg1: i32) -> (i32, i32, i32) {
    %c0_i32 = arith.constant 0 : i32
    %c0_i32_0 = arith.constant 0 : i32
    %c0_i32_1 = arith.constant 0 : i32
    return %arg1, %c0_i32, %c0_i32_0 : i32, i32, i32
  }
  func.func @transform_12(%arg0: i32, %arg1: i32) -> (i32, i32, i32) {
    %c0_i32 = arith.constant 0 : i32
    %c0_i32_0 = arith.constant 0 : i32
    %c0_i32_1 = arith.constant 0 : i32
    return %arg1, %c0_i32, %c0_i32_0 : i32, i32, i32
  }
  func.func @transform_13(%arg0: i32, %arg1: i32) -> (i32, i32, i32) {
    %c0_i32 = arith.constant 0 : i32
    %c0_i32_0 = arith.constant 0 : i32
    %c0_i32_1 = arith.constant 0 : i32
    return %arg1, %c0_i32, %c0_i32_0 : i32, i32, i32
  }
  func.func @transform_14(%arg0: i32, %arg1: i32) -> (i32, i32, i32) {
    %c0_i32 = arith.constant 0 : i32
    %c0_i32_0 = arith.constant 0 : i32
    %c0_i32_1 = arith.constant 0 : i32
    return %arg1, %c0_i32, %c0_i32_0 : i32, i32, i32
  }
  func.func @transform_15(%arg0: i32, %arg1: i32) -> (i32, i32, i32) {
    %c0_i32 = arith.constant 0 : i32
    %c0_i32_0 = arith.constant 0 : i32
    %c0_i32_1 = arith.constant 0 : i32
    return %arg1, %c0_i32, %c0_i32_0 : i32, i32, i32
  }
  func.func @transform_16(%arg0: i32, %arg1: i32) -> (i32, i32, i32) {
    %c0_i32 = arith.constant 0 : i32
    %c0_i32_0 = arith.constant 0 : i32
    %c0_i32_1 = arith.constant 0 : i32
    return %arg0, %c0_i32, %c0_i32_0 : i32, i32, i32
  }
}

module attributes {stable_mosaic.version = 11 : i64} {
  func.func @_fc_loss_kernel(%arg0: i32, %arg1: memref<1x10x128xf32, #tpu.memory_space<vmem>>, %arg2: memref<128x1xbf16, #tpu.memory_space<vmem>>, %arg3: memref<1x1xf32, #tpu.memory_space<vmem>>, %arg4: memref<1x10x1xf32, #tpu.memory_space<vmem>>, %arg5: memref<1x1x1xf32, #tpu.memory_space<vmem>>, %arg6: memref<1x1x1xf32, #tpu.memory_space<vmem>>) attributes {dimension_semantics = [#tpu.dimension_semantics<parallel>], iteration_bounds = array<i64: 2>, scalar_prefetch = 0 : i64, scratch_operands = 0 : i64, tpu.core_type = #tpu.core_type<tc>, window_params = [{transform_indices = @transform_0, window_bounds = array<i64: 1, 10, 128>}, {pipeline_mode = #tpu.pipeline_mode<synchronous>, transform_indices = @transform_1, window_bounds = array<i64: 128, 1>}, {pipeline_mode = #tpu.pipeline_mode<synchronous>, transform_indices = @transform_2, window_bounds = array<i64: 1, 1>}, {transform_indices = @transform_3, window_bounds = array<i64: 1, 10, 1>}, {transform_indices = @transform_4, window_bounds = array<i64: 1, 1, 1>}, {transform_indices = @transform_5, window_bounds = array<i64: 1, 1, 1>}]} {
    %c0 = arith.constant 0 : index
    %c0_0 = arith.constant 0 : index
    %c0_1 = arith.constant 0 : index
    %0 = vector.load %arg1[%c0, %c0_0, %c0_1] : memref<1x10x128xf32, #tpu.memory_space<vmem>>, vector<1x10x128xf32>
    %1 = vector.shape_cast %0 : vector<1x10x128xf32> to vector<10x128xf32>
    %2 = arith.truncf %1 : vector<10x128xf32> to vector<10x128xbf16>
    %c0_2 = arith.constant 0 : index
    %c0_3 = arith.constant 0 : index
    %3 = vector.load %arg2[%c0_2, %c0_3] : memref<128x1xbf16, #tpu.memory_space<vmem>>, vector<128x1xbf16>
    %cst = arith.constant dense<0.000000e+00> : vector<10x1xf32>
    %4 = tpu.matmul %2, %3, %cst {dimension_numbers = #tpu.dot_dimension_numbers<[1], [0], [0], [1], [0, 0, 1, 1], [], []>} : vector<10x128xbf16>, vector<128x1xbf16>, vector<10x1xf32> -> vector<10x1xf32>
    %c0_4 = arith.constant 0 : index
    %c0_5 = arith.constant 0 : index
    %5 = vector.load %arg3[%c0_4, %c0_5] : memref<1x1xf32, #tpu.memory_space<vmem>>, vector<1x1xf32>
    %6 = vector.broadcast %5 : vector<1x1xf32> to vector<10x1xf32>
    %7 = arith.addf %4, %6 : vector<10x1xf32>
    %8 = tpu.iota {dimensions = array<i32: 0>} : vector<10x1xi32>
    %c8_i32 = arith.constant 8 : i32
    %9 = vector.broadcast %c8_i32 : i32 to vector<10x1xi32>
    %10 = arith.cmpi slt, %8, %9 : vector<10x1xi32>
    %c0_6 = arith.constant 0 : index
    %c0_7 = arith.constant 0 : index
    %c0_8 = arith.constant 0 : index
    %11 = vector.load %arg4[%c0_6, %c0_7, %c0_8] : memref<1x10x1xf32, #tpu.memory_space<vmem>>, vector<1x10x1xf32>
    %12 = vector.shape_cast %11 : vector<1x10x1xf32> to vector<10x1xf32>
    %c8_i32_9 = arith.constant 8 : i32
    %13 = vector.broadcast %c8_i32_9 : i32 to vector<10x1xi32>
    %14 = arith.subi %8, %13 : vector<10x1xi32>
    %15 = vector.broadcast %arg0 : i32 to vector<10x1xi32>
    %16 = arith.cmpi eq, %14, %15 : vector<10x1xi32>
    %17 = arith.extui %16 : vector<10x1xi1> to vector<10x1xi32>
    %18 = arith.sitofp %17 : vector<10x1xi32> to vector<10x1xf32>
    %19 = arith.negf %7 : vector<10x1xf32>
    %20 = math.exp %19 : vector<10x1xf32>
    %cst_10 = arith.constant 1.000000e+00 : f32
    %21 = vector.broadcast %cst_10 : f32 to vector<10x1xf32>
    %22 = arith.addf %21, %20 : vector<10x1xf32>
    %23 = arith.divf %21, %22 : vector<10x1xf32>
    %cst_11 = arith.constant 1.000000e+00 : f32
    %24 = vector.broadcast %cst_11 : f32 to vector<10x1xf32>
    %25 = arith.subf %24, %23 : vector<10x1xf32>
    %cst_12 = arith.constant 5.000000e-02 : f32
    %26 = vector.broadcast %cst_12 : f32 to vector<10x1xf32>
    %27 = arith.addf %25, %26 : vector<10x1xf32>
    %cst_13 = arith.constant 1.000000e+00 : f32
    %28 = vector.broadcast %cst_13 : f32 to vector<10x1xf32>
    %29 = arith.minimumf %27, %28 : vector<10x1xf32>
    %cst_14 = arith.constant 9.99999993E-9 : f32
    %30 = vector.broadcast %cst_14 : f32 to vector<10x1xf32>
    %31 = arith.maximumf %23, %30 : vector<10x1xf32>
    %32 = math.log %31 : vector<10x1xf32>
    %33 = arith.mulf %12, %32 : vector<10x1xf32>
    %cst_15 = arith.constant 1.000000e+00 : f32
    %34 = vector.broadcast %cst_15 : f32 to vector<10x1xf32>
    %35 = arith.subf %34, %12 : vector<10x1xf32>
    %cst_16 = arith.constant 9.99999993E-9 : f32
    %36 = vector.broadcast %cst_16 : f32 to vector<10x1xf32>
    %37 = arith.maximumf %29, %36 : vector<10x1xf32>
    %38 = math.log %37 : vector<10x1xf32>
    %39 = arith.mulf %35, %38 : vector<10x1xf32>
    %40 = arith.addf %33, %39 : vector<10x1xf32>
    %41 = arith.mulf %23, %12 : vector<10x1xf32>
    %cst_17 = arith.constant 1.000000e+00 : f32
    %42 = vector.broadcast %cst_17 : f32 to vector<10x1xf32>
    %43 = arith.subf %42, %12 : vector<10x1xf32>
    %44 = arith.mulf %29, %43 : vector<10x1xf32>
    %45 = arith.addf %41, %44 : vector<10x1xf32>
    %cst_18 = arith.constant 0.000000e+00 : f32
    %46 = vector.broadcast %cst_18 : f32 to vector<10x1xf32>
    %47 = arith.mulf %46, %12 : vector<10x1xf32>
    %cst_19 = arith.constant 1.000000e+00 : f32
    %48 = vector.broadcast %cst_19 : f32 to vector<10x1xf32>
    %49 = arith.subf %48, %12 : vector<10x1xf32>
    %cst_20 = arith.constant 7.000000e+00 : f32
    %50 = vector.broadcast %cst_20 : f32 to vector<10x1xf32>
    %51 = arith.mulf %50, %49 : vector<10x1xf32>
    %52 = arith.addf %47, %51 : vector<10x1xf32>
    %cst_21 = arith.constant 1.000000e+00 : f32
    %53 = vector.broadcast %cst_21 : f32 to vector<10x1xf32>
    %54 = arith.subf %53, %45 : vector<10x1xf32>
    %cst_22 = arith.constant 9.99999993E-9 : f32
    %55 = vector.broadcast %cst_22 : f32 to vector<10x1xf32>
    %56 = arith.maximumf %54, %55 : vector<10x1xf32>
    %57 = math.log %56 : vector<10x1xf32>
    %58 = arith.mulf %52, %57 : vector<10x1xf32>
    %59 = math.exp %58 : vector<10x1xf32>
    %60 = arith.mulf %40, %59 : vector<10x1xf32>
    %61 = arith.negf %7 : vector<10x1xf32>
    %62 = math.exp %61 : vector<10x1xf32>
    %cst_23 = arith.constant 1.000000e+00 : f32
    %63 = vector.broadcast %cst_23 : f32 to vector<10x1xf32>
    %64 = arith.addf %63, %62 : vector<10x1xf32>
    %65 = arith.divf %63, %64 : vector<10x1xf32>
    %cst_24 = arith.constant 1.000000e+00 : f32
    %66 = vector.broadcast %cst_24 : f32 to vector<10x1xf32>
    %67 = arith.subf %66, %65 : vector<10x1xf32>
    %cst_25 = arith.constant 5.000000e-02 : f32
    %68 = vector.broadcast %cst_25 : f32 to vector<10x1xf32>
    %69 = arith.addf %67, %68 : vector<10x1xf32>
    %cst_26 = arith.constant 1.000000e+00 : f32
    %70 = vector.broadcast %cst_26 : f32 to vector<10x1xf32>
    %71 = arith.minimumf %69, %70 : vector<10x1xf32>
    %cst_27 = arith.constant 9.99999993E-9 : f32
    %72 = vector.broadcast %cst_27 : f32 to vector<10x1xf32>
    %73 = arith.maximumf %65, %72 : vector<10x1xf32>
    %74 = math.log %73 : vector<10x1xf32>
    %75 = arith.mulf %18, %74 : vector<10x1xf32>
    %cst_28 = arith.constant 1.000000e+00 : f32
    %76 = vector.broadcast %cst_28 : f32 to vector<10x1xf32>
    %77 = arith.subf %76, %18 : vector<10x1xf32>
    %cst_29 = arith.constant 9.99999993E-9 : f32
    %78 = vector.broadcast %cst_29 : f32 to vector<10x1xf32>
    %79 = arith.maximumf %71, %78 : vector<10x1xf32>
    %80 = math.log %79 : vector<10x1xf32>
    %81 = arith.mulf %77, %80 : vector<10x1xf32>
    %82 = arith.addf %75, %81 : vector<10x1xf32>
    %83 = arith.mulf %65, %18 : vector<10x1xf32>
    %cst_30 = arith.constant 1.000000e+00 : f32
    %84 = vector.broadcast %cst_30 : f32 to vector<10x1xf32>
    %85 = arith.subf %84, %18 : vector<10x1xf32>
    %86 = arith.mulf %71, %85 : vector<10x1xf32>
    %87 = arith.addf %83, %86 : vector<10x1xf32>
    %cst_31 = arith.constant 0.000000e+00 : f32
    %88 = vector.broadcast %cst_31 : f32 to vector<10x1xf32>
    %89 = arith.mulf %88, %18 : vector<10x1xf32>
    %cst_32 = arith.constant 1.000000e+00 : f32
    %90 = vector.broadcast %cst_32 : f32 to vector<10x1xf32>
    %91 = arith.subf %90, %18 : vector<10x1xf32>
    %cst_33 = arith.constant 4.000000e+00 : f32
    %92 = vector.broadcast %cst_33 : f32 to vector<10x1xf32>
    %93 = arith.mulf %92, %91 : vector<10x1xf32>
    %94 = arith.addf %89, %93 : vector<10x1xf32>
    %cst_34 = arith.constant 1.000000e+00 : f32
    %95 = vector.broadcast %cst_34 : f32 to vector<10x1xf32>
    %96 = arith.subf %95, %87 : vector<10x1xf32>
    %cst_35 = arith.constant 9.99999993E-9 : f32
    %97 = vector.broadcast %cst_35 : f32 to vector<10x1xf32>
    %98 = arith.maximumf %96, %97 : vector<10x1xf32>
    %99 = math.log %98 : vector<10x1xf32>
    %100 = arith.mulf %94, %99 : vector<10x1xf32>
    %101 = math.exp %100 : vector<10x1xf32>
    %102 = arith.mulf %82, %101 : vector<10x1xf32>
    %cst_36 = arith.constant 0.000000e+00 : f32
    %103 = vector.broadcast %cst_36 : f32 to vector<10x1xf32>
    %104 = arith.select %10, %60, %103 : vector<10x1xi1>, vector<10x1xf32>
    %105 = vector.shape_cast %104 : vector<10x1xf32> to vector<1x10x1xf32>
    %cst_37 = arith.constant dense<0.000000e+00> : vector<1xf32>
    %106 = vector.multi_reduction <add>, %105, %cst_37 [1, 2] : vector<1x10x1xf32> to vector<1xf32>
    %107 = vector.shape_cast %106 : vector<1xf32> to vector<1x1x1xf32>
    %108 = vector.extract %107[0, 0, 0] : f32 from vector<1x1x1xf32>
    %109 = vector.broadcast %108 : f32 to vector<1x1xf32>
    %c0_38 = arith.constant 0 : index
    %c0_39 = arith.constant 0 : index
    %c0_40 = arith.constant 0 : index
    %110 = vector.load %arg5[%c0_38, %c0_39, %c0_40] : memref<1x1x1xf32, #tpu.memory_space<vmem>>, vector<1x1x1xf32>
    %111 = vector.shape_cast %110 : vector<1x1x1xf32> to vector<1x1xf32>
    %112 = vector.shape_cast %109 : vector<1x1xf32> to vector<1x1x1xf32>
    tpu.vector_store %arg5[%c0_38, %c0_39, %c0_40], %112 {strides = array<i32>} : memref<1x1x1xf32, #tpu.memory_space<vmem>>, vector<1x1x1xf32>,
    %cst_41 = arith.constant 0.000000e+00 : f32
    %113 = vector.broadcast %cst_41 : f32 to vector<10x1xf32>
    %114 = arith.select %10, %113, %102 : vector<10x1xi1>, vector<10x1xf32>
    %115 = vector.shape_cast %114 : vector<10x1xf32> to vector<1x10x1xf32>
    %cst_42 = arith.constant dense<0.000000e+00> : vector<1xf32>
    %116 = vector.multi_reduction <add>, %115, %cst_42 [1, 2] : vector<1x10x1xf32> to vector<1xf32>
    %117 = vector.shape_cast %116 : vector<1xf32> to vector<1x1x1xf32>
    %118 = vector.extract %117[0, 0, 0] : f32 from vector<1x1x1xf32>
    %119 = vector.broadcast %118 : f32 to vector<1x1xf32>
    %c0_43 = arith.constant 0 : index
    %c0_44 = arith.constant 0 : index
    %c0_45 = arith.constant 0 : index
    %120 = vector.load %arg6[%c0_43, %c0_44, %c0_45] : memref<1x1x1xf32, #tpu.memory_space<vmem>>, vector<1x1x1xf32>
    %121 = vector.shape_cast %120 : vector<1x1x1xf32> to vector<1x1xf32>
    %122 = vector.shape_cast %119 : vector<1x1xf32> to vector<1x1x1xf32>
    tpu.vector_store %arg6[%c0_43, %c0_44, %c0_45], %122 {strides = array<i32>} : memref<1x1x1xf32, #tpu.memory_space<vmem>>, vector<1x1x1xf32>,
    return
  }
  func.func @transform_0(%arg0: i32) -> (i32, i32, i32) {
    %c0_i32 = arith.constant 0 : i32
    %c0_i32_0 = arith.constant 0 : i32
    %c0_i32_1 = arith.constant 0 : i32
    return %arg0, %c0_i32, %c0_i32_0 : i32, i32, i32
  }
  func.func @transform_1(%arg0: i32) -> (i32, i32) {
    %c0_i32 = arith.constant 0 : i32
    %c0_i32_0 = arith.constant 0 : i32
    %c0_i32_1 = arith.constant 0 : i32
    return %c0_i32, %c0_i32_0 : i32, i32
  }
  func.func @transform_2(%arg0: i32) -> (i32, i32) {
    %c0_i32 = arith.constant 0 : i32
    %c0_i32_0 = arith.constant 0 : i32
    %c0_i32_1 = arith.constant 0 : i32
    return %c0_i32, %c0_i32_0 : i32, i32
  }
  func.func @transform_3(%arg0: i32) -> (i32, i32, i32) {
    %c0_i32 = arith.constant 0 : i32
    %c0_i32_0 = arith.constant 0 : i32
    %c0_i32_1 = arith.constant 0 : i32
    return %arg0, %c0_i32, %c0_i32_0 : i32, i32, i32
  }
  func.func @transform_4(%arg0: i32) -> (i32, i32, i32) {
    %c0_i32 = arith.constant 0 : i32
    %c0_i32_0 = arith.constant 0 : i32
    %c0_i32_1 = arith.constant 0 : i32
    return %arg0, %c0_i32, %c0_i32_0 : i32, i32, i32
  }
  func.func @transform_5(%arg0: i32) -> (i32, i32, i32) {
    %c0_i32 = arith.constant 0 : i32
    %c0_i32_0 = arith.constant 0 : i32
    %c0_i32_1 = arith.constant 0 : i32
    return %arg0, %c0_i32, %c0_i32_0 : i32, i32, i32
  }
}

</mosaic_0001>

<bundles_post_ra>
// kernel: ram_plus_forward.7
= control target key start
LH: loop header
LB: loop body
LE: loop exit
PB: predicated region body
PF: predicated region fallthrough
CT: control target
= control target key end

     0   :  { %s749_s20 = smov 0   ;;  %s820_s0 = inlined_call_operand.vmem [shape: f32[2,10,128], index: 0, kind: input, shape index: {}]   ;;  %s821_s1 = inlined_call_operand.vmem [shape: bf16[128,1], index: 1, kind: input, shape index: {}]   ;;  %s822_s2 = inlined_call_operand.<no memory space> [shape: f32[1,1], index: 2, kind: input, shape index: {}]   ;;  %s823_s3 = inlined_call_operand.vmem [shape: f32[2,10,1], index: 3, kind: input, shape index: {}]   ;;  %s824_s4 = inlined_call_operand.vmem [shape: f32[2,1,1], index: 4, kind: output, shape index: {0}]   ;;  %s825_s5 = inlined_call_operand.vmem [shape: f32[2,1,1], index: 5, kind: output, shape index: {1}]  }
   0x1   :  { %v11_v0 = vstv %s822_s2 }
   0x2   :  { %12 = vst [vmem:[#allocation2] sm:$0x1] %v11_v0 }
   0x3 LB: > { %s755_s21 = sadd.s32 4294967295, %s712_s20   ;;  %p608_p0 = scmp.ge.s32.totalorder %s712_s20, 1  ;;  %s712_s20 = sphi %s749_s20, %s18_s20  }
   0x4   : > { %p202_p1 = scmp.lt.s32.totalorder %s712_s20, 3 }
   0x6   : > { %p203_p2 = pnand %p608_p0, %p202_p1 }
   0x7   : > { %v674_v1 = vld [vmem:[%s821_s1] sm:$0xff] (!%p203_p2)   ;;  %v714_v2 = vmov (!%p203_p2), 0.0   ;;  %v675_v3 = vld [vmem:[%s821_s1 + $0x8] sm:$0xff] (!%p203_p2)   ;;  %vm715_vm0 = vmmov (!%p203_p2), 0   ;;  %v676_v4 = vld [vmem:[%s821_s1 + $0x10] sm:$0xff] (!%p203_p2)   ;;  %p236_p3 = scmp.lt.s32.totalorder (!%p203_p2), %s755_s21, 1  ;;  %v368_v26 = vlaneseq (!%p203_p2)  ;;  %v376_v29 = vstv (!%p203_p2), %s755_s21 }
   0x8   : > { %206 = sbr.rel (%p203_p2) target bundleno = 535 (0x217), region = 36  ;;  %640 = vmatprep.subr.bf16.mxu0 (!%p203_p2), %v714_v2  ;;  %656 = vmatprep.mubr.msk.bf16.mxu0 (!%p203_p2), %vm715_vm0, %v714_v2  ;;  %v677_v5 = vld [vmem:[%s821_s1 + $0x18] sm:$0xff] (!%p203_p2)   ;;  %v678_v6 = vld [vmem:[%s821_s1 + $0x20] sm:$0xff] (!%p203_p2)   ;;  %v679_v7 = vld [vmem:[%s821_s1 + $0x28] sm:$0xff] (!%p203_p2)   ;;  %vm487_vm2 = vcmask (!%p203_p2), 7168   ;;  %vm489_vm3 = vcmask (!%p203_p2), 1024  }
   0x9   : > { %641 = vmatpush3.bf16.msra.mxu0 (!%p203_p2), %v674_v1  ;;  %v680_v8 = vld [vmem:[%s821_s1 + $0x30] sm:$0xff] (!%p203_p2)   ;;  %v681_v9 = vld [vmem:[%s821_s1 + $0x38] sm:$0xff] (!%p203_p2)   ;;  %v613_v13 = vld [vmem:[#allocation2] ss:$0 sm:$0xff] (!%p203_p2)  ;;  %v369_v27 = vshrl.u32 (!%p203_p2), %v368_v26, 7  ;;  %vm502_vm4 = vcmask (!%p203_p2), 0  }
   0xa   : > { %642 = vmatprep.subr.bf16.mxu0 (!%p203_p2), %v714_v2 }
   0xb   : > { %vm378_vm1 = vcmp.eq.s32.totalorder (!%p203_p2), %v369_v27, %v376_v29 }
   0xc   : > { %v624_v38 = vsel (!%p203_p2), %vm378_vm1, 1.0, %v714_v2 }
   0xd   : > { %643 = vmatpush3.bf16.msra.mxu0 (!%p203_p2), %v675_v3  ;;  %v452_v41 = vsub.f32 (!%p203_p2), 1.0, %v624_v38  ;;  %v464_v63 = vmul.f32 (!%p203_p2), 0.0, %v624_v38 }
   0xe   : > { %644 = vmatprep.subr.bf16.mxu0 (!%p203_p2), %v714_v2 }
   0xf   : > { %s782_s6 = scalar_select %p236_p3, %s755_s21, 1  ;;  %v466_v0 = vmul.f32 4.0, %v452_v41 }
  0x11   : > { %645 = vmatpush3.bf16.msra.mxu0 %v676_v4  ;;  %s629_s9 = sshll.u32 %s782_s6, 4  ;;  %s248_s23 = scalar_lea.vmem %s824_s4, %s782_s6 }
  0x12   : > { %646 = vmatprep.subr.bf16.mxu0 %v714_v2  ;;  %s240_s14 = scalar_lea.vmem %s820_s0, %s629_s9  ;;  %s245_s19 = scalar_lea.vmem %s823_s3, %s629_s9 }
  0x13   : > { %v253_v10 = vld [vmem:[%s240_s14] sm:$0xff]  ;;  %v254_v11 = vld [vmem:[%s240_s14 + $0x8] sm:$0x3]  ;;  %s251_s26 = scalar_lea.vmem %s825_s5, %s782_s6 }
  0x14   : > { %v255_v12 = vpack.c.bf16 %v254_v11, %v253_v10  ;;  %v373_v28 = vld [vmem:[%s245_s19] sm:$0xff] }
  0x15   : > { %647 = vmatpush3.bf16.msra.mxu0 %v677_v5  ;;  %v409_v36 = vsub.f32 1.0, %v373_v28  ;;  %v427_v58 = vmul.f32 0.0, %v373_v28  ;;  %v468_v5 = vadd.f32 %v466_v0, %v464_v63 }
  0x16   : > { %648 = vmatprep.subr.bf16.mxu0 %v714_v2 }
  0x17   : > { %v429_v60 = vmul.f32 7.0, %v409_v36 }
  0x19   : > { %649 = vmatpush3.bf16.msra.mxu0 %v678_v6 }
  0x1a   : > { %650 = vmatprep.subr.bf16.mxu0 %v714_v2 }
  0x1d   : > { %651 = vmatpush3.bf16.msra.mxu0 %v679_v7 }
  0x1e   : > { %652 = vmatprep.subr.bf16.mxu0 %v714_v2 }
  0x21   : > { %653 = vmatpush3.bf16.msra.mxu0 %v680_v8 }
  0x22   : > { %654 = vmatprep.subr.bf16.mxu0 %v714_v2  ;;  %v431_v2 = vadd.f32 %v429_v60, %v427_v58 }
  0x25   : > { %655 = vmatpush3.bf16.msra.mxu0 %v681_v9 }
  0x28   : > { %657 = vmatmul.mubr.bf16.vlgmr.msra.gmra.mrb[0].mxu0 %v255_v12 }
  0xfb   : > { %v361_v14 = vpop.f32.mrb[0].mxu0 }
  0xfc   : > { %v362_v15 = vadd.f32 %v613_v13, %v361_v14  ;;  %v658_v16 = vpop.f32.mrb[1].mxu0 }
  0xfd   : > { %v364_v17 = vpop.f32.mrb[2].mxu0 }
  0xfe   : > { %v625_v18 = vmul.f32 -1.442695, %v362_v15  ;;  %v365_v19 = vadd.f32 %v613_v13, %v364_v17  ;;  %v659_v20 = vpop.f32.mrb[3].mxu0 }
 0x100   : > { %682 = vpow2.f32 %v625_v18  ;;  %v626_v21 = vmul.f32 -1.442695, %v365_v19 }
 0x102   : > { %684 = vpow2.f32 %v626_v21 }
 0x10a   : > { %v683_v22 = vpop.eup %682 }
 0x10b   : > { %v389_v23 = vadd.f32 1.0, %v683_v22 }
 0x10c   : > { %v685_v24 = vpop.eup %684 }
 0x10d   : > { %686 = vrcp.f32 %v389_v23  ;;  %v390_v25 = vadd.f32 1.0, %v685_v24 }
 0x10f   : > { %688 = vrcp.f32 %v390_v25 }
 0x117   : > { %v687_v30 = vpop.eup %686 }
 0x118   : > { %v395_v31 = vsub.f32 1.0, %v687_v30  ;;  %v401_v32 = vmax.f32 %v687_v30, 1e-08  ;;  %v421_v33 = vmul.f32 %v687_v30, %v373_v28 }
 0x119   : > { %v689_v34 = vpop.eup %688 }
 0x11a   : > { %v397_v35 = vadd.f32 0.05, %v395_v31  ;;  %690 = vlog2.f32 %v401_v32  ;;  %v396_v37 = vsub.f32 1.0, %v689_v34  ;;  %v458_v46 = vmul.f32 %v689_v34, %v624_v38 }
 0x11b   : > { %v402_v61 = vmax.f32 %v689_v34, 1e-08 }
 0x11c   : > { %v399_v39 = vmin.f32 %v397_v35, 1.0  ;;  %v398_v40 = vadd.f32 0.05, %v396_v37 }
 0x11e   : > { %v411_v42 = vmax.f32 %v399_v39, 1e-08  ;;  %v423_v43 = vmul.f32 %v409_v36, %v399_v39  ;;  %v400_v44 = vmin.f32 %v398_v40, 1.0 }
 0x120   : > { %692 = vlog2.f32 %v411_v42  ;;  %v425_v45 = vadd.f32 %v423_v43, %v421_v33  ;;  %v460_v47 = vmul.f32 %v452_v41, %v400_v44  ;;  %v412_v56 = vmax.f32 %v400_v44, 1e-08 }
 0x122   : > { %v433_v48 = vsub.f32 1.0, %v425_v45  ;;  %v462_v49 = vadd.f32 %v460_v47, %v458_v46 }
 0x124   : > { %v691_v50 = vpop.eup %690  ;;  %v435_v51 = vmax.f32 %v433_v48, 1e-08  ;;  %v470_v52 = vsub.f32 1.0, %v462_v49 }
 0x125   : > { %v404_v53 = vmul.f32 0.6931472, %v691_v50 }
 0x126   : > { %694 = vlog2.f32 %v435_v51  ;;  %v472_v54 = vmax.f32 %v470_v52, 1e-08 }
 0x127   : > { %v407_v55 = vmul.f32 %v404_v53, %v373_v28 }
 0x128   : > { %696 = vlog2.f32 %v472_v54 }
 0x129   : > { %698 = vlog2.f32 %v412_v56 }
 0x12a   : > { %v693_v57 = vpop.eup %692  ;;  %700 = vlog2.f32 %v402_v61 }
 0x12b   : > { %v414_v59 = vmul.f32 0.6931472, %v693_v57 }
 0x12d   : > { %v417_v62 = vmul.f32 %v414_v59, %v409_v36 }
 0x12f   : > { %v419_v1 = vadd.f32 %v417_v62, %v407_v55 }
 0x130   : > { %v695_v3 = vpop.eup %694 }
 0x131   : > { %v438_v4 = vmul.f32 0.6931472, %v695_v3 }
 0x132   : > { %v697_v6 = vpop.eup %696 }
 0x133   : > { %v441_v7 = vmul.f32 %v438_v4, %v431_v2  ;;  %v476_v8 = vmul.f32 0.6931472, %v697_v6  ;;  %v699_v11 = vpop.eup %698 }
 0x134   : > { %v701_v13 = vpop.eup %700  ;;  %v416_v14 = vmul.f32 0.6931472, %v699_v11 }
 0x135   : > { %v443_v9 = vmul.f32 1.442695, %v441_v7  ;;  %v478_v10 = vmul.f32 %v476_v8, %v468_v5  ;;  %v406_v15 = vmul.f32 0.6931472, %v701_v13 }
 0x136   : > { %v454_v16 = vmul.f32 %v452_v41, %v416_v14 }
 0x137   : > { %702 = vpow2.f32 %v443_v9  ;;  %v481_v12 = vmul.f32 1.442695, %v478_v10  ;;  %v450_v17 = vmul.f32 %v624_v38, %v406_v15 }
 0x139   : > { %704 = vpow2.f32 %v481_v12  ;;  %v456_v20 = vadd.f32 %v454_v16, %v450_v17 }
 0x141   : > { %v703_v18 = vpop.eup %702 }
 0x142   : > { %v447_v19 = vmul.f32 %v703_v18, %v419_v1 }
 0x143   : > { %v705_v21 = vpop.eup %704 }
 0x144   : > { %v488_v22 = vsel %vm487_vm2, %v447_v19, 0.0  ;;  %v484_v23 = vmul.f32 %v705_v21, %v456_v20 }
 0x145   : > { %492 = vadd.xlane.f32.xlu0 %v488_v22 }
 0x146   : > { %v507_v24 = vsel %vm489_vm3, %v484_v23, 0.0 }
 0x149   : > { %509 = vadd.xlane.f32.xlu0 %v507_v24 }
 0x1d2   : > { %v493_v25 = vpop.xlane.xlu0 %492 }
 0x1d3   : > { %v494_v26 = vrot.slane %v493_v25, 4 }
 0x1d5   : > { %v495_v27 = vadd.f32 %v494_v26, %v493_v25 }
 0x1d6   : > { %v510_v28 = vpop.xlane.xlu0 %509 }
 0x1d7   : > { %v496_v29 = vrot.slane %v495_v27, 2  ;;  %v511_v30 = vrot.slane %v510_v28, 4 }
 0x1d9   : > { %v512_v31 = vadd.f32 %v511_v30, %v510_v28  ;;  %v497_v32 = vadd.f32 %v496_v29, %v495_v27 }
 0x1db   : > { %v513_v33 = vrot.slane %v512_v31, 2  ;;  %v498_v34 = vrot.slane %v497_v32, 1 }
 0x1dd   : > { %v514_v35 = vadd.f32 %v513_v33, %v512_v31  ;;  %v499_v36 = vadd.f32 %v498_v34, %v497_v32 }
 0x1df   : > { %660 = vpush %v499_v36  ;;  %v515_v37 = vrot.slane %v514_v35, 1 }
 0x1e1   : > { %v516_v38 = vadd.f32 %v515_v37, %v514_v35 }
 0x1e3   : > { %662 = vpush %v516_v38 }
 0x210   : > { %s661_s2 = spop %660 }
 0x211   : > { %v501_v39 = vstv %s661_s2 }
 0x212   : > { %503 = vst.msk [vmem:[%s248_s23] sm:$0x1] %vm502_vm4, %v501_v39 }
 0x214   : > { %s663_s27 = spop %662 }
 0x215   : > { %v518_v40 = vstv %s663_s27 }
 0x216   : > { %519 = vst.msk [vmem:[%s251_s26] sm:$0x1] %vm502_vm4, %v518_v40 }
 0x217 PF: > { %s18_s20 = sadd.s32 1, %s712_s20  }
 0x218   : > { %p15_p4 = scmp.ge.s32.totalorder %s18_s20, 4  }
 0x21a   :  { %17 = sbr.rel (!%p15_p4) target bundleno = 3 (0x3), region = 81 }

// kernel: ram_plus_forward.5
= control target key start
LH: loop header
LB: loop body
LE: loop exit
PB: predicated region body
PF: predicated region fallthrough
CT: control target
= control target key end

     0   :  { %s1517_s15 = smov 0   ;;  %s1691_s0 = inlined_call_operand.<no memory space> [shape: f32[1,1], index: 0, kind: input, shape index: {}]   ;;  %s1692_s1 = inlined_call_operand.vmem [shape: f32[2,5,64], index: 1, kind: input, shape index: {}]   ;;  %s1693_s2 = inlined_call_operand.vmem [shape: f32[1,64], index: 2, kind: input, shape index: {}]   ;;  %s1694_s3 = inlined_call_operand.vmem [shape: f32[1,64], index: 3, kind: input, shape index: {}]   ;;  %s1695_s4 = inlined_call_operand.vmem [shape: bf16[64,64], index: 4, kind: input, shape index: {}]   ;;  %s1696_s5 = inlined_call_operand.vmem [shape: f32[1,64], index: 5, kind: input, shape index: {}]   ;;  %s1697_s6 = inlined_call_operand.vmem [shape: f32[2,1,64], index: 6, kind: input, shape index: {}]   ;;  %s1698_s7 = inlined_call_operand.vmem [shape: bf16[64,24], index: 7, kind: input, shape index: {}]   ;;  %s1699_s8 = inlined_call_operand.vmem [shape: bf16[24,64], index: 8, kind: input, shape index: {}]   ;;  %s1700_s9 = inlined_call_operand.vmem [shape: bf16[64,128], index: 9, kind: input, shape index: {}]   ;;  %s1701_s10 = inlined_call_operand.vmem [shape: f32[1,128], index: 10, kind: input, shape index: {}]   ;;  %s1702_s11 = inlined_call_operand.vmem [shape: f32[2,64], index: 11, kind: input, shape index: {}]   ;;  %s1703_s12 = inlined_call_operand.vmem [shape: f32[2,5,64], index: 12, kind: output, shape index: {0}]   ;;  %s1704_s13 = inlined_call_operand.vmem [shape: f32[2,10,128], index: 13, kind: output, shape index: {1}]   ;;  %s1705_s14 = inlined_call_operand.vmem [shape: f32[2,1,1], index: 14, kind: output, shape index: {2}]  }
   0x1   :  { %v20_v0 = vstv %s1691_s0 }
   0x2   :  { %21 = vst [vmem:[#allocation2] sm:$0x1] %v20_v0 }
   0x3 LB: > { %s1236_s16 = sadd.s32 4294967295, %s1431_s15   ;;  %p1240_p0 = scmp.ge.s32.totalorder %s1431_s15, 1  ;;  %s1431_s15 = sphi %s1517_s15, %s27_s15  }
   0x4   : > { %p426_p1 = scmp.lt.s32.totalorder %s1431_s15, 3 }
   0x6   : > { %p427_p2 = pnand %p1240_p0, %p426_p1 }
   0x7   : > { %p481_p3 = scmp.lt.s32.totalorder (!%p427_p2), %s1236_s16, 1  ;;  %vm504_vm0 = vcmask (!%p427_p2), 520192   ;;  %v1401_v8 = vld [vmem:[%s1695_s4] sm:$0xff] (!%p427_p2)   ;;  %v1433_v9 = vmov (!%p427_p2), 0.0   ;;  %vm1434_vm1 = vmmov (!%p427_p2), 0   ;;  %v1402_v10 = vld [vmem:[%s1695_s4 + $0x8] sm:$0xff] (!%p427_p2)   ;;  %v725_v43 = vlaneseq (!%p427_p2) }
   0x8   : > { %430 = sbr.rel (%p427_p2) target bundleno = 1954 (0x7a2), region = 68  ;;  %1310 = vmatprep.subr.bf16.mxu0 (!%p427_p2), %v1433_v9  ;;  %1318 = vmatprep.mubr.msk.bf16.mxu0 (!%p427_p2), %vm1434_vm1, %v1433_v9  ;;  %v1403_v11 = vld [vmem:[%s1695_s4 + $0x10] sm:$0xff] (!%p427_p2)   ;;  %v1404_v12 = vld [vmem:[%s1695_s4 + $0x18] sm:$0xff] (!%p427_p2)   ;;  %v1245_v17 = vld [vmem:[%s1693_s2] ss:$0 sm:$0xff] (!%p427_p2)  ;;  %vm573_vm2 = vcmask (!%p427_p2), 523264  }
   0x9   : > { %1311 = vmatpush3.bf16.msra.mxu0 (!%p427_p2), %v1401_v8  ;;  %1322 = vmatprep.subr.bf16.mxu1 (!%p427_p2), %v1433_v9  ;;  %v1246_v19 = vld [vmem:[%s1694_s3] ss:$0 sm:$0xff] (!%p427_p2)  ;;  %vm621_vm3 = vcmask (!%p427_p2), 516096   ;;  %v1406_v32 = vld [vmem:[%s1698_s7 + $0x8] sm:$0xff] (!%p427_p2)   ;;  %v1407_v33 = vld [vmem:[%s1698_s7 + $0x10] sm:$0xff] (!%p427_p2)   ;;  %v1435_v36 = vmov (!%p427_p2), 0  }
   0xa   : > { %1312 = vmatprep.subr.bf16.mxu0 (!%p427_p2), %v1433_v9  ;;  %1330 = vmatprep.mubr.msk.bf16.mxu1 (!%p427_p2), %vm1434_vm1, %v1433_v9  ;;  %v1247_v23 = vld [vmem:[%s1696_s5] ss:$0 sm:$0xff] (!%p427_p2)  ;;  %v1408_v34 = vld [vmem:[%s1698_s7 + $0x18] sm:$0xff] (!%p427_p2)   ;;  %v1594_v44 = vshrl.u32 (!%p427_p2), %v725_v43, 7  ;;  %vm730_vm4 = vcmask (!%p427_p2), 188416   ;;  %v742_v58 = vand.u32 (!%p427_p2), 127, %v725_v43 }
   0xb   : > { %v1405_v31 = vld [vmem:[%s1698_s7] sm:$0xff] (!%p427_p2)   ;;  %1399 = vset.pattern.permute.xlu1 (!%p427_p2), %v1435_v36  ;;  %1400 = vset.pattern.permute.xlu0 (!%p427_p2), %v1435_v36  ;;  %v1436_v0 = vmov (!%p427_p2), 0.0|0.0  }
   0xc   : > { %1323 = vmatpush3.bf16.msra.mxu1 (!%p427_p2), %v1405_v31  ;;  %v641_v35 = vld [vmem:[#allocation2] sm:$0x1] (!%p427_p2)  ;;  %v727_v45 = vsub.s32 (!%p427_p2), 0, %v1594_v44  ;;  %v747_v59 = vadd.s32 (!%p427_p2), 1, %v742_v58  ;;  %v739_v60 = vadd.s32 (!%p427_p2), 8, %v1594_v44  ;;  %v743_v61 = vmul.u32 (!%p427_p2), 3, %v742_v58 }
   0xd   : > { %1313 = vmatpush3.bf16.msra.mxu0 (!%p427_p2), %v1402_v10  ;;  %1324 = vmatprep.subr.bf16.mxu1 (!%p427_p2), %v1433_v9  ;;  %v642_v37 = vmul.f32 (!%p427_p2), 1.442695, %v641_v35  ;;  %v740_v63 = vadd.s32 (!%p427_p2), 16, %v1594_v44 }
   0xe   : > { %1314 = vmatprep.subr.bf16.mxu0 (!%p427_p2), %v1433_v9  ;;  %v748_v62 = vmul.u32 (!%p427_p2), 3, %v747_v59  ;;  %vm744_vm5 = vcmp.ge.s32.totalorder (!%p427_p2), %v1594_v44, %v743_v61  ;;  %vm745_vm6 = vcmp.ge.s32.totalorder (!%p427_p2), %v739_v60, %v743_v61 }
   0xf   : > { %s1711_s16 = smov (!%p481_p3, %s1236_s16), 1  ;;  %vm746_vm12 = vcmp.ge.s32.totalorder %v740_v63, %v743_v61 }
  0x10   : > { %s1241_s0 = sshll.u32 %s1711_s16, 3  ;;  %1325 = vmatpush3.bf16.msra.mxu1 %v1406_v32  ;;  %s487_s18 = scalar_lea.vmem %s1697_s6, %s1711_s16  ;;  %vm749_vm7 = vcmp.lt.s32.totalorder %v1594_v44, %v748_v62  ;;  %vm750_vm8 = vcmp.lt.s32.totalorder %v739_v60, %v748_v62  ;;  %vm751_vm13 = vcmp.lt.s32.totalorder %v740_v63, %v748_v62 }
  0x11   : > { %s484_s19 = scalar_lea.vmem %s1692_s1, %s1241_s0  ;;  %1315 = vmatpush3.bf16.msra.mxu0 %v1403_v11  ;;  %s491_s22 = scalar_lea.vmem %s1703_s12, %s1241_s0  ;;  %1326 = vmatprep.subr.bf16.mxu1 %v1433_v9  ;;  %v618_v47 = vld [vmem:[%s487_s18] sm:$0x1]  ;;  %vm752_vm9 = vmand %vm744_vm5, %vm749_vm7  ;;  %v761_v11 = vmul.u32 3, %v1594_v44  ;;  %vm633_vm5 = vcmask 0   ;;  %vm940_vm7 = vcmask 1043456  }
  0x12   : > { %v501_v1 = vld [vmem:[%s484_s19] sm:$0x1f]  ;;  %1316 = vmatprep.subr.bf16.mxu0 %v1433_v9  ;;  %vm753_vm10 = vmand %vm745_vm6, %vm750_vm8  ;;  %s499_s21 = scalar_lea.vmem %s1705_s14, %s1711_s16  ;;  %vm843_vm6 = vcmask 64512   ;;  %s1280_s24 = sshll.u32 %s1711_s16, 4 }
  0x13   : > { %v505_v2 = vsel %vm504_vm0, %v501_v1, 0.0  ;;  %vm1381_vm11 = vmpackc.low %vm753_vm10, %vm752_vm9  ;;  %vm1612_vm15 = vcmp.ge.s32.totalorder %v742_v58, %v761_v11  ;;  %s496_s0 = scalar_lea.vmem %s1704_s13, %s1280_s24 }
  0x14   : > { %506 = vadd.xlane.f32.xlu0 %v505_v2  ;;  %1327 = vmatpush3.bf16.msra.mxu1 %v1407_v33  ;;  %vm754_vm14 = vmand %vm746_vm12, %vm751_vm13  ;;  %v1438_v2 = vmov 1.0  }
  0x15   : > { %1317 = vmatpush3.bf16.msra.mxu0 %v1404_v12  ;;  %1328 = vmatprep.subr.bf16.mxu1 %v1433_v9 }
  0x16   : > { %1348 = vmatprep.subr.bf16.mxu0 %v1433_v9 }
  0x18   : > { %1329 = vmatpush3.bf16.msra.mxu1 %v1408_v34 }
  0x19   : > { %1380 = vmatprep.subr.bf16.mxu1 %v1436_v0 }
  0xa1   : > { %v507_v3 = vpop.xlane.xlu0 %506 }
  0xa2   : > { %v509_v4 = vmul.f32 0.015625, %v507_v3 }
  0xa4   : > { %v510_v5 = vsub.f32 %v501_v1, %v509_v4  ;;  %v1437_v1 = vmov 1.0|1.0  }
  0xa6   : > { %v511_v6 = vmul.f32 %v510_v5, %v510_v5 }
  0xa8   : > { %v512_v7 = vsel %vm504_vm0, %v511_v6, 0.0  ;;  %v763_v6 = vadd.s32 1, %v1594_v44 }
  0xa9   : > { %513 = vadd.xlane.f32.xlu0 %v512_v7 }
  0xaa   : > { %v764_v12 = vmul.u32 3, %v763_v6 }
 0x136   : > { %v514_v13 = vpop.xlane.xlu0 %513 }
 0x137   : > { %v515_v14 = vmul.f32 0.015625, %v514_v13 }
 0x139   : > { %v516_v15 = vadd.f32 1e-06, %v515_v14 }
 0x13b   : > { %1415 = vrsqrt.f32 %v516_v15 }
 0x13c   : > { %1417 = vpow2.f32 %v642_v37 }
 0x145   : > { %v1416_v16 = vpop.eup %1415 }
 0x146   : > { %v518_v18 = vmul.f32 %v1416_v16, %v510_v5  ;;  %v1418_v38 = vpop.eup %1417 }
 0x148   : > { %v525_v20 = vmul.f32 %v1245_v17, %v518_v18 }
 0x14a   : > { %v532_v21 = vadd.f32 %v1246_v19, %v525_v20 }
 0x14c   : > { %v533_v22 = vpack.c.bf16 %v532_v21, %v532_v21 }
 0x14e   : > { %1319 = vmatmul.mubr.msk.bf16.vlgmr.msra.gmra.mrb[0].mxu0 %vm573_vm2, %v533_v22 }
 0x14f   : > { %1352 = vmatprep.mubr.msk.bf16.mxu0 %vm1434_vm1, %v1433_v9 }
 0x221   : > { %v611_v24 = vpop.f32.mrb[0].mxu0 }
 0x222   : > { %v612_v25 = vadd.f32 %v1247_v23, %v611_v24  ;;  %v1320_v26 = vpop.f32.mrb[1].mxu0  ;;  %v1409_v23 = vld [vmem:[%s1699_s8] sm:$0xff]   ;;  %v1410_v24 = vld [vmem:[%s1699_s8 + $0x8] ss:$0 sps:$4 sm:$0xff]  }
 0x223   : > { %v614_v27 = vpop.f32.mrb[2].mxu0  ;;  %1349 = vmatpush3.bf16.msra.mxu0 %v1409_v23  ;;  %v1411_v26 = vld [vmem:[%s1700_s9] sm:$0xff]  }
 0x224   : > { %617 = vst.msk [vmem:[%s491_s22] sm:$0x1f] %vm504_vm0, %v612_v25  ;;  %v1321_v28 = vpop.f32.mrb[3].mxu0  ;;  %v635_v29 = vmul.f32 %v612_v25, %v612_v25  ;;  %v619_v49 = vsub.f32 %v612_v25, %v618_v47  ;;  %vm1616_vm0 = vcmp.lt.s32.totalorder %v742_v58, %v764_v12  ;;  %1350 = vmatprep.subr.bf16.mxu0 %v1433_v9  ;;  %v1412_v27 = vld [vmem:[%s1700_s9 + $0x8] sm:$0xff]  }
 0x225   : > { %v1413_v28 = vld [vmem:[%s1700_s9 + $0x10] sm:$0xff]  }
 0x226   : > { %v636_v30 = vsel %vm621_vm3, %v635_v29, 0.0  ;;  %v620_v56 = vand.u32 2147483647, %v619_v49  ;;  %v1414_v29 = vld [vmem:[%s1700_s9 + $0x18] sm:$0xff]  }
 0x227   : > { %637 = vadd.xlane.f32.xlu1 %v636_v30 }
 0x228   : > { %v622_v57 = vsel %vm621_vm3, %v620_v56, 0.0  ;;  %vm769_vm3 = vcmask 195584  }
 0x238   : > { %722 = vperm.xlu1 %1399, %v1418_v38   ;;  %v1068_v38 = vld [vmem:[%s1702_s11] sm:$0x3] }
 0x2b4   : > { %v638_v39 = vpop.xlane.xlu1 %637 }
 0x2b5   : > { %1419 = vrsqrt.f32 %v638_v39  ;;  %v1069_v39 = vpack.c.bf16 %v1068_v38, %v1068_v38 }
 0x2b8   : > { %v723_v46 = vpop.permute.xlu1 %722 }
 0x2b9   : > { %v728_v48 = vrot.slane %v723_v46, %v727_v45 }
 0x2bf   : > { %v1420_v40 = vpop.eup %1419 }
 0x2c0   : > { %v640_v41 = vmul.f32 %v1420_v40, %v612_v25  ;;  %v942_v25 = vsel %vm940_vm7, %v1410_v24, 0 }
 0x2c1   : > { %1351 = vmatpush3.bf16.msra.mxu0 %v942_v25 }
 0x2c2   : > { %v644_v42 = vpack.c.bf16 %v640_v41, %v640_v41  ;;  %1368 = vmatprep.subr.bf16.mxu0 %v1433_v9 }
 0x2c4   : > { %1331 = vmatmul.mubr.msk.bf16.vlgmr.msra.gmra.mrb[0].mxu1 %vm573_vm2, %v644_v42 }
 0x2c5   : > { %1340 = vmatprep.mubr.msk.f32.mxu1 %vm1434_vm1, %v1433_v9  ;;  %1382 = vmatpush3.bf16.msk.msra.mxu1 %vm1381_vm11, %v1437_v1 }
 0x2c6   : > { %1338 = vmatprep.subr.mxu1 %v1433_v9 }
 0x2c9   : > { %1339 = vmatpush3.msk.msra.mxu1 %vm754_vm14, %v1438_v2 }
 0x2ca   : > { %1343 = vmatprep.subr.mxu1 %v1433_v9 }
 0x397   : > { %v714_v50 = vpop.f32.mrb[0].mxu1 }
 0x398   : > { %v729_v51 = vmul.f32 %v728_v48, %v714_v50  ;;  %v1332_v52 = vpop.f32.mrb[1].mxu1 }
 0x399   : > { %v717_v53 = vpop.f32.mrb[2].mxu1 }
 0x39a   : > { %v1333_v54 = vpop.f32.mrb[3].mxu1  ;;  %v731_v55 = vsel %vm730_vm4, %v729_v51, -inf  ;;  %vm766_vm4 = vmand %vm1612_vm15, %vm1616_vm0 }
 0x39b   : > { %732 = vmax.xlane.f32.xlu0 %v731_v55  ;;  %v1261_v34 = vsel %vm766_vm4, 1.0, %v1433_v9 }
 0x39f   : > { %623 = vadd.xlane.f32.xlu0 %v622_v57 }
 0x428   : > { %v733_v3 = vpop.xlane.xlu0 %732 }
 0x429   : > { %v734_v4 = vsub.f32 %v729_v51, %v733_v3 }
 0x42b   : > { %v735_v5 = vmul.f32 1.442695, %v734_v4 }
 0x42c   : > { %v624_v7 = vpop.xlane.xlu0 %623 }
 0x42d   : > { %1421 = vpow2.f32 %v735_v5  ;;  %v625_v8 = vrot.slane %v624_v7, 4 }
 0x42f   : > { %v626_v10 = vadd.f32 %v625_v8, %v624_v7 }
 0x431   : > { %v627_v13 = vrot.slane %v626_v10, 2 }
 0x433   : > { %v628_v14 = vadd.f32 %v627_v13, %v626_v10 }
 0x435   : > { %v629_v17 = vrot.slane %v628_v14, 1 }
 0x437   : > { %v1422_v18 = vpop.eup %1421  ;;  %v630_v19 = vadd.f32 %v629_v17, %v628_v14 }
 0x438   : > { %1341 = vmatmul.mubr.msk.f32.vlgmr.msra.gmra.mrb[4].mxu1 %vm769_vm3, %v1422_v18 }
 0x439   : > { %1383 = vpush %v630_v19  ;;  %1344 = vmatpush3.msk.msra.mxu1 %vm766_vm4, %v1438_v2  ;;  %1345 = vmatprep.mubr.msk.f32.mxu1 %vm1434_vm1, %v1433_v9 }
 0x43a   : > { %1356 = vmatprep.subr.bf16.mxu1 %v1433_v9 }
 0x46a   : > { %s1384_s22 = spop %1383 }
 0x46b   : > { %v632_v20 = vstv %s1384_s22 }
 0x46c   : > { %634 = vst.msk [vmem:[%s499_s21] sm:$0x1] %vm633_vm5, %v632_v20 }
 0x50b   : > { %v839_v21 = vpop.f32.mrb[4].mxu1 }
 0x50c   : > { %v1342_v22 = vpop.f32.mrb[5].mxu1  ;;  %1346 = vmatmul.mubr.msk.f32.vlgmr.msra.gmra.mrb[6].mxu1 %vm843_vm6, %v839_v21 }
 0x50d   : > { %1364 = vmatprep.mubr.msk.bf16.mxu1 %vm1434_vm1, %v1433_v9  ;;  %1357 = vmatpush3.bf16.msra.mxu1 %v1411_v26 }
 0x50e   : > { %1358 = vmatprep.subr.bf16.mxu1 %v1433_v9 }
 0x511   : > { %1359 = vmatpush3.bf16.msra.mxu1 %v1412_v27 }
 0x512   : > { %1360 = vmatprep.subr.bf16.mxu1 %v1433_v9 }
 0x515   : > { %1361 = vmatpush3.bf16.msra.mxu1 %v1413_v28 }
 0x516   : > { %1362 = vmatprep.subr.bf16.mxu1 %v1433_v9 }
 0x519   : > { %1363 = vmatpush3.bf16.msra.mxu1 %v1414_v29 }
 0x5df   : > { %v913_v30 = vpop.f32.mrb[6].mxu1 }
 0x5e0   : > { %1423 = vrcp.f32 %v913_v30  ;;  %v1347_v31 = vpop.f32.mrb[7].mxu1 }
 0x5ea   : > { %v1424_v32 = vpop.eup %1423 }
 0x5eb   : > { %v918_v33 = vmul.f32 %v1424_v32, %v1422_v18 }
 0x5ed   : > { %v922_v35 = vrot.slane %v918_v33, %v727_v45  ;;  %v1271_v45 = vld [vmem:[%s1701_s10] ss:$0 sm:$0xff] }
 0x5ef   : > { %v923_v36 = vmul.f32 %v1261_v34, %v922_v35 }
 0x5f1   : > { %v924_v37 = vpack.c.bf16 %v923_v36, %v923_v36 }
 0x5f3   : > { %1353 = vmatmul.mubr.msk.bf16.vlgmr.msra.gmra.mrb[4].mxu0 %vm769_vm3, %v924_v37 }
 0x5f4   : > { %1369 = vmatpush3.bf16.msra.mxu0 %v1411_v26  ;;  %1376 = vmatprep.mubr.msk.bf16.mxu0 %vm1434_vm1, %v1433_v9 }
 0x5f5   : > { %1370 = vmatprep.subr.bf16.mxu0 %v1433_v9 }
 0x5f8   : > { %1371 = vmatpush3.bf16.msra.mxu0 %v1412_v27 }
 0x5f9   : > { %1372 = vmatprep.subr.bf16.mxu0 %v1433_v9 }
 0x5fc   : > { %1373 = vmatpush3.bf16.msra.mxu0 %v1413_v28 }
 0x5fd   : > { %1374 = vmatprep.subr.bf16.mxu0 %v1433_v9 }
 0x600   : > { %1375 = vmatpush3.bf16.msra.mxu0 %v1414_v29 }
 0x603   : > { %1377 = vmatmul.mubr.msk.bf16.vlgmr.msra.gmra.mrb[8].mxu0 %vm573_vm2, %v1069_v39 }
 0x6c6   : > { %v978_v40 = vpop.f32.mrb[4].mxu0 }
 0x6c7   : > { %v984_v41 = vpack.c.bf16 %v978_v40, %v978_v40  ;;  %v1354_v42 = vpop.f32.mrb[5].mxu0 }
 0x6c8   : > { %v981_v43 = vpop.f32.mrb[6].mxu0 }
 0x6c9   : > { %v1355_v44 = vpop.f32.mrb[7].mxu0  ;;  %1365 = vmatmul.mubr.msk.bf16.vlgmr.msra.gmra.mrb[8].mxu1 %vm573_vm2, %v984_v41 }
 0x6d6   : > { %v1107_v9 = vpop.f32.mrb[8].mxu0 }
 0x6d7   : > { %v1108_v46 = vadd.f32 %v1271_v45, %v1107_v9  ;;  %v1378_v47 = vpop.f32.mrb[9].mxu0 }
 0x6d8   : > { %v1110_v48 = vpop.f32.mrb[10].mxu0 }
 0x6d9   : > { %v1113_v49 = vmax.f32 %v1108_v46, 0.0  ;;  %v1379_v50 = vpop.f32.mrb[11].mxu0 }
 0x6db   : > { %1115 = vst [vmem:[%s496_s0 + $0x8] sm:$0x3] %v1113_v49 }
 0x79c   : > { %v1061_v51 = vpop.f32.mrb[8].mxu1 }
 0x79d   : > { %v1062_v52 = vadd.f32 %v1271_v45, %v1061_v51  ;;  %v1366_v53 = vpop.f32.mrb[9].mxu1 }
 0x79e   : > { %v1064_v54 = vpop.f32.mrb[10].mxu1 }
 0x79f   : > { %v1067_v55 = vmax.f32 %v1062_v52, 0.0  ;;  %v1367_v56 = vpop.f32.mrb[11].mxu1 }
 0x7a1   : > { %1114 = vst [vmem:[%s496_s0] sm:$0xff] %v1067_v55 }
 0x7a2 PF: > { %s27_s15 = sadd.s32 1, %s1431_s15  }
 0x7a3   : > { %p24_p4 = scmp.ge.s32.totalorder %s27_s15, 4  }
 0x7a5   :  { %26 = sbr.rel (!%p24_p4) target bundleno = 3 (0x3), region = 125 }

// kernel: ram_plus_forward.4
= control target key start
LH: loop header
LB: loop body
LE: loop exit
PB: predicated region body
PF: predicated region fallthrough
CT: control target
= control target key end

     0   :  { %s3112_s24 = smov 0   ;;  %s3114_s25 = smov 0   ;;  %s3566_s0 = inlined_call_operand.vmem [shape: f32[2,4,768], index: 0, kind: input, shape index: {}]   ;;  %s3567_s1 = inlined_call_operand.vmem [shape: bf16[768,64], index: 1, kind: input, shape index: {}]   ;;  %s3568_s2 = inlined_call_operand.vmem [shape: f32[1,64], index: 2, kind: input, shape index: {}]   ;;  %s3569_s3 = inlined_call_operand.vmem [shape: f32[1,64], index: 3, kind: input, shape index: {}]   ;;  %s3570_s4 = inlined_call_operand.vmem [shape: f32[5,64], index: 4, kind: input, shape index: {}]   ;;  %s3571_s5 = inlined_call_operand.vmem [shape: f32[2,1,64], index: 5, kind: input, shape index: {}]   ;;  %s3572_s6 = inlined_call_operand.vmem [shape: f32[2,1,64], index: 6, kind: input, shape index: {}]   ;;  %s3573_s7 = inlined_call_operand.vmem [shape: bf16[2,64,192], index: 7, kind: input, shape index: {}]   ;;  %s3574_s8 = inlined_call_operand.vmem [shape: f32[2,1,192], index: 8, kind: input, shape index: {}]   ;;  %s3575_s9 = inlined_call_operand.vmem [shape: bf16[2,64,64], index: 9, kind: input, shape index: {}]   ;;  %s3576_s10 = inlined_call_operand.vmem [shape: f32[2,1,64], index: 10, kind: input, shape index: {}]   ;;  %s3577_s11 = inlined_call_operand.vmem [shape: f32[2,1,64], index: 11, kind: input, shape index: {}]   ;;  %s3578_s12 = inlined_call_operand.vmem [shape: f32[2,1,64], index: 12, kind: input, shape index: {}]   ;;  %s3579_s13 = inlined_call_operand.vmem [shape: bf16[2,64,256], index: 13, kind: input, shape index: {}]   ;;  %s3580_s14 = inlined_call_operand.vmem [shape: f32[2,1,256], index: 14, kind: input, shape index: {}]   ;;  %s3581_s15 = inlined_call_operand.vmem [shape: bf16[2,256,64], index: 15, kind: input, shape index: {}]   ;;  %s3582_s16 = inlined_call_operand.vmem [shape: f32[2,1,64], index: 16, kind: input, shape index: {}]   ;;  %s3583_s17 = inlined_call_operand.vmem [shape: f32[2,5,64], index: 17, kind: output, shape index: {}]  }
   0x1   :  { %3589 = sst [smem:[#allocation8_spill]] %s3566_s0  ;;  %s3116_s26 = smov 0  }
   0x2   :  { %3590 = sst [smem:[#allocation9_spill]] %s3567_s1  ;;  %s3118_s27 = smov 0  }
   0x3   :  { %3591 = sst [smem:[#allocation10_spill]] %s3568_s2  ;;  %s3120_s28 = smov 0  }
   0x4   :  { %3592 = sst [smem:[#allocation11_spill]] %s3569_s3 }
   0x5   :  { %3593 = sst [smem:[#allocation12_spill]] %s3570_s4 }
   0x6   :  { %3594 = sst [smem:[#allocation13_spill]] %s3571_s5 }
   0x7   :  { %3595 = sst [smem:[#allocation14_spill]] %s3572_s6 }
   0x8   :  { %3596 = sst [smem:[#allocation15_spill]] %s3573_s7 }
   0x9   :  { %3597 = sst [smem:[#allocation16_spill]] %s3574_s8 }
   0xa   :  { %3598 = sst [smem:[#allocation17_spill]] %s3575_s9 }
   0xb   :  { %3599 = sst [smem:[#allocation18_spill]] %s3583_s17 }
   0xc LB: > { %3600 = sst [smem:[#allocation2_spill]] %s2993_s24  ;;  %s36_s29 = sadd.s32 1, %s3001_s26  ;;  %s3009_s28 = sphi %s3120_s28, %s27_s28   ;;  %s3005_s27 = sphi %s3118_s27, %s3629_s27   ;;  %s3001_s26 = sphi %s3116_s26, %s3628_s26   ;;  %s2997_s25 = sphi %s3114_s25, %s3627_s25   ;;  %s2993_s24 = sphi %s3112_s24, %s3626_s24  }
   0xd   : > { %3601 = sst [smem:[#allocation3_spill]] %s3001_s26  ;;  %s39_s0 = sadd.s32 1, %s3005_s27 }
   0xe   : > { %3602 = sst [smem:[#allocation4_spill]] %s3005_s27  ;;  %p37_p0 = scmp.ge.s32.totalorder %s36_s29, 2 }
   0xf   : > { %3603 = sst [smem:[#allocation5_spill]] %s3009_s28  ;;  %p2509_p1 = scmp.ge.s32.totalorder %s3009_s28, 1 }
  0x10   : > { %p605_p2 = scmp.lt.s32.totalorder %s3009_s28, 5  ;;  %s3631_s29 = smov (%p37_p0, %s36_s29), 0 }
  0x11   : > { %3604 = sst [smem:[#allocation6_spill]] %s3631_s29  ;;  %s3633_s0 = smov (!%p37_p0, %s39_s0), %s3005_s27 }
  0x12   : > { %p606_p3 = pnand %p2509_p1, %p605_p2  ;;  %p41_p4 = scmp.ge.s32.totalorder %s3633_s0, 2 }
  0x13   : > { %p702_p5 = scmp.lt.s32.totalorder (!%p606_p3), %s2997_s25, 1  ;;  %p707_p6 = scmp.lt.s32.totalorder (!%p606_p3), %s2993_s24, 1 }
  0x14   : > { %s3635_s0 = smov (%p41_p4, %s3633_s0), 0  ;;  %609 = sbr.rel (%p606_p3) target bundleno = 2899 (0xb53), region = 88 }
  0x15   : > { %3605 = sst [smem:[#allocation7_spill]] %s3635_s0  ;;  %s3608_s26 = sld [smem:[#allocation8_spill]] (!%p606_p3) }
  0x16   : > { %s3609_s7 = sld [smem:[#allocation15_spill]] (!%p606_p3)  ;;  %s3610_s8 = sld [smem:[#allocation16_spill]] (!%p606_p3) }
  0x17   : > { %s3611_s9 = sld [smem:[#allocation17_spill]] (!%p606_p3)  ;;  %s3613_s1 = sld [smem:[#allocation2_spill]] (!%p606_p3) }
  0x1b   : > { %s3637_s25 = smov (!%p702_p5, %s2997_s25), 1 }
  0x1c   : > { %s3146_s30 = scalar_select %p707_p6, %s2993_s24, 1 }
  0x1d   : > { %s2800_s18 = smul.u32 24, %s3637_s25  ;;  %s2521_s19 = sshll.u32 %s3637_s25, 3 }
  0x1e   : > { %s2627_s4 = sshll.u32 %s3146_s30, 6  ;;  %s2513_s25 = sshll.u32 %s3146_s30, 1 }
  0x1f   : > { %s3159_s28 = scalar_lea.vmem %s3608_s26, %s2800_s18  ;;  %s3165_s24 = scalar_lea.vmem %s3609_s7, %s2627_s4 }
  0x20   : > { %s3171_s20 = scalar_lea.vmem %s3610_s8, %s2513_s25  ;;  %s2628_s21 = sshll.u32 %s3146_s30, 5 }
  0x21   : > { %s3177_s0 = scalar_lea.vmem %s3611_s9, %s2628_s21  ;;  %s3194_s5 = scalar_lea.vmem %s3579_s13, %s2627_s4 }
  0x22   : > { %s3199_s23 = scalar_lea.vmem %s3580_s14, %s2513_s25  ;;  %s2630_s26 = sshll.u32 %s3146_s30, 7 }
  0x23   : > { %s752_s18 = scalar_lea.vmem %s3582_s16, %s3146_s30  ;;  %s3209_s6 = scalar_lea.vmem %s3581_s15, %s2630_s26 }
  0x24   : > { %s3612_s8 = sld [smem:[#allocation18_spill]]  ;;  %p2522_p7 = scmp.ne.s32.totalorder %s3613_s1, 0 }
  0x25   : > { %s3614_s21 = sld [smem:[#allocation9_spill]] (!%p2522_p7)  ;;  %v762_v31 = vld [vmem:[%s3159_s28] sm:$0xff] (!%p2522_p7)  ;;  %v763_v36 = vld [vmem:[%s3159_s28 + $0x8] sm:$0xff] (!%p2522_p7)  ;;  %v764_v49 = vld [vmem:[%s3159_s28 + $0x10] sm:$0xff] (!%p2522_p7)  ;;  %s3615_s17 = sld [smem:[#allocation10_spill]] (!%p2522_p7)  ;;  %vm1295_vm0 = vcmask (!%p2522_p7), 1040384  }
  0x26   : > { %761 = sbr.rel (%p2522_p7) target bundleno = 331 (0x14b), region = 92  ;;  %v768_v32 = vcombine.high (!%p2522_p7), %v762_v31, %v762_v31  ;;  %v774_v34 = vpack.c.bf16 (!%p2522_p7), %v762_v31, %v762_v31  ;;  %v769_v38 = vcombine.high (!%p2522_p7), %v763_v36, %v763_v36  ;;  %v776_v40 = vpack.c.bf16 (!%p2522_p7), %v763_v36, %v763_v36  ;;  %s3616_s2 = sld [smem:[#allocation11_spill]] (!%p2522_p7) }
  0x27   : > { %v770_v50 = vcombine.high (!%p2522_p7), %v764_v49, %v764_v49  ;;  %v778_v59 = vpack.c.bf16 (!%p2522_p7), %v764_v49, %v764_v49  ;;  %vm1299_vm1 = vcmask (!%p2522_p7), 520192  }
  0x28   : > { %v775_v37 = vpack.c.bf16 (!%p2522_p7), %v768_v32, %v768_v32  ;;  %v777_v42 = vpack.c.bf16 (!%p2522_p7), %v769_v38, %v769_v38 }
  0x29   : > { %v779_v53 = vpack.c.bf16 (!%p2522_p7), %v770_v50, %v770_v50 }
  0x2a   : > { %s3214_s4 = scalar_lea.vmem %s3612_s8, %s2521_s19  ;;  %1203 = vmatprep.mubr.bf16.mxu0 (!%p2522_p7), %v775_v37  ;;  %1243 = vmatprep.mubr.bf16.mxu1 (!%p2522_p7), %v777_v42  ;;  %s3617_s8 = sld [smem:[#allocation12_spill]] (!%p2522_p7) }
  0x2b   : > { %v2852_v0 = vld [vmem:[%s3614_s21 + $0x40] sm:$0xff] (!%p2522_p7)   ;;  %v2856_v4 = vld [vmem:[%s3614_s21 + $0x48] sm:$0xff] (!%p2522_p7)   ;;  %v2860_v8 = vld [vmem:[%s3614_s21 + $0x50] sm:$0xff] (!%p2522_p7)  }
  0x2c   : > { %v2853_v1 = vld [vmem:[%s3614_s21] sm:$0xff] (!%p2522_p7)   ;;  %2631 = vmatprep.subr.bf16.mxu0 (!%p2522_p7), %v2852_v0  ;;  %v2857_v5 = vld [vmem:[%s3614_s21 + $0x8] sm:$0xff] (!%p2522_p7)   ;;  %v2861_v9 = vld [vmem:[%s3614_s21 + $0x10] sm:$0xff] (!%p2522_p7)  }
  0x2d   : > { %v2854_v2 = vld [vmem:[%s3614_s21 + $0xc0] sm:$0xff]   ;;  %2632 = vmatpush3.bf16.msra.mxu0 %v2853_v1  ;;  %v2858_v6 = vld [vmem:[%s3614_s21 + $0xc8] sm:$0xff]   ;;  %v2862_v10 = vld [vmem:[%s3614_s21 + $0xd0] sm:$0xff]  }
  0x2e   : > { %v2855_v3 = vld [vmem:[%s3614_s21 + $0x80] sm:$0xff]   ;;  %2653 = vmatprep.subr.bf16.mxu1 %v2854_v2  ;;  %2633 = vmatprep.subr.bf16.mxu0 %v2856_v4  ;;  %v2859_v7 = vld [vmem:[%s3614_s21 + $0x88] sm:$0xff]   ;;  %v2863_v11 = vld [vmem:[%s3614_s21 + $0x90] sm:$0xff]  }
  0x2f   : > { %2654 = vmatpush3.bf16.msra.mxu1 %v2855_v3  ;;  %v2864_v12 = vld [vmem:[%s3614_s21 + $0x58] sm:$0xff]   ;;  %v2868_v16 = vld [vmem:[%s3614_s21 + $0x60] sm:$0xff]   ;;  %v2872_v20 = vld [vmem:[%s3614_s21 + $0x68] sm:$0xff]  }
  0x30   : > { %2655 = vmatprep.subr.bf16.mxu1 %v2858_v6  ;;  %v2865_v13 = vld [vmem:[%s3614_s21 + $0x18] sm:$0xff]   ;;  %v2869_v17 = vld [vmem:[%s3614_s21 + $0x20] sm:$0xff]   ;;  %v2873_v21 = vld [vmem:[%s3614_s21 + $0x28] sm:$0xff]  }
  0x31   : > { %2634 = vmatpush3.bf16.msra.mxu0 %v2857_v5  ;;  %v2866_v14 = vld [vmem:[%s3614_s21 + $0xd8] sm:$0xff]   ;;  %v2870_v18 = vld [vmem:[%s3614_s21 + $0xe0] sm:$0xff]   ;;  %v2874_v22 = vld [vmem:[%s3614_s21 + $0xe8] sm:$0xff]  }
  0x32   : > { %2635 = vmatprep.subr.bf16.mxu0 %v2860_v8  ;;  %v2867_v15 = vld [vmem:[%s3614_s21 + $0x98] sm:$0xff]   ;;  %v2871_v19 = vld [vmem:[%s3614_s21 + $0xa0] sm:$0xff]   ;;  %v2875_v23 = vld [vmem:[%s3614_s21 + $0xa8] sm:$0xff]  }
  0x33   : > { %2656 = vmatpush3.bf16.msra.mxu1 %v2859_v7  ;;  %v2876_v24 = vld [vmem:[%s3614_s21 + $0x70] sm:$0xff]   ;;  %v2880_v28 = vld [vmem:[%s3614_s21 + $0x78] sm:$0xff]   ;;  %v2885_v35 = vld [vmem:[%s3614_s21 + $0x140] sm:$0xff]  }
  0x34   : > { %2657 = vmatprep.subr.bf16.mxu1 %v2862_v10  ;;  %v2877_v25 = vld [vmem:[%s3614_s21 + $0x30] sm:$0xff]   ;;  %v2881_v29 = vld [vmem:[%s3614_s21 + $0x38] sm:$0xff]   ;;  %v2887_v39 = vld [vmem:[%s3614_s21 + $0x100] sm:$0xff]  }
  0x35   : > { %2636 = vmatpush3.bf16.msra.mxu0 %v2861_v9  ;;  %v2878_v26 = vld [vmem:[%s3614_s21 + $0xf0] sm:$0xff]   ;;  %v2882_v30 = vld [vmem:[%s3614_s21 + $0xf8] sm:$0xff]   ;;  %v2888_v41 = vld [vmem:[%s3614_s21 + $0x148] sm:$0xff]  }
  0x36   : > { %2637 = vmatprep.subr.bf16.mxu0 %v2864_v12  ;;  %v2879_v27 = vld [vmem:[%s3614_s21 + $0xb0] sm:$0xff]   ;;  %v2884_v33 = vld [vmem:[%s3614_s21 + $0xb8] sm:$0xff]   ;;  %v2889_v43 = vld [vmem:[%s3614_s21 + $0x108] sm:$0xff]  }
  0x37   : > { %2658 = vmatpush3.bf16.msra.mxu1 %v2863_v11  ;;  %v2890_v44 = vld [vmem:[%s3614_s21 + $0x150] sm:$0xff]   ;;  %v2892_v46 = vld [vmem:[%s3614_s21 + $0x158] sm:$0xff]   ;;  %v2894_v48 = vld [vmem:[%s3614_s21 + $0x160] sm:$0xff]  }
  0x38   : > { %2659 = vmatprep.subr.bf16.mxu1 %v2866_v14  ;;  %v2891_v45 = vld [vmem:[%s3614_s21 + $0x110] sm:$0xff]   ;;  %v2893_v47 = vld [vmem:[%s3614_s21 + $0x118] sm:$0xff]   ;;  %v2895_v51 = vld [vmem:[%s3614_s21 + $0x120] sm:$0xff]  }
  0x39   : > { %2638 = vmatpush3.bf16.msra.mxu0 %v2865_v13  ;;  %v2896_v52 = vld [vmem:[%s3614_s21 + $0x168] sm:$0xff]   ;;  %v2898_v55 = vld [vmem:[%s3614_s21 + $0x170] sm:$0xff]   ;;  %v2900_v57 = vld [vmem:[%s3614_s21 + $0x178] sm:$0xff]  }
  0x3a   : > { %2639 = vmatprep.subr.bf16.mxu0 %v2868_v16  ;;  %v2897_v54 = vld [vmem:[%s3614_s21 + $0x128] sm:$0xff]   ;;  %v2899_v56 = vld [vmem:[%s3614_s21 + $0x130] sm:$0xff]   ;;  %v2901_v58 = vld [vmem:[%s3614_s21 + $0x138] sm:$0xff]  }
  0x3b   : > { %2660 = vmatpush3.bf16.msra.mxu1 %v2867_v15  ;;  %v2523_v61 = vld [vmem:[%s3615_s17] ss:$0 sm:$0xff] }
  0x3c   : > { %2661 = vmatprep.subr.bf16.mxu1 %v2870_v18  ;;  %v1291_v15 = vld [vmem:[%s3616_s2] sm:$0x1] }
  0x3d   : > { %2640 = vmatpush3.bf16.msra.mxu0 %v2869_v17  ;;  %v1297_v17 = vld [vmem:[%s3617_s8] sm:$0x1f] }
  0x3e   : > { %2641 = vmatprep.subr.bf16.mxu0 %v2872_v20 }
  0x3f   : > { %2662 = vmatpush3.bf16.msra.mxu1 %v2871_v19 }
  0x40   : > { %2663 = vmatprep.subr.bf16.mxu1 %v2874_v22 }
  0x41   : > { %2642 = vmatpush3.bf16.msra.mxu0 %v2873_v21 }
  0x42   : > { %2643 = vmatprep.subr.bf16.mxu0 %v2876_v24 }
  0x43   : > { %2664 = vmatpush3.bf16.msra.mxu1 %v2875_v23 }
  0x44   : > { %2665 = vmatprep.subr.bf16.mxu1 %v2878_v26 }
  0x45   : > { %2644 = vmatpush3.bf16.msra.mxu0 %v2877_v25 }
  0x46   : > { %2645 = vmatprep.subr.bf16.mxu0 %v2880_v28 }
  0x47   : > { %2666 = vmatpush3.bf16.msra.mxu1 %v2879_v27 }
  0x48   : > { %2667 = vmatprep.subr.bf16.mxu1 %v2882_v30 }
  0x49   : > { %2646 = vmatpush3.bf16.msra.mxu0 %v2881_v29 }
  0x4a   : > { %2675 = vmatprep.subr.bf16.mxu0 %v2885_v35 }
  0x4b   : > { %2668 = vmatpush3.bf16.msra.mxu1 %v2884_v33 }
  0x4c   : > { %1204 = vmatmul.mubr.bf16.vlgmr.msra.gmra.mrb[0].mxu0 %v774_v34 }
  0x4d   : > { %2676 = vmatpush3.bf16.msra.mxu0 %v2887_v39  ;;  %1283 = vmatprep.mubr.bf16.mxu0 %v779_v53 }
  0x4e   : > { %1244 = vmatmul.mubr.bf16.vlgmr.msra.gmra.mrb[0].mxu1 %v776_v40  ;;  %2677 = vmatprep.subr.bf16.mxu0 %v2888_v41 }
  0x51   : > { %2678 = vmatpush3.bf16.msra.mxu0 %v2889_v43 }
  0x52   : > { %2679 = vmatprep.subr.bf16.mxu0 %v2890_v44 }
  0x55   : > { %2680 = vmatpush3.bf16.msra.mxu0 %v2891_v45 }
  0x56   : > { %2681 = vmatprep.subr.bf16.mxu0 %v2892_v46 }
  0x59   : > { %2682 = vmatpush3.bf16.msra.mxu0 %v2893_v47 }
  0x5a   : > { %2683 = vmatprep.subr.bf16.mxu0 %v2894_v48 }
  0x5d   : > { %2684 = vmatpush3.bf16.msra.mxu0 %v2895_v51 }
  0x5e   : > { %2685 = vmatprep.subr.bf16.mxu0 %v2896_v52 }
  0x61   : > { %2686 = vmatpush3.bf16.msra.mxu0 %v2897_v54 }
  0x62   : > { %2687 = vmatprep.subr.bf16.mxu0 %v2898_v55 }
  0x65   : > { %2688 = vmatpush3.bf16.msra.mxu0 %v2899_v56 }
  0x66   : > { %2689 = vmatprep.subr.bf16.mxu0 %v2900_v57 }
  0x69   : > { %2690 = vmatpush3.bf16.msra.mxu0 %v2901_v58 }
  0x6c   : > { %1284 = vmatmul.mubr.bf16.vlgmr.msra.gmra.mrb[4].mxu0 %v778_v59 }
 0x11f   : > { %v2647_v60 = vpop.f32.mrb[0].mxu0 }
 0x120   : > { %v2648_v62 = vpop.f32.mrb[1].mxu0 }
 0x121   : > { %v2649_v63 = vadd.f32 %v2648_v62, %v2647_v60  ;;  %v2650_v0 = vpop.f32.mrb[2].mxu0  ;;  %v2669_v1 = vpop.f32.mrb[0].mxu1 }
 0x122   : > { %v2651_v2 = vpop.f32.mrb[3].mxu0  ;;  %v2670_v3 = vpop.f32.mrb[1].mxu1 }
 0x123   : > { %v1206_v4 = vadd.f32 %v2649_v63, %v2523_v61  ;;  %v2671_v5 = vadd.f32 %v2670_v3, %v2669_v1  ;;  %v2672_v6 = vpop.f32.mrb[2].mxu1 }
 0x124   : > { %v2673_v7 = vpop.f32.mrb[3].mxu1 }
 0x125   : > { %v1246_v8 = vadd.f32 %v2671_v5, %v1206_v4 }
 0x13f   : > { %v2691_v9 = vpop.f32.mrb[4].mxu0 }
 0x140   : > { %v2692_v10 = vpop.f32.mrb[5].mxu0 }
 0x141   : > { %v2693_v11 = vadd.f32 %v2692_v10, %v2691_v9  ;;  %v2694_v12 = vpop.f32.mrb[6].mxu0 }
 0x142   : > { %v2695_v13 = vpop.f32.mrb[7].mxu0 }
 0x143   : > { %v1286_v14 = vadd.f32 %v2693_v11, %v1246_v8 }
 0x145   : > { %v1293_v16 = vrot.slane %v1286_v14, 7 }
 0x147   : > { %v1296_v18 = vsel %vm1295_vm0, %v1291_v15, %v1293_v16 }
 0x148   : > { %v1298_v19 = vadd.f32 %v1297_v17, %v1296_v18 }
 0x14a   : > { %1300 = vst.msk [vmem:[%s3214_s4] sm:$0x1f] %vm1299_vm1, %v1298_v19 }
 0x14b PF: > { %vm1304_vm2 = vcmask 520192   ;;  %v2903_v27 = vld [vmem:[%s3165_s24 + $0x4] ss:$8 sps:$4 sm:$0xff]   ;;  %v2905_v28 = vld [vmem:[%s3165_s24] ss:$8 sps:$4 sm:$0xff]   ;;  %v3011_v31 = vmov 0   ;;  %v1344_v46 = vlaneseq  ;;  %s3622_s9 = scalar_lea.vmem %s3576_s10, %s3146_s30  ;;  %s3624_s3 = scalar_lea.vmem %s3578_s12, %s3146_s30 }
 0x14c   : > { %v2906_v29 = vld [vmem:[%s3165_s24 + $0x14] ss:$8 sps:$4 sm:$0xff]   ;;  %1398 = vmatprep.subr.bf16.mxu1 %v2903_v27  ;;  %v2908_v30 = vld [vmem:[%s3165_s24 + $0x10] ss:$8 sps:$4 sm:$0xff]   ;;  %1430 = vmatprep.mubr.bf16.mxu1 %v3011_v31  ;;  %v2909_v32 = vld [vmem:[%s3165_s24 + $0x24] ss:$8 sps:$4 sm:$0xff]  }
 0x14d   : > { %1399 = vmatpush1.bf16.msra.mxu1 %v2905_v28  ;;  %v2911_v33 = vld [vmem:[%s3165_s24 + $0x20] ss:$8 sps:$4 sm:$0xff]   ;;  %v2912_v34 = vld [vmem:[%s3165_s24 + $0x34] ss:$8 sps:$4 sm:$0xff]   ;;  %v2914_v35 = vld [vmem:[%s3165_s24 + $0x30] ss:$8 sps:$4 sm:$0xff]  }
 0x14e   : > { %1400 = vmatprep.subr.bf16.mxu1 %v2906_v29  ;;  %s3618_s25 = sld [smem:[#allocation13_spill]]  ;;  %s3620_s26 = sld [smem:[#allocation14_spill]]  ;;  %vm1394_vm3 = vcmask 523264   ;;  %v3401_v47 = vshrl.u32 %v1344_v46, 7  ;;  %v3012_v48 = vmov 0.0   ;;  %vm3013_vm4 = vmmov 0  }
 0x14f   : > { %2752 = vmatprep.subr.bf16.mxu0 %v3012_v48  ;;  %v1342_v50 = vld [vmem:[%s3171_s20] sm:$0x3]  ;;  %2754 = vmatprep.mubr.msk.bf16.mxu0 %vm3013_vm4, %v3012_v48  ;;  %s3014_s24 = smov 112   ;;  %s3015_s20 = smov 64   ;;  %vm1444_vm5 = vcmask 130048   ;;  %vm1509_vm6 = vcmask 1041408  }
 0x150   : > { %v1346_v49 = vsub.s32 0, %v3401_v47  ;;  %s3016_s19 = smov 48   ;;  %s3017_s27 = smov 32   ;;  %v1350_v58 = vsub.s32 1, %v3401_v47  ;;  %vm1510_vm7 = vcmask 1042432   ;;  %v3021_v63 = vmov 65535  }
 0x151   : > { %v3375_v20 = vld [vmem:[%s3214_s4] sm:$0x1f]  ;;  %1401 = vmatpush1.bf16.msra.mxu1 %v2908_v30  ;;  %s3018_s2 = smov 96   ;;  %s3019_s28 = smov 16   ;;  %v1511_v0 = vsel %vm1509_vm6, 4294967295, %v3021_v63  ;;  %vm1492_vm8 = vcmask 36864  }
 0x152   : > { %v1305_v21 = vsel %vm1304_vm2, %v3375_v20, 0.0  ;;  %1402 = vmatprep.subr.bf16.mxu1 %v2909_v32  ;;  %v1347_v51 = vrot.slane %v1342_v50, %v1346_v49  ;;  %s3020_s7 = smov 80   ;;  %v1351_v59 = vrot.slane %v1342_v50, %v1350_v58  ;;  %v3427_v4 = vsel %vm1510_vm7, %v1511_v0, 0 }
 0x153   : > { %1306 = vadd.xlane.f32.xlu0 %v1305_v21  ;;  %vm1505_vm9 = vcmask 39936   ;;  %vm1903_vm10 = vcmask 261120   ;;  %vm1905_vm11 = vcmask 392192  }
 0x154   : > { %s3619_s22 = scalar_lea.vmem %s3618_s25, %s3146_s30  ;;  %s3621_s17 = scalar_lea.vmem %s3620_s26, %s3146_s30 }
 0x155   : > { %1403 = vmatpush1.bf16.msra.mxu1 %v2911_v33  ;;  %v2572_v40 = vld [vmem:[%s3619_s22] ss:$0 sm:$0xff]  ;;  %s3623_s25 = scalar_lea.vmem %s3577_s11, %s3146_s30 }
 0x156   : > { %1404 = vmatprep.subr.bf16.mxu1 %v2912_v34  ;;  %v2573_v42 = vld [vmem:[%s3621_s17] ss:$0 sm:$0xff] }
 0x159   : > { %1405 = vmatpush1.bf16.msra.mxu1 %v2914_v35 }
 0x15a   : > { %2740 = vmatprep.subr.bf16.mxu1 %v3012_v48 }
 0x1e0   : > { %v1307_v22 = vpop.xlane.xlu0 %1306 }
 0x1e1   : > { %v1309_v23 = vmul.f32 0.015625, %v1307_v22 }
 0x1e3   : > { %v1310_v24 = vsub.f32 %v3375_v20, %v1309_v23 }
 0x1e5   : > { %v1311_v25 = vmul.f32 %v1310_v24, %v1310_v24 }
 0x1e7   : > { %v1312_v26 = vsel %vm1304_vm2, %v1311_v25, 0.0 }
 0x1e8   : > { %1313 = vadd.xlane.f32.xlu0 %v1312_v26 }
 0x275   : > { %v1314_v36 = vpop.xlane.xlu0 %1313 }
 0x276   : > { %v1315_v37 = vmul.f32 0.015625, %v1314_v36 }
 0x278   : > { %v1316_v38 = vadd.f32 1e-06, %v1315_v37 }
 0x27a   : > { %2947 = vrsqrt.f32 %v1316_v38 }
 0x284   : > { %v2948_v39 = vpop.eup %2947 }
 0x285   : > { %v1318_v41 = vmul.f32 %v2948_v39, %v1310_v24 }
 0x287   : > { %v1325_v43 = vmul.f32 %v2572_v40, %v1318_v41 }
 0x289   : > { %v1332_v44 = vadd.f32 %v2573_v42, %v1325_v43 }
 0x28b   : > { %v1333_v45 = vpack.c.bf16 %v1332_v44, %v1332_v44 }
 0x28d   : > { %2582 = vmatmul.mubr.msk.bf16.vlgmr.msra.gmra.mrb[0].mxu1 %vm1394_vm3, %v1333_v45 }
 0x28e   : > { %2742 = vmatprep.mubr.msk.bf16.mxu1 %vm3013_vm4, %v3012_v48 }
 0x360   : > { %v1432_v52 = vpop.f32.mrb[0].mxu1 }
 0x361   : > { %v1433_v53 = vadd.f32 %v1432_v52, %v1347_v51  ;;  %v1434_v54 = vpop.f32.mrb[1].mxu1 }
 0x362   : > { %v1436_v55 = vpop.f32.mrb[2].mxu1  ;;  %v1435_v60 = vadd.f32 %v1434_v54, %v1351_v59 }
 0x363   : > { %v1439_v56 = vpack.c.bf16 %v1433_v53, %v1433_v53  ;;  %v1437_v57 = vpop.f32.mrb[3].mxu1 }
 0x364   : > { %v3424_v1 = vpack.c.bf16 %v1435_v60, %v1435_v60 }
 0x365   : > { %1556 = vrot.lane.b32.xlu0 %v1439_v56, %s3014_s24  ;;  %1442 = vrot.lane.b32.xlu1 %v1439_v56, %s3015_s20 }
 0x366   : > { %v1514_v6 = vand.u32 %v3427_v4, %v3424_v1 }
 0x369   : > { %1558 = vrot.lane.b32.xlu1 %v1439_v56, %s3016_s19 }
 0x36d   : > { %1670 = vrot.lane.b32.xlu1 %v1439_v56, %s3017_s27 }
 0x371   : > { %1668 = vrot.lane.b32.xlu1 %v1439_v56, %s3018_s2 }
 0x375   : > { %1781 = vrot.lane.b32.xlu1 %v1439_v56, %s3019_s28 }
 0x379   : > { %1779 = vrot.lane.b32.xlu1 %v1439_v56, %s3020_s7 }
 0x3d7   : > { %v1443_v61 = vpop.permute.xlu1 %1442  ;;  %v1557_v7 = vpop.permute.xlu0 %1556 }
 0x3d8   : > { %v1449_v62 = vsel %vm1444_vm5, %v1443_v61, 0 }
 0x3d9   : > { %2741 = vmatpush3.bf16.xpose.msra.mxu1 %v1449_v62 }
 0x3da   : > { %2746 = vmatprep.subr.bf16.mxu1 %v3012_v48 }
 0x3db   : > { %v1559_v2 = vpop.permute.xlu1 %1558 }
 0x3dc   : > { %v1564_v3 = vsel %vm1444_vm5, %v1559_v2, 0 }
 0x3dd   : > { %2753 = vmatpush3.bf16.xpose.msra.mxu0 %v1564_v3 }
 0x3de   : > { %2764 = vmatprep.subr.bf16.mxu0 %v3012_v48 }
 0x3df   : > { %v1671_v5 = vpop.permute.xlu1 %1670 }
 0x3e0   : > { %2743 = vmatmul.mubr.msk.bf16.vlgmr.msra.gmra.mrb[4].mxu1 %vm1444_vm5, %v1439_v56  ;;  %v1676_v9 = vsel %vm1444_vm5, %v1671_v5, 0 }
 0x3e1   : > { %2747 = vmatpush3.bf16.msra.mxu1 %v1514_v6  ;;  %2748 = vmatprep.mubr.msk.bf16.mxu1 %vm3013_vm4, %v3012_v48 }
 0x3e2   : > { %2758 = vmatprep.subr.bf16.mxu1 %v3012_v48 }
 0x3e3   : > { %v1669_v8 = vpop.permute.xlu1 %1668 }
 0x3e4   : > { %2755 = vmatmul.mubr.msk.bf16.vlgmr.msra.gmra.mrb[0].mxu0 %vm1444_vm5, %v1557_v7 }
 0x3e5   : > { %2765 = vmatpush3.bf16.xpose.msra.mxu0 %v1676_v9  ;;  %2766 = vmatprep.mubr.msk.bf16.mxu0 %vm3013_vm4, %v3012_v48 }
 0x3e6   : > { %2776 = vmatprep.subr.bf16.mxu0 %v3012_v48 }
 0x3e7   : > { %v1782_v10 = vpop.permute.xlu1 %1781 }
 0x3e8   : > { %v1787_v11 = vsel %vm1444_vm5, %v1782_v10, 0 }
 0x3eb   : > { %v1780_v12 = vpop.permute.xlu1 %1779 }
 0x3ec   : > { %2767 = vmatmul.mubr.msk.bf16.vlgmr.msra.gmra.mrb[4].mxu0 %vm1444_vm5, %v1669_v8 }
 0x3ed   : > { %2777 = vmatpush3.bf16.xpose.msra.mxu0 %v1787_v11  ;;  %2778 = vmatprep.mubr.msk.bf16.mxu0 %vm3013_vm4, %v3012_v48 }
 0x3ee   : > { %2788 = vmatprep.subr.bf16.mxu0 %v3012_v48 }
 0x3f4   : > { %2779 = vmatmul.mubr.msk.bf16.vlgmr.msra.gmra.mrb[8].mxu0 %vm1444_vm5, %v1780_v12 }
 0x3f5   : > { %2796 = vmatprep.mubr.msk.bf16.mxu0 %vm3013_vm4, %v3012_v48 }
 0x4b3   : > { %v1485_v13 = vpop.f32.mrb[4].mxu1 }
 0x4b4   : > { %v1491_v14 = vmul.f32 0.25, %v1485_v13  ;;  %v2744_v15 = vpop.f32.mrb[5].mxu1 }
 0x4b5   : > { %v1488_v16 = vpop.f32.mrb[6].mxu1 }
 0x4b6   : > { %v2745_v17 = vpop.f32.mrb[7].mxu1  ;;  %v1493_v18 = vsel %vm1492_vm8, %v1491_v14, -inf }
 0x4b7   : > { %1494 = vmax.xlane.f32.xlu1 %v1493_v18  ;;  %v1600_v19 = vpop.f32.mrb[0].mxu0 }
 0x4b8   : > { %v1606_v21 = vmul.f32 0.25, %v1600_v19  ;;  %v2756_v22 = vpop.f32.mrb[1].mxu0 }
 0x4b9   : > { %v1603_v23 = vpop.f32.mrb[2].mxu0 }
 0x4ba   : > { %v2757_v24 = vpop.f32.mrb[3].mxu0  ;;  %v1607_v25 = vsel %vm1492_vm8, %v1606_v21, -inf  ;;  %v2915_v23 = vld [vmem:[%s3177_s0] sm:$0xff]  }
 0x4bb   : > { %1608 = vmax.xlane.f32.xlu0 %v1607_v25  ;;  %2789 = vmatpush3.bf16.msra.mxu0 %v2915_v23 }
 0x4bc   : > { %2790 = vmatprep.subr.bf16.mxu0 %v3012_v48 }
 0x4bf   : > { %v1712_v26 = vpop.f32.mrb[4].mxu0 }
 0x4c0   : > { %v1718_v27 = vmul.f32 0.25, %v1712_v26  ;;  %v2768_v28 = vpop.f32.mrb[5].mxu0 }
 0x4c1   : > { %v1715_v29 = vpop.f32.mrb[6].mxu0 }
 0x4c2   : > { %v2769_v30 = vpop.f32.mrb[7].mxu0  ;;  %v1719_v32 = vsel %vm1492_vm8, %v1718_v27, -inf }
 0x4c3   : > { %1720 = vmax.xlane.f32.xlu1 %v1719_v32  ;;  %v2916_v32 = vld [vmem:[%s3177_s0 + $0x8] sm:$0xff]  }
 0x4c4   : > { %2791 = vmatpush3.bf16.msra.mxu0 %v2916_v32  ;;  %v2943_v32 = vld [vmem:[%s3209_s6 + $0x70] sm:$0xff]  }
 0x4c5   : > { %2792 = vmatprep.subr.bf16.mxu0 %v3012_v48 }
 0x4c7   : > { %v1823_v33 = vpop.f32.mrb[8].mxu0 }
 0x4c8   : > { %v1829_v34 = vmul.f32 0.25, %v1823_v33  ;;  %v2780_v35 = vpop.f32.mrb[9].mxu0  ;;  %v2917_v33 = vld [vmem:[%s3177_s0 + $0x10] sm:$0xff]  }
 0x4c9   : > { %v1826_v36 = vpop.f32.mrb[10].mxu0  ;;  %2793 = vmatpush3.bf16.msra.mxu0 %v2917_v33  ;;  %v2944_v33 = vld [vmem:[%s3209_s6 + $0x30] sm:$0xff]  }
 0x4ca   : > { %v2781_v37 = vpop.f32.mrb[11].mxu0  ;;  %v1830_v38 = vsel %vm1492_vm8, %v1829_v34, -inf  ;;  %2794 = vmatprep.subr.bf16.mxu0 %v3012_v48 }
 0x4cb   : > { %1831 = vmax.xlane.f32.xlu0 %v1830_v38 }
 0x544   : > { %v1495_v39 = vpop.xlane.xlu1 %1494 }
 0x545   : > { %v1496_v40 = vsub.f32 %v1491_v14, %v1495_v39 }
 0x547   : > { %v1497_v41 = vmul.f32 1.442695, %v1496_v40 }
 0x548   : > { %v1609_v42 = vpop.xlane.xlu0 %1608 }
 0x549   : > { %2949 = vpow2.f32 %v1497_v41  ;;  %v1610_v43 = vsub.f32 %v1606_v21, %v1609_v42 }
 0x54b   : > { %v1611_v44 = vmul.f32 1.442695, %v1610_v43 }
 0x54d   : > { %2951 = vpow2.f32 %v1611_v44 }
 0x550   : > { %v1721_v57 = vpop.xlane.xlu1 %1720 }
 0x551   : > { %v1722_v59 = vsub.f32 %v1718_v27, %v1721_v57 }
 0x553   : > { %v2950_v45 = vpop.eup %2949  ;;  %v1723_v60 = vmul.f32 1.442695, %v1722_v59 }
 0x554   : > { %v1499_v46 = vsel %vm1492_vm8, %v2950_v45, 0.0 }
 0x555   : > { %1500 = vadd.xlane.f32.xlu1 %v1499_v46 }
 0x557   : > { %v2952_v50 = vpop.eup %2951 }
 0x558   : > { %v1832_v51 = vpop.xlane.xlu0 %1831  ;;  %v1613_v52 = vsel %vm1492_vm8, %v2952_v50, 0.0 }
 0x559   : > { %v1833_v53 = vsub.f32 %v1829_v34, %v1832_v51  ;;  %1614 = vadd.xlane.f32.xlu0 %v1613_v52  ;;  %v2591_v51 = vld [vmem:[%s3622_s9] ss:$0 sm:$0xff] }
 0x55b   : > { %v1834_v54 = vmul.f32 1.442695, %v1833_v53 }
 0x55d   : > { %2953 = vpow2.f32 %v1834_v54 }
 0x55e   : > { %2955 = vpow2.f32 %v1723_v60 }
 0x566   : > { %1620 = vrot.lane.b32.xlu1 %v3424_v1, %s3014_s24 }
 0x567   : > { %v2954_v55 = vpop.eup %2953 }
 0x568   : > { %v1836_v56 = vsel %vm1492_vm8, %v2954_v55, 0.0  ;;  %v2956_v61 = vpop.eup %2955 }
 0x569   : > { %1837 = vadd.xlane.f32.xlu0 %v1836_v56  ;;  %v1725_v62 = vsel %vm1492_vm8, %v2956_v61, 0.0 }
 0x57f   : > { %1731 = vrot.lane.b32.xlu0 %v3424_v1, %s3018_s2 }
 0x58a   : > { %1726 = vadd.xlane.f32.xlu1 %v1725_v62 }
 0x59b   : > { %1842 = vrot.lane.b32.xlu1 %v3424_v1, %s3020_s7 }
 0x5e2   : > { %v1501_v63 = vpop.xlane.xlu1 %1500 }
 0x5e3   : > { %2957 = vrcp.f32 %v1501_v63 }
 0x5e6   : > { %v1615_v0 = vpop.xlane.xlu0 %1614  ;;  %v1621_v5 = vpop.permute.xlu1 %1620 }
 0x5e7   : > { %2959 = vrcp.f32 %v1615_v0  ;;  %v1626_v8 = vand.u32 %v1621_v5, %v3427_v4  ;;  %v2922_v5 = vld [vmem:[%s3194_s5 + $0x10] ss:$8 sps:$4 sm:$0xff]  }
 0x5ed   : > { %v2958_v2 = vpop.eup %2957 }
 0x5ee   : > { %v1503_v3 = vmul.f32 %v2958_v2, %v2950_v45  ;;  %v2921_v2 = vld [vmem:[%s3194_s5 + $0x4] ss:$8 sps:$4 sm:$0xff]  }
 0x5f0   : > { %v1504_v6 = vpack.c.bf16 %v1503_v3, %v1503_v3  ;;  %v2924_v3 = vld [vmem:[%s3194_s5 + $0x14] ss:$8 sps:$4 sm:$0xff]  }
 0x5f1   : > { %v2960_v7 = vpop.eup %2959 }
 0x5f2   : > { %2749 = vmatmul.mubr.msk.bf16.vlgmr.msra.gmra.mrb[8].mxu1 %vm1505_vm9, %v1504_v6  ;;  %v1617_v9 = vmul.f32 %v2960_v7, %v2952_v50  ;;  %v2927_v6 = vld [vmem:[%s3194_s5 + $0x24] ss:$8 sps:$4 sm:$0xff]   ;;  %v2925_v7 = vld [vmem:[%s3194_s5 + $0x20] ss:$8 sps:$4 sm:$0xff]  }
 0x5f3   : > { %2759 = vmatpush3.bf16.msra.mxu1 %v1626_v8  ;;  %2760 = vmatprep.mubr.msk.bf16.mxu1 %vm3013_vm4, %v3012_v48  ;;  %v2928_v8 = vld [vmem:[%s3194_s5 + $0x30] ss:$8 sps:$4 sm:$0xff]  }
 0x5f4   : > { %2770 = vmatprep.subr.bf16.mxu1 %v3012_v48  ;;  %v1618_v10 = vpack.c.bf16 %v1617_v9, %v1617_v9  ;;  %v2930_v9 = vld [vmem:[%s3194_s5 + $0x34] ss:$8 sps:$4 sm:$0xff]  }
 0x5f6   : > { %v1838_v1 = vpop.xlane.xlu0 %1837 }
 0x5fa   : > { %v1732_v11 = vpop.permute.xlu0 %1731  ;;  %2761 = vmatmul.mubr.msk.bf16.vlgmr.msra.gmra.mrb[12].mxu1 %vm1505_vm9, %v1618_v10  ;;  %v2932_v10 = vld [vmem:[%s3209_s6] sm:$0xff]  }
 0x5fb   : > { %v1737_v12 = vand.u32 %v1732_v11, %v3427_v4  ;;  %2772 = vmatprep.mubr.msk.bf16.mxu1 %vm3013_vm4, %v3012_v48  ;;  %v2933_v11 = vld [vmem:[%s3209_s6 + $0x48] sm:$0xff]  }
 0x5fd   : > { %2771 = vmatpush3.bf16.msra.mxu1 %v1737_v12  ;;  %v2934_v12 = vld [vmem:[%s3209_s6 + $0x8] sm:$0xff]  }
 0x5fe   : > { %2782 = vmatprep.subr.bf16.mxu1 %v3012_v48 }
 0x617   : > { %v1727_v13 = vpop.xlane.xlu1 %1726 }
 0x618   : > { %2961 = vrcp.f32 %v1727_v13 }
 0x619   : > { %2963 = vrcp.f32 %v1838_v1  ;;  %v2931_v1 = vld [vmem:[%s3209_s6 + $0x40] sm:$0xff]  }
 0x61b   : > { %v1843_v16 = vpop.permute.xlu1 %1842 }
 0x61c   : > { %v1848_v19 = vand.u32 %v1843_v16, %v3427_v4 }
 0x622   : > { %v2962_v14 = vpop.eup %2961 }
 0x623   : > { %v1729_v15 = vmul.f32 %v2962_v14, %v2956_v61  ;;  %v2964_v18 = vpop.eup %2963 }
 0x624   : > { %v1840_v21 = vmul.f32 %v2964_v18, %v2954_v55 }
 0x625   : > { %v1730_v17 = vpack.c.bf16 %v1729_v15, %v1729_v15 }
 0x626   : > { %v1841_v22 = vpack.c.bf16 %v1840_v21, %v1840_v21 }
 0x627   : > { %2773 = vmatmul.mubr.msk.bf16.vlgmr.msra.gmra.mrb[16].mxu1 %vm1505_vm9, %v1730_v17  ;;  %v2597_v17 = vld [vmem:[%s3623_s25] ss:$0 sm:$0xff] }
 0x628   : > { %2783 = vmatpush3.bf16.msra.mxu1 %v1848_v19  ;;  %2784 = vmatprep.mubr.msk.bf16.mxu1 %vm3013_vm4, %v3012_v48  ;;  %v2598_v19 = vld [vmem:[%s3624_s3] ss:$0 sm:$0xff] }
 0x629   : > { %2084 = vmatprep.subr.bf16.mxu1 %v2921_v2 }
 0x62f   : > { %2785 = vmatmul.mubr.msk.bf16.vlgmr.msra.gmra.mrb[20].mxu1 %vm1505_vm9, %v1841_v22 }
 0x630   : > { %2116 = vmatprep.mubr.bf16.mxu1 %v3011_v31  ;;  %v2918_v31 = vld [vmem:[%s3177_s0 + $0x18] sm:$0xff]  }
 0x631   : > { %2795 = vmatpush3.bf16.msra.mxu0 %v2918_v31  ;;  %v2945_v31 = vld [vmem:[%s3209_s6 + $0x78] sm:$0xff]  }
 0x632   : > { %2718 = vmatprep.subr.bf16.mxu0 %v2931_v1 }
 0x6c5   : > { %v1550_v4 = vpop.f32.mrb[8].mxu1 }
 0x6c6   : > { %v2750_v24 = vpop.f32.mrb[9].mxu1 }
 0x6c7   : > { %v1553_v25 = vpop.f32.mrb[10].mxu1  ;;  %v2936_v24 = vld [vmem:[%s3209_s6 + $0x10] sm:$0xff]  }
 0x6c8   : > { %v2751_v26 = vpop.f32.mrb[11].mxu1  ;;  %v2937_v25 = vld [vmem:[%s3209_s6 + $0x58] sm:$0xff]  }
 0x6c9   : > { %v2938_v26 = vld [vmem:[%s3209_s6 + $0x18] sm:$0xff]  }
 0x6cd   : > { %v1662_v27 = vpop.f32.mrb[12].mxu1 }
 0x6ce   : > { %1891 = vrot.lane.b32.xlu1 %v1662_v27, %s3019_s28  ;;  %v2762_v28 = vpop.f32.mrb[13].mxu1  ;;  %v2939_v27 = vld [vmem:[%s3209_s6 + $0x60] sm:$0xff]  }
 0x6cf   : > { %v1665_v29 = vpop.f32.mrb[14].mxu1  ;;  %v2940_v28 = vld [vmem:[%s3209_s6 + $0x20] sm:$0xff]  }
 0x6d0   : > { %v2763_v30 = vpop.f32.mrb[15].mxu1  ;;  %v2941_v29 = vld [vmem:[%s3209_s6 + $0x68] sm:$0xff]  }
 0x6d1   : > { %v2942_v30 = vld [vmem:[%s3209_s6 + $0x28] sm:$0xff]  }
 0x6fa   : > { %v1773_v34 = vpop.f32.mrb[16].mxu1 }
 0x6fb   : > { %1895 = vrot.lane.b32.xlu0 %v1773_v34, %s3017_s27  ;;  %v2774_v35 = vpop.f32.mrb[17].mxu1  ;;  %v2946_v34 = vld [vmem:[%s3209_s6 + $0x38] sm:$0xff]  }
 0x6fc   : > { %v1776_v36 = vpop.f32.mrb[18].mxu1  ;;  %v2029_v35 = vld [vmem:[%s3199_s23] sm:$0x3] }
 0x6fd   : > { %v2775_v37 = vpop.f32.mrb[19].mxu1  ;;  %v2034_v36 = vrot.slane %v2029_v35, %v1346_v49 }
 0x6fe   : > { %v2038_v37 = vrot.slane %v2029_v35, %v1350_v58 }
 0x702   : > { %v1884_v38 = vpop.f32.mrb[20].mxu1 }
 0x703   : > { %1899 = vrot.lane.b32.xlu1 %v1884_v38, %s3016_s19  ;;  %v2786_v39 = vpop.f32.mrb[21].mxu1 }
 0x704   : > { %v1887_v40 = vpop.f32.mrb[22].mxu1 }
 0x705   : > { %v2787_v41 = vpop.f32.mrb[23].mxu1 }
 0x740   : > { %v1892_v42 = vpop.permute.xlu1 %1891 }
 0x741   : > { %v1902_v48 = vsel %vm1444_vm5, %v1550_v4, %v1892_v42  ;;  %v2935_v4 = vld [vmem:[%s3209_s6 + $0x50] sm:$0xff]  }
 0x76d   : > { %v1896_v43 = vpop.permute.xlu0 %1895 }
 0x76e   : > { %v1904_v44 = vsel %vm1903_vm10, %v1902_v48, %v1896_v43 }
 0x775   : > { %v1900_v45 = vpop.permute.xlu1 %1899 }
 0x776   : > { %v1906_v46 = vsel %vm1905_vm11, %v1904_v44, %v1900_v45 }
 0x777   : > { %v1907_v50 = vpack.c.bf16 %v1906_v46, %v1906_v46 }
 0x779   : > { %2797 = vmatmul.mubr.msk.bf16.vlgmr.msra.gmra.mrb[12].mxu0 %vm1394_vm3, %v1907_v50 }
 0x77a   : > { %2719 = vmatpush3.bf16.msra.mxu0 %v2932_v10 }
 0x77b   : > { %2720 = vmatprep.subr.bf16.mxu0 %v2933_v11 }
 0x77e   : > { %2721 = vmatpush3.bf16.msra.mxu0 %v2934_v12 }
 0x77f   : > { %2722 = vmatprep.subr.bf16.mxu0 %v2935_v4 }
 0x782   : > { %2723 = vmatpush3.bf16.msra.mxu0 %v2936_v24 }
 0x783   : > { %2724 = vmatprep.subr.bf16.mxu0 %v2937_v25 }
 0x786   : > { %2725 = vmatpush3.bf16.msra.mxu0 %v2938_v26 }
 0x787   : > { %2726 = vmatprep.subr.bf16.mxu0 %v2939_v27 }
 0x78a   : > { %2727 = vmatpush3.bf16.msra.mxu0 %v2940_v28 }
 0x78b   : > { %2728 = vmatprep.subr.bf16.mxu0 %v2941_v29 }
 0x78e   : > { %2729 = vmatpush3.bf16.msra.mxu0 %v2942_v30 }
 0x78f   : > { %2730 = vmatprep.subr.bf16.mxu0 %v2943_v32 }
 0x792   : > { %2731 = vmatpush3.bf16.msra.mxu0 %v2944_v33 }
 0x793   : > { %2732 = vmatprep.subr.bf16.mxu0 %v2945_v31 }
 0x796   : > { %2733 = vmatpush3.bf16.msra.mxu0 %v2946_v34 }
 0x84c   : > { %v1984_v52 = vpop.f32.mrb[12].mxu0 }
 0x84d   : > { %v1985_v53 = vadd.f32 %v2591_v51, %v1984_v52  ;;  %v2798_v54 = vpop.f32.mrb[13].mxu0 }
 0x84e   : > { %v1987_v55 = vpop.f32.mrb[14].mxu0 }
 0x84f   : > { %v3497_v56 = vadd.f32 %v1985_v53, %v3375_v20  ;;  %v2799_v57 = vpop.f32.mrb[15].mxu0  ;;  %v2919_v20 = vld [vmem:[%s3194_s5] ss:$8 sps:$4 sm:$0xff]  }
 0x850   : > { %2085 = vmatpush1.bf16.msra.mxu1 %v2919_v20 }
 0x851   : > { %v1993_v59 = vsel %vm1304_vm2, %v3497_v56, 0.0  ;;  %2086 = vmatprep.subr.bf16.mxu1 %v2924_v3 }
 0x852   : > { %1994 = vadd.xlane.f32.xlu0 %v1993_v59 }
 0x854   : > { %2087 = vmatpush1.bf16.msra.mxu1 %v2922_v5 }
 0x855   : > { %2088 = vmatprep.subr.bf16.mxu1 %v2927_v6 }
 0x858   : > { %2089 = vmatpush1.bf16.msra.mxu1 %v2925_v7 }
 0x859   : > { %2090 = vmatprep.subr.bf16.mxu1 %v2930_v9 }
 0x85c   : > { %2091 = vmatpush1.bf16.msra.mxu1 %v2928_v8 }
 0x8df   : > { %v1995_v60 = vpop.xlane.xlu0 %1994 }
 0x8e0   : > { %v1996_v61 = vmul.f32 0.015625, %v1995_v60 }
 0x8e2   : > { %v1997_v62 = vsub.f32 %v3497_v56, %v1996_v61  ;;  %v2624_v61 = vld [vmem:[%s752_s18] ss:$0 sm:$0xff] }
 0x8e4   : > { %v1998_v63 = vmul.f32 %v1997_v62, %v1997_v62 }
 0x8e6   : > { %v1999_v0 = vsel %vm1304_vm2, %v1998_v63, 0.0 }
 0x8e7   : > { %2000 = vadd.xlane.f32.xlu1 %v1999_v0 }
 0x974   : > { %v2001_v13 = vpop.xlane.xlu1 %2000 }
 0x975   : > { %v2002_v14 = vmul.f32 0.015625, %v2001_v13 }
 0x977   : > { %v2003_v15 = vadd.f32 1e-06, %v2002_v14 }
 0x979   : > { %2965 = vrsqrt.f32 %v2003_v15 }
 0x983   : > { %v2966_v16 = vpop.eup %2965 }
 0x984   : > { %v2005_v18 = vmul.f32 %v2966_v16, %v1997_v62 }
 0x986   : > { %v2012_v21 = vmul.f32 %v2597_v17, %v2005_v18 }
 0x988   : > { %v2019_v22 = vadd.f32 %v2598_v19, %v2012_v21 }
 0x98a   : > { %v2020_v23 = vpack.c.bf16 %v2019_v22, %v2019_v22 }
 0x98c   : > { %2607 = vmatmul.mubr.msk.bf16.vlgmr.msra.gmra.mrb[24].mxu1 %vm1394_vm3, %v2020_v23 }
 0xa5f   : > { %v2118_v38 = vpop.f32.mrb[24].mxu1 }
 0xa60   : > { %v2119_v39 = vadd.f32 %v2118_v38, %v2034_v36  ;;  %v2120_v40 = vpop.f32.mrb[25].mxu1 }
 0xa61   : > { %v2121_v41 = vadd.f32 %v2120_v40, %v2038_v37  ;;  %v2122_v42 = vpop.f32.mrb[26].mxu1 }
 0xa62   : > { %v2127_v43 = vmul.f32 0.70710677, %v2119_v39  ;;  %v2123_v48 = vpop.f32.mrb[27].mxu1  ;;  %v2125_v50 = vmul.f32 0.5, %v2119_v39 }
 0xa63   : > { %v2128_v44 = vmul.f32 0.70710677, %v2121_v41  ;;  %v2126_v52 = vmul.f32 0.5, %v2121_v41 }
 0xa64   : > { %2967 = verf.f32 %v2127_v43 }
 0xa65   : > { %2969 = verf.f32 %v2128_v44 }
 0xa6e   : > { %v2968_v45 = vpop.eup %2967 }
 0xa6f   : > { %v2970_v46 = vpop.eup %2969  ;;  %v2131_v51 = vadd.f32 1.0, %v2968_v45 }
 0xa70   : > { %v2132_v49 = vadd.f32 1.0, %v2970_v46 }
 0xa71   : > { %v2133_v47 = vmul.f32 %v2131_v51, %v2125_v50 }
 0xa72   : > { %v2134_v58 = vmul.f32 %v2132_v49, %v2126_v52 }
 0xa73   : > { %v2135_v54 = vpack.c.bf16 %v2133_v47, %v2133_v47 }
 0xa74   : > { %v2136_v53 = vpack.c.bf16 %v2134_v58, %v2134_v58 }
 0xa76   : > { %2297 = vmatprep.mubr.bf16.mxu0 %v2136_v53 }
 0xa77   : > { %2298 = vmatmul.mubr.bf16.vlgmr.msra.gmra.mrb[16].mxu0 %v2135_v54 }
 0xb4a   : > { %v2734_v55 = vpop.f32.mrb[16].mxu0 }
 0xb4b   : > { %v2735_v57 = vpop.f32.mrb[17].mxu0 }
 0xb4c   : > { %v2736_v59 = vadd.f32 %v2735_v57, %v2734_v55  ;;  %v2737_v60 = vpop.f32.mrb[18].mxu0 }
 0xb4d   : > { %v2738_v62 = vpop.f32.mrb[19].mxu0 }
 0xb4e   : > { %v2305_v63 = vadd.f32 %v2736_v59, %v3497_v56 }
 0xb50   : > { %v2313_v0 = vadd.f32 %v2624_v61, %v2305_v63 }
 0xb52   : > { %2314 = vst.msk [vmem:[%s3214_s4] sm:$0x1f] %vm1304_vm2, %v2313_v0 }
 0xb53 PF: > { %s3625_s26 = sld [smem:[#allocation5_spill]]  ;;  %s3626_s24 = sld [smem:[#allocation3_spill]] }
 0xb54   : > { %s3627_s25 = sld [smem:[#allocation4_spill]]  ;;  %s3629_s27 = sld [smem:[#allocation7_spill]] }
 0xb59   : > { %s27_s28 = sadd.s32 1, %s3625_s26   ;;  %s3628_s26 = sld [smem:[#allocation6_spill]] }
 0xb5a   : > { %p24_p8 = scmp.ge.s32.totalorder %s27_s28, 6  }
 0xb5c   :  { %26 = sbr.rel (!%p24_p8) target bundleno = 12 (0xc), region = 158 }

// kernel: ram_plus_forward.6
= control target key start
LH: loop header
LB: loop body
LE: loop exit
PB: predicated region body
PF: predicated region fallthrough
CT: control target
= control target key end

     0   :  { %s3331_s21 = smov 0   ;;  %s3333_s22 = smov 0   ;;  %s3762_s0 = inlined_call_operand.vmem [shape: f32[2,10,128], index: 0, kind: input, shape index: {}]   ;;  %s3763_s1 = inlined_call_operand.vmem [shape: f32[2,5,64], index: 1, kind: input, shape index: {}]   ;;  %s3764_s2 = inlined_call_operand.vmem [shape: bf16[2,128,128], index: 2, kind: input, shape index: {}]   ;;  %s3765_s3 = inlined_call_operand.vmem [shape: f32[2,1,128], index: 3, kind: input, shape index: {}]   ;;  %s3766_s4 = inlined_call_operand.vmem [shape: bf16[2,64,256], index: 4, kind: input, shape index: {}]   ;;  %s3767_s5 = inlined_call_operand.vmem [shape: f32[2,1,256], index: 5, kind: input, shape index: {}]   ;;  %s3768_s6 = inlined_call_operand.vmem [shape: bf16[2,128,128], index: 6, kind: input, shape index: {}]   ;;  %s3769_s7 = inlined_call_operand.vmem [shape: f32[2,1,128], index: 7, kind: input, shape index: {}]   ;;  %s3770_s8 = inlined_call_operand.vmem [shape: f32[2,1,128], index: 8, kind: input, shape index: {}]   ;;  %s3771_s9 = inlined_call_operand.vmem [shape: f32[2,1,128], index: 9, kind: input, shape index: {}]   ;;  %s3772_s10 = inlined_call_operand.vmem [shape: bf16[2,128,512], index: 10, kind: input, shape index: {}]   ;;  %s3773_s11 = inlined_call_operand.vmem [shape: f32[2,1,512], index: 11, kind: input, shape index: {}]   ;;  %s3774_s12 = inlined_call_operand.vmem [shape: bf16[2,512,128], index: 12, kind: input, shape index: {}]   ;;  %s3775_s13 = inlined_call_operand.vmem [shape: f32[2,1,128], index: 13, kind: input, shape index: {}]   ;;  %s3776_s14 = inlined_call_operand.vmem [shape: f32[2,1,128], index: 14, kind: input, shape index: {}]   ;;  %s3777_s15 = inlined_call_operand.vmem [shape: f32[2,1,128], index: 15, kind: input, shape index: {}]   ;;  %s3778_s16 = inlined_call_operand.vmem [shape: f32[2,10,128], index: 16, kind: output, shape index: {}]  }
   0x1   :  { %3784 = sst [smem:[#allocation10_spill]] %s3762_s0  ;;  %s3335_s23 = smov 0  }
   0x2   :  { %3785 = sst [smem:[#allocation11_spill]] %s3763_s1  ;;  %s3337_s24 = smov 0  }
   0x3   :  { %3786 = sst [smem:[#allocation12_spill]] %s3764_s2  ;;  %s3339_s25 = smov 0  }
   0x4   :  { %3787 = sst [smem:[#allocation13_spill]] %s3765_s3 }
   0x5   :  { %3788 = sst [smem:[#allocation14_spill]] %s3766_s4 }
   0x6   :  { %3789 = sst [smem:[#allocation15_spill]] %s3767_s5 }
   0x7   :  { %3790 = sst [smem:[#allocation16_spill]] %s3768_s6 }
   0x8   :  { %3791 = sst [smem:[#allocation17_spill]] %s3771_s9 }
   0x9   :  { %3792 = sst [smem:[#allocation18_spill]] %s3772_s10 }
   0xa   :  { %3793 = sst [smem:[#allocation19_spill]] %s3773_s11 }
   0xb   :  { %3794 = sst [smem:[#allocation20_spill]] %s3777_s15 }
   0xc   :  { %3795 = sst [smem:[#allocation21_spill]] %s3778_s16 }
   0xd LB: > { %3796 = sst [smem:[#allocation2_spill]] %s3221_s21  ;;  %s35_s26 = sadd.s32 1, %s3229_s23  ;;  %s3237_s25 = sphi %s3339_s25, %s26_s25   ;;  %s3233_s24 = sphi %s3337_s24, %s3830_s24   ;;  %s3229_s23 = sphi %s3335_s23, %s3829_s23   ;;  %s3225_s22 = sphi %s3333_s22, %s3828_s22   ;;  %s3221_s21 = sphi %s3331_s21, %s3827_s21  }
   0xe   : > { %3797 = sst [smem:[#allocation3_spill]] %s3229_s23  ;;  %s38_s27 = sadd.s32 1, %s3233_s24 }
   0xf   : > { %3798 = sst [smem:[#allocation4_spill]] %s3233_s24  ;;  %p36_p0 = scmp.ge.s32.totalorder %s35_s26, 2 }
  0x10   : > { %3799 = sst [smem:[#allocation5_spill]] %s3237_s25  ;;  %p2675_p1 = scmp.ge.s32.totalorder %s3237_s25, 1 }
  0x11   : > { %p607_p2 = scmp.lt.s32.totalorder %s3237_s25, 5  ;;  %s3832_s26 = smov (%p36_p0, %s35_s26), 0 }
  0x12   : > { %3800 = sst [smem:[#allocation6_spill]] %s3832_s26  ;;  %s3834_s27 = smov (!%p36_p0, %s38_s27), %s3233_s24 }
  0x13   : > { %p608_p3 = pnand %p2675_p1, %p607_p2  ;;  %p40_p4 = scmp.ge.s32.totalorder %s3834_s27, 2 }
  0x15   : > { %s3836_s27 = smov (%p40_p4, %s3834_s27), 0  ;;  %611 = sbr.rel (%p608_p3) target bundleno = 3585 (0xe01), region = 84 }
  0x16   : > { %3801 = sst [smem:[#allocation7_spill]] %s3836_s27 }
  0x1c   : > { %p715_p5 = scmp.lt.s32.totalorder %s3225_s22, 1  ;;  %p724_p6 = scmp.lt.s32.totalorder %s3221_s21, 1 }
  0x1d   : > { %s3802_s18 = sld [smem:[#allocation10_spill]]  ;;  %s3803_s1 = sld [smem:[#allocation11_spill]] }
  0x1e   : > { %s3838_s22 = smov (!%p715_p5, %s3225_s22), 1  ;;  %s3806_s2 = sld [smem:[#allocation12_spill]] }
  0x1f   : > { %s3365_s28 = scalar_select %p724_p6, %s3221_s21, 1 }
  0x20   : > { %s2800_s29 = sshll.u32 %s3838_s22, 4  ;;  %s2678_s30 = sshll.u32 %s3838_s22, 3 }
  0x21   : > { %s2801_s24 = sshll.u32 %s3365_s28, 6  ;;  %s3807_s4 = sld [smem:[#allocation14_spill]] }
  0x22   : > { %s2683_s27 = sshll.u32 %s3365_s28, 1  ;;  %s3809_s6 = sld [smem:[#allocation16_spill]] }
  0x23   : > { %s719_s19 = scalar_lea.vmem %s3802_s18, %s2800_s29  ;;  %s3373_s26 = scalar_lea.vmem %s3803_s1, %s2678_s30 }
  0x24   : > { %3804 = sst [smem:[#allocation8_spill]] %s3373_s26  ;;  %s3383_s22 = scalar_lea.vmem %s3806_s2, %s2801_s24 }
  0x25   : > { %s3810_s5 = sld [smem:[#allocation15_spill]]  ;;  %s2804_s30 = sshll.u32 %s3365_s28, 8 }
  0x26   : > { %s3812_s10 = sld [smem:[#allocation18_spill]]  ;;  %s3813_s11 = sld [smem:[#allocation19_spill]] }
  0x27   : > { %s3388_s18 = scalar_lea.vmem %s3807_s4, %s2801_s24  ;;  %s3428_s3 = scalar_lea.vmem %s3774_s12, %s2804_s30 }
  0x28   : > { %3808 = sst [smem:[#allocation9_spill]] %s3388_s18  ;;  %s3394_s1 = scalar_lea.vmem %s3809_s6, %s2801_s24 }
  0x29   : > { %s2688_s24 = sshll.u32 %s3365_s28, 2  ;;  %s771_s17 = scalar_lea.vmem %s3775_s13, %s3365_s28 }
  0x2a   : > { %s774_s6 = scalar_lea.vmem %s3776_s14, %s3365_s28  ;;  %s3815_s25 = sld [smem:[#allocation21_spill]] }
  0x2b   : > { %s3399_s21 = scalar_lea.vmem %s3810_s5, %s2683_s27  ;;  %s3816_s2 = sld [smem:[#allocation2_spill]] }
  0x2c   : > { %s3418_s23 = scalar_lea.vmem %s3812_s10, %s2804_s30  ;;  %s3423_s15 = scalar_lea.vmem %s3813_s11, %s2688_s24 }
  0x2d   : > { %s3814_s10 = sld [smem:[#allocation20_spill]] }
  0x30   : > { %s3445_s11 = scalar_lea.vmem %s3815_s25, %s2800_s29 }
  0x31   : > { %p2693_p7 = scmp.ne.s32.totalorder %s3816_s2, 0 }
  0x32   : > { %v788_v0 = vld [vmem:[%s719_s19] sm:$0xff] (!%p2693_p7)  ;;  %v789_v1 = vld [vmem:[%s719_s19 + $0x8] sm:$0x3] (!%p2693_p7) }
  0x33   : > { %s777_s9 = scalar_lea.vmem %s3814_s10, %s3365_s28  ;;  %787 = sbr.rel (%p2693_p7) target bundleno = 58 (0x3a), region = 88  ;;  %790 = vst [vmem:[%s3445_s11] sm:$0xff] (!%p2693_p7), %v788_v0  ;;  %791 = vst [vmem:[%s3445_s11 + $0x8] sm:$0x3] (!%p2693_p7), %v789_v1 }
  0x3a PF: > { %s3817_s18 = sld [smem:[#allocation9_spill]]  ;;  %v3035_v2 = vld [vmem:[%s3383_s22] sm:$0xff]   ;;  %v3239_v3 = vmov 0.0   ;;  %v3036_v4 = vld [vmem:[%s3383_s22 + $0x8] sm:$0xff]   ;;  %v3240_v6 = vmov 0   ;;  %vm3241_vm0 = vmmov 0   ;;  %v919_v25 = vlaneseq  ;;  %s3821_s26 = scalar_lea.vmem %s3769_s7, %s3365_s28 }
  0x3b   : > { %2885 = vmatprep.subr.bf16.mxu0 %v3239_v3  ;;  %1005 = vmatprep.mubr.bf16.mxu1 %v3240_v6  ;;  %s3818_s5 = sld [smem:[#allocation8_spill]]  ;;  %v3040_v10 = vld [vmem:[%s3383_s22 + $0x10] sm:$0xff]   ;;  %v3044_v12 = vld [vmem:[%s3383_s22 + $0x18] sm:$0xff]   ;;  %v3048_v17 = vld [vmem:[%s3383_s22 + $0x20] sm:$0xff]   ;;  %vm969_vm1 = vcmask 523264   ;;  %vm1017_vm2 = vcmask 261120   ;;  %s3822_s20 = scalar_lea.vmem %s3770_s8, %s3365_s28 }
  0x3c   : > { %2886 = vmatpush3.bf16.msra.mxu0 %v3035_v2  ;;  %2901 = vmatprep.mubr.msk.bf16.mxu0 %vm3241_vm0, %v3239_v3  ;;  %v3052_v18 = vld [vmem:[%s3383_s22 + $0x28] sm:$0xff]   ;;  %v3053_v20 = vld [vmem:[%s3383_s22 + $0x30] sm:$0xff]   ;;  %v3054_v21 = vld [vmem:[%s3383_s22 + $0x38] sm:$0xff]   ;;  %v3493_v26 = vshrl.u32 %v919_v25, 7  ;;  %vm1095_vm3 = vcmask 1041408   ;;  %s3819_s29 = sld [smem:[#allocation13_spill]] }
  0x3d   : > { %2887 = vmatprep.subr.bf16.mxu0 %v3239_v3  ;;  %v3482_v22 = vld [vmem:[%s3445_s11] sm:$0xff]  ;;  %v3485_v23 = vld [vmem:[%s3445_s11 + $0x8] sm:$0x3]  ;;  %vm1096_vm4 = vcmask 1042432   ;;  %v3242_v42 = vmov 65535   ;;  %vm1067_vm5 = vcmask 39936  }
  0x3e   : > { %v796_v24 = vpack.c.bf16 %v3485_v23, %v3482_v22  ;;  %v921_v27 = vsub.s32 0, %v3493_v26  ;;  %v917_v28 = vld [vmem:[%s3399_s21] sm:$0x3]  ;;  %v925_v35 = vsub.s32 1, %v3493_v26  ;;  %v1097_v43 = vsel %vm1095_vm3, 4294967295, %v3242_v42  ;;  %s3243_s22 = smov 96  }
  0x3f   : > { %v3515_v50 = vsel %vm1096_vm4, %v1097_v43, 0  ;;  %vm1071_vm6 = vcmask 33792   ;;  %s3244_s0 = smov 64   ;;  %s3245_s30 = smov 32   ;;  %vm1549_vm7 = vcmask 785408  }
  0x40   : > { %v3037_v5 = vld [vmem:[%s3817_s18 + $0x4] ss:$8 sps:$4 sm:$0xff]   ;;  %v3039_v7 = vld [vmem:[%s3817_s18] ss:$8 sps:$4 sm:$0xff]   ;;  %v3041_v8 = vld [vmem:[%s3817_s18 + $0x14] ss:$8 sps:$4 sm:$0xff]   ;;  %2888 = vmatpush3.bf16.msra.mxu0 %v3036_v4  ;;  %v922_v29 = vrot.slane %v917_v28, %v921_v27  ;;  %v926_v38 = vrot.slane %v917_v28, %v925_v35 }
  0x41   : > { %973 = vmatprep.subr.bf16.mxu1 %v3037_v5  ;;  %v3043_v9 = vld [vmem:[%s3817_s18 + $0x10] ss:$8 sps:$4 sm:$0xff]   ;;  %2889 = vmatprep.subr.bf16.mxu0 %v3239_v3  ;;  %v3045_v11 = vld [vmem:[%s3817_s18 + $0x24] ss:$8 sps:$4 sm:$0xff]   ;;  %v3047_v13 = vld [vmem:[%s3817_s18 + $0x20] ss:$8 sps:$4 sm:$0xff]  }
  0x42   : > { %974 = vmatpush1.bf16.msra.mxu1 %v3039_v7  ;;  %v3049_v14 = vld [vmem:[%s3817_s18 + $0x34] ss:$8 sps:$4 sm:$0xff]   ;;  %v3051_v15 = vld [vmem:[%s3817_s18 + $0x30] ss:$8 sps:$4 sm:$0xff]   ;;  %v794_v16 = vld [vmem:[%s3818_s5] sm:$0x1f]  ;;  %s3820_s19 = scalar_lea.vmem %s3819_s29, %s3365_s28 }
  0x43   : > { %975 = vmatprep.subr.bf16.mxu1 %v3041_v8  ;;  %v795_v19 = vpack.c.bf16 %v794_v16, %v794_v16  ;;  %v2694_v40 = vld [vmem:[%s3820_s19] ss:$0 sm:$0xff]  ;;  %s3823_s25 = sld [smem:[#allocation17_spill]] }
  0x44   : > { %2890 = vmatpush3.bf16.msra.mxu0 %v3040_v10 }
  0x45   : > { %2891 = vmatprep.subr.bf16.mxu0 %v3239_v3 }
  0x46   : > { %976 = vmatpush1.bf16.msra.mxu1 %v3043_v9 }
  0x47   : > { %977 = vmatprep.subr.bf16.mxu1 %v3045_v11 }
  0x48   : > { %2892 = vmatpush3.bf16.msra.mxu0 %v3044_v12 }
  0x49   : > { %2893 = vmatprep.subr.bf16.mxu0 %v3239_v3  ;;  %s3824_s2 = scalar_lea.vmem %s3823_s25, %s3365_s28 }
  0x4a   : > { %978 = vmatpush1.bf16.msra.mxu1 %v3047_v13 }
  0x4b   : > { %979 = vmatprep.subr.bf16.mxu1 %v3049_v14 }
  0x4c   : > { %2894 = vmatpush3.bf16.msra.mxu0 %v3048_v17 }
  0x4d   : > { %2895 = vmatprep.subr.bf16.mxu0 %v3239_v3 }
  0x4e   : > { %980 = vmatpush1.bf16.msra.mxu1 %v3051_v15 }
  0x4f   : > { %2905 = vmatprep.subr.bf16.mxu1 %v3239_v3 }
  0x50   : > { %2896 = vmatpush3.bf16.msra.mxu0 %v3052_v18 }
  0x51   : > { %2711 = vmatmul.mubr.msk.bf16.vlgmr.msra.gmra.mrb[0].mxu1 %vm969_vm1, %v795_v19  ;;  %2897 = vmatprep.subr.bf16.mxu0 %v3239_v3 }
  0x52   : > { %2907 = vmatprep.mubr.msk.bf16.mxu1 %vm3241_vm0, %v3239_v3 }
  0x54   : > { %2898 = vmatpush3.bf16.msra.mxu0 %v3053_v20 }
  0x55   : > { %2899 = vmatprep.subr.bf16.mxu0 %v3239_v3 }
  0x58   : > { %2900 = vmatpush3.bf16.msra.mxu0 %v3054_v21 }
  0x59   : > { %2941 = vmatprep.subr.bf16.mxu0 %v3239_v3 }
  0x5b   : > { %2902 = vmatmul.mubr.bf16.vlgmr.msra.gmra.mrb[0].mxu0 %v796_v24 }
  0x5c   : > { %2943 = vmatprep.mubr.msk.bf16.mxu0 %vm3241_vm0, %v3239_v3 }
 0x124   : > { %v1007_v30 = vpop.f32.mrb[0].mxu1 }
 0x125   : > { %v1008_v31 = vadd.f32 %v1007_v30, %v922_v29  ;;  %v1009_v32 = vpop.f32.mrb[1].mxu1 }
 0x126   : > { %v1011_v33 = vpop.f32.mrb[2].mxu1  ;;  %v1010_v39 = vadd.f32 %v1009_v32, %v926_v38 }
 0x127   : > { %v3499_v34 = vpack.c.bf16 %v1008_v31, %v1008_v31  ;;  %v1012_v36 = vpop.f32.mrb[3].mxu1 }
 0x128   : > { %v3513_v45 = vpack.c.bf16 %v1010_v39, %v1010_v39 }
 0x129   : > { %v1022_v37 = vsel %vm1017_vm2, %v3499_v34, 0 }
 0x12a   : > { %2906 = vmatpush3.bf16.xpose.msra.mxu1 %v1022_v37  ;;  %v1100_v52 = vand.u32 %v3515_v50, %v3513_v45 }
 0x12b   : > { %2911 = vmatprep.subr.bf16.mxu1 %v3239_v3 }
 0x12e   : > { %v902_v41 = vpop.f32.mrb[0].mxu0 }
 0x12f   : > { %v2903_v44 = vpop.f32.mrb[1].mxu0  ;;  %v903_v47 = vadd.f32 %v2694_v40, %v902_v41 }
 0x130   : > { %v905_v46 = vpop.f32.mrb[2].mxu0 }
 0x131   : > { %v906_v48 = vadd.f32 %v2694_v40, %v905_v46  ;;  %v2904_v49 = vpop.f32.mrb[3].mxu0 }
 0x133   : > { %v3517_v51 = vpack.c.bf16 %v906_v48, %v903_v47 }
 0x135   : > { %2908 = vmatmul.mubr.msk.bf16.vlgmr.msra.gmra.mrb[4].mxu1 %vm1017_vm2, %v3517_v51 }
 0x136   : > { %2912 = vmatpush3.bf16.msra.mxu1 %v1100_v52  ;;  %2913 = vmatprep.mubr.msk.bf16.mxu1 %vm3241_vm0, %v3239_v3 }
 0x137   : > { %2917 = vmatprep.subr.bf16.mxu1 %v3239_v3 }
 0x208   : > { %v1058_v53 = vpop.f32.mrb[4].mxu1 }
 0x209   : > { %v1065_v54 = vmul.f32 0.17677669, %v1058_v53  ;;  %v2909_v55 = vpop.f32.mrb[5].mxu1 }
 0x20a   : > { %v1061_v56 = vpop.f32.mrb[6].mxu1 }
 0x20b   : > { %v1066_v57 = vmul.f32 0.17677669, %v1061_v56  ;;  %v2910_v58 = vpop.f32.mrb[7].mxu1  ;;  %v1068_v59 = vsel %vm1067_vm5, %v1065_v54, -inf }
 0x20c   : > { %1069 = vmax.xlane.f32.xlu0 %v1068_v59 }
 0x20d   : > { %v1072_v60 = vsel %vm1071_vm6, %v1066_v57, -inf }
 0x210   : > { %1073 = vmax.xlane.f32.xlu0 %v1072_v60 }
 0x226   : > { %1147 = vrot.lane.b32.xlu0 %v3499_v34, %s3243_s22 }
 0x299   : > { %v1070_v61 = vpop.xlane.xlu0 %1069 }
 0x29a   : > { %v1075_v62 = vsub.f32 %v1065_v54, %v1070_v61 }
 0x29c   : > { %v1077_v63 = vmul.f32 1.442695, %v1075_v62 }
 0x29d   : > { %v1074_v0 = vpop.xlane.xlu0 %1073 }
 0x29e   : > { %3143 = vpow2.f32 %v1077_v63  ;;  %v1076_v1 = vsub.f32 %v1066_v57, %v1074_v0 }
 0x2a0   : > { %v1079_v2 = vmul.f32 1.442695, %v1076_v1 }
 0x2a1   : > { %v1148_v15 = vpop.permute.xlu0 %1147 }
 0x2a2   : > { %3145 = vpow2.f32 %v1079_v2  ;;  %v1153_v17 = vsel %vm1017_vm2, %v1148_v15, 0 }
 0x2a8   : > { %v3144_v4 = vpop.eup %3143 }
 0x2a9   : > { %v1081_v5 = vsel %vm1067_vm5, %v3144_v4, 0.0 }
 0x2aa   : > { %1082 = vadd.xlane.f32.xlu1 %v1081_v5 }
 0x2ac   : > { %v3146_v7 = vpop.eup %3145 }
 0x2ad   : > { %v1084_v8 = vsel %vm1071_vm6, %v3146_v7, 0.0 }
 0x2ae   : > { %1085 = vadd.xlane.f32.xlu1 %v1084_v8 }
 0x2bf   : > { %1144 = vrot.lane.b32.xlu1 %v3517_v51, %s3243_s22 }
 0x337   : > { %v1083_v9 = vpop.xlane.xlu1 %1082 }
 0x338   : > { %3147 = vrcp.f32 %v1083_v9 }
 0x33b   : > { %v1086_v10 = vpop.xlane.xlu1 %1085 }
 0x33c   : > { %3149 = vrcp.f32 %v1086_v10 }
 0x33f   : > { %v1145_v18 = vpop.permute.xlu1 %1144 }
 0x342   : > { %v3148_v11 = vpop.eup %3147 }
 0x343   : > { %v1089_v13 = vmul.f32 %v3148_v11, %v3144_v4 }
 0x346   : > { %v3150_v12 = vpop.eup %3149 }
 0x347   : > { %v1090_v14 = vmul.f32 %v3150_v12, %v3146_v7 }
 0x349   : > { %v1091_v16 = vpack.c.bf16 %v1090_v14, %v1089_v13 }
 0x34b   : > { %2914 = vmatmul.mubr.msk.bf16.vlgmr.msra.gmra.mrb[8].mxu1 %vm1067_vm5, %v1091_v16 }
 0x34c   : > { %2918 = vmatpush3.bf16.xpose.msra.mxu1 %v1153_v17  ;;  %2919 = vmatprep.mubr.msk.bf16.mxu1 %vm3241_vm0, %v3239_v3 }
 0x34d   : > { %2923 = vmatprep.subr.bf16.mxu1 %v3239_v3 }
 0x353   : > { %2920 = vmatmul.mubr.msk.bf16.vlgmr.msra.gmra.mrb[12].mxu1 %vm1017_vm2, %v1145_v18 }
 0x354   : > { %2925 = vmatprep.mubr.msk.bf16.mxu1 %vm3241_vm0, %v3239_v3 }
 0x41e   : > { %v3542_v19 = vpop.f32.mrb[8].mxu1 }
 0x41f   : > { %v2915_v20 = vpop.f32.mrb[9].mxu1 }
 0x420   : > { %v3544_v21 = vpop.f32.mrb[10].mxu1 }
 0x421   : > { %v2916_v24 = vpop.f32.mrb[11].mxu1 }
 0x426   : > { %v1189_v25 = vpop.f32.mrb[12].mxu1 }
 0x427   : > { %v1196_v28 = vmul.f32 0.17677669, %v1189_v25  ;;  %v2921_v29 = vpop.f32.mrb[13].mxu1 }
 0x428   : > { %v1192_v30 = vpop.f32.mrb[14].mxu1 }
 0x429   : > { %v1197_v31 = vmul.f32 0.17677669, %v1192_v30  ;;  %v2922_v32 = vpop.f32.mrb[15].mxu1  ;;  %v1198_v33 = vsel %vm1067_vm5, %v1196_v28, -inf }
 0x42a   : > { %1199 = vmax.xlane.f32.xlu1 %v1198_v33 }
 0x42b   : > { %v1201_v36 = vsel %vm1071_vm6, %v1197_v31, -inf }
 0x42c   : > { %1202 = vmax.xlane.f32.xlu0 %v1201_v36 }
 0x43b   : > { %1273 = vrot.lane.b32.xlu1 %v3499_v34, %s3244_s0 }
 0x4b7   : > { %v1200_v37 = vpop.xlane.xlu1 %1199 }
 0x4b8   : > { %v1204_v38 = vsub.f32 %v1196_v28, %v1200_v37 }
 0x4b9   : > { %v1203_v39 = vpop.xlane.xlu0 %1202 }
 0x4ba   : > { %v1206_v40 = vmul.f32 1.442695, %v1204_v38  ;;  %v1205_v41 = vsub.f32 %v1197_v31, %v1203_v39 }
 0x4bb   : > { %v1274_v48 = vpop.permute.xlu1 %1273 }
 0x4bc   : > { %3151 = vpow2.f32 %v1206_v40  ;;  %v1208_v42 = vmul.f32 1.442695, %v1205_v41  ;;  %v1279_v61 = vsel %vm1017_vm2, %v1274_v48, 0 }
 0x4be   : > { %3153 = vpow2.f32 %v1208_v42 }
 0x4c6   : > { %v3152_v43 = vpop.eup %3151 }
 0x4c7   : > { %v1210_v44 = vsel %vm1067_vm5, %v3152_v43, 0.0 }
 0x4c8   : > { %v3154_v46 = vpop.eup %3153  ;;  %1211 = vadd.xlane.f32.xlu0 %v1210_v44 }
 0x4c9   : > { %v1213_v47 = vsel %vm1071_vm6, %v3154_v46, 0.0 }
 0x4ca   : > { %1214 = vadd.xlane.f32.xlu1 %v1213_v47 }
 0x4db   : > { %1271 = vrot.lane.b32.xlu1 %v3517_v51, %s3244_s0 }
 0x4de   : > { %1222 = vrot.lane.b32.xlu0 %v3513_v45, %s3243_s22 }
 0x4df   : > { %1398 = vrot.lane.b32.xlu1 %v3499_v34, %s3245_s30 }
 0x4e2   : > { %1396 = vrot.lane.b32.xlu0 %v3517_v51, %s3245_s30 }
 0x555   : > { %v1212_v49 = vpop.xlane.xlu0 %1211 }
 0x556   : > { %3155 = vrcp.f32 %v1212_v49 }
 0x557   : > { %v1215_v52 = vpop.xlane.xlu1 %1214 }
 0x558   : > { %3157 = vrcp.f32 %v1215_v52 }
 0x559   : > { %v1223_v53 = vpop.permute.xlu0 %1222 }
 0x55a   : > { %v1228_v54 = vand.u32 %v1223_v53, %v3515_v50 }
 0x55b   : > { %v1272_v55 = vpop.permute.xlu1 %1271 }
 0x55c   : > { %2924 = vmatpush3.bf16.msra.mxu1 %v1228_v54 }
 0x55d   : > { %2929 = vmatprep.subr.bf16.mxu1 %v3239_v3  ;;  %v1397_v62 = vpop.permute.xlu0 %1396 }
 0x55f   : > { %v1399_v56 = vpop.permute.xlu1 %1398 }
 0x560   : > { %v3156_v57 = vpop.eup %3155  ;;  %v1404_v58 = vsel %vm1017_vm2, %v1399_v56, 0 }
 0x561   : > { %2942 = vmatpush3.bf16.xpose.msra.mxu0 %v1404_v58  ;;  %v1218_v51 = vmul.f32 %v3156_v57, %v3152_v43 }
 0x562   : > { %v3158_v34 = vpop.eup %3157  ;;  %2953 = vmatprep.subr.bf16.mxu0 %v3239_v3 }
 0x563   : > { %v1219_v59 = vmul.f32 %v3158_v34, %v3154_v46 }
 0x565   : > { %v1220_v60 = vpack.c.bf16 %v1219_v59, %v1218_v51 }
 0x567   : > { %2926 = vmatmul.mubr.msk.bf16.vlgmr.msra.gmra.mrb[16].mxu1 %vm1067_vm5, %v1220_v60 }
 0x568   : > { %2930 = vmatpush3.bf16.xpose.msra.mxu1 %v1279_v61  ;;  %2944 = vmatmul.mubr.msk.bf16.vlgmr.msra.gmra.mrb[4].mxu0 %vm1017_vm2, %v1397_v62 }
 0x569   : > { %2931 = vmatprep.mubr.msk.bf16.mxu1 %vm3241_vm0, %v3239_v3  ;;  %2935 = vmatprep.subr.bf16.mxu1 %v3239_v3 }
 0x56a   : > { %2969 = vmatprep.mubr.msk.bf16.mxu0 %vm3241_vm0, %v3239_v3 }
 0x56f   : > { %2932 = vmatmul.mubr.msk.bf16.vlgmr.msra.gmra.mrb[20].mxu1 %vm1017_vm2, %v1272_v55 }
 0x570   : > { %2937 = vmatprep.mubr.msk.bf16.mxu1 %vm3241_vm0, %v3239_v3 }
 0x63a   : > { %v1264_v63 = vpop.f32.mrb[16].mxu1 }
 0x63b   : > { %v2927_v0 = vpop.f32.mrb[17].mxu1  ;;  %v1440_v1 = vpop.f32.mrb[4].mxu0 }
 0x63c   : > { %v1267_v2 = vpop.f32.mrb[18].mxu1  ;;  %v2945_v4 = vpop.f32.mrb[5].mxu0  ;;  %v1447_v17 = vmul.f32 0.17677669, %v1440_v1 }
 0x63d   : > { %v3020_v5 = vpack.i.bf16 %v1267_v2, %v1264_v63  ;;  %v2928_v7 = vpop.f32.mrb[19].mxu1  ;;  %v1443_v8 = vpop.f32.mrb[6].mxu0 }
 0x63e   : > { %v2946_v9 = vpop.f32.mrb[7].mxu0  ;;  %v1448_v20 = vmul.f32 0.17677669, %v1443_v8  ;;  %v1449_v24 = vsel %vm1067_vm5, %v1447_v17, -inf  ;;  %v3057_v7 = vld [vmem:[%s3394_s1 + $0x10] sm:$0xff]   ;;  %v3058_v8 = vld [vmem:[%s3394_s1 + $0x18] sm:$0xff]  }
 0x63f   : > { %v3059_v9 = vld [vmem:[%s3394_s1 + $0x20] sm:$0xff]  }
 0x640   : > { %v1452_v25 = vsel %vm1071_vm6, %v1448_v20, -inf }
 0x642   : > { %v1315_v10 = vpop.f32.mrb[20].mxu1 }
 0x643   : > { %v1322_v11 = vmul.f32 0.17677669, %v1315_v10  ;;  %v2933_v12 = vpop.f32.mrb[21].mxu1  ;;  %v3060_v10 = vld [vmem:[%s3394_s1 + $0x28] sm:$0xff]  }
 0x644   : > { %v1318_v13 = vpop.f32.mrb[22].mxu1 }
 0x645   : > { %v1323_v14 = vmul.f32 0.17677669, %v1318_v13  ;;  %v2934_v15 = vpop.f32.mrb[23].mxu1  ;;  %v1324_v16 = vsel %vm1067_vm5, %v1322_v11, -inf }
 0x646   : > { %1325 = vmax.xlane.f32.xlu1 %v1324_v16 }
 0x647   : > { %v1327_v18 = vsel %vm1071_vm6, %v1323_v14, -inf }
 0x648   : > { %1328 = vmax.xlane.f32.xlu0 %v1327_v18 }
 0x64c   : > { %1450 = vmax.xlane.f32.xlu0 %v1449_v24 }
 0x650   : > { %1453 = vmax.xlane.f32.xlu0 %v1452_v25 }
 0x6d3   : > { %v1326_v28 = vpop.xlane.xlu1 %1325 }
 0x6d4   : > { %v1330_v31 = vsub.f32 %v1322_v11, %v1326_v28  ;;  %v3061_v11 = vld [vmem:[%s3394_s1 + $0x30] sm:$0xff]  }
 0x6d5   : > { %v1329_v29 = vpop.xlane.xlu0 %1328 }
 0x6d6   : > { %v1331_v30 = vsub.f32 %v1323_v14, %v1329_v29  ;;  %v1332_v37 = vmul.f32 1.442695, %v1330_v31  ;;  %v3062_v14 = vld [vmem:[%s3394_s1 + $0x38] sm:$0xff]  }
 0x6d8   : > { %v1334_v32 = vmul.f32 1.442695, %v1331_v30 }
 0x6d9   : > { %v1451_v33 = vpop.xlane.xlu0 %1450 }
 0x6da   : > { %3159 = vpow2.f32 %v1334_v32  ;;  %v1455_v36 = vsub.f32 %v1447_v17, %v1451_v33 }
 0x6dc   : > { %v1457_v38 = vmul.f32 1.442695, %v1455_v36 }
 0x6dd   : > { %v1454_v39 = vpop.xlane.xlu0 %1453 }
 0x6de   : > { %3161 = vpow2.f32 %v1457_v38  ;;  %v1456_v40 = vsub.f32 %v1448_v20, %v1454_v39 }
 0x6df   : > { %3163 = vpow2.f32 %v1332_v37 }
 0x6e0   : > { %v1459_v41 = vmul.f32 1.442695, %v1456_v40 }
 0x6e2   : > { %3165 = vpow2.f32 %v1459_v41 }
 0x6e4   : > { %v3160_v42 = vpop.eup %3159 }
 0x6e5   : > { %v1339_v43 = vsel %vm1071_vm6, %v3160_v42, 0.0 }
 0x6e6   : > { %1340 = vadd.xlane.f32.xlu0 %v1339_v43 }
 0x6e8   : > { %v3162_v44 = vpop.eup %3161 }
 0x6e9   : > { %v1461_v46 = vsel %vm1067_vm5, %v3162_v44, 0.0  ;;  %v3164_v47 = vpop.eup %3163 }
 0x6ea   : > { %1462 = vadd.xlane.f32.xlu1 %v1461_v46  ;;  %v1336_v49 = vsel %vm1067_vm5, %v3164_v47, 0.0 }
 0x6ec   : > { %v3166_v48 = vpop.eup %3165 }
 0x6ed   : > { %v1464_v52 = vsel %vm1071_vm6, %v3166_v48, 0.0 }
 0x6ee   : > { %1337 = vadd.xlane.f32.xlu1 %v1336_v49  ;;  %1465 = vadd.xlane.f32.xlu0 %v1464_v52 }
 0x6ff   : > { %1347 = vrot.lane.b32.xlu1 %v3513_v45, %s3244_s0 }
 0x703   : > { %3021 = vrot.lane.b32.xlu1 %v3020_v5, %s3245_s30  ;;  %v3055_v5 = vld [vmem:[%s3394_s1] sm:$0xff]  }
 0x704   : > { %1472 = vrot.lane.b32.xlu0 %v3513_v45, %s3245_s30  ;;  %2954 = vmatpush3.bf16.msra.mxu0 %v3055_v5  ;;  %v3077_v5 = vld [vmem:[%s3418_s23 + $0x44] ss:$16 sps:$4 sm:$0xff]  }
 0x705   : > { %2955 = vmatprep.subr.bf16.mxu0 %v3239_v3 }
 0x773   : > { %v1341_v53 = vpop.xlane.xlu0 %1340 }
 0x774   : > { %3167 = vrcp.f32 %v1341_v53 }
 0x777   : > { %v1463_v54 = vpop.xlane.xlu1 %1462 }
 0x77b   : > { %v1338_v55 = vpop.xlane.xlu1 %1337  ;;  %v1466_v56 = vpop.xlane.xlu0 %1465 }
 0x77c   : > { %3169 = vrcp.f32 %v1338_v55 }
 0x77d   : > { %3171 = vrcp.f32 %v1466_v56  ;;  %v3063_v56 = vld [vmem:[%s3418_s23] ss:$16 sps:$4 sm:$0xff]  }
 0x77e   : > { %3173 = vrcp.f32 %v1463_v54  ;;  %v3168_v34 = vpop.eup %3167 }
 0x77f   : > { %v1348_v57 = vpop.permute.xlu1 %1347  ;;  %v1345_v59 = vmul.f32 %v3168_v34, %v3160_v42  ;;  %v1473_v45 = vpop.permute.xlu0 %1472  ;;  %v3068_v34 = vld [vmem:[%s3418_s23 + $0xc] ss:$16 sps:$4 sm:$0xff]  }
 0x780   : > { %v1353_v58 = vand.u32 %v1348_v57, %v3515_v50  ;;  %v1478_v63 = vand.u32 %v1473_v45, %v3515_v50  ;;  %v3056_v50 = vld [vmem:[%s3394_s1 + $0x8] sm:$0xff]   ;;  %v3065_v57 = vld [vmem:[%s3418_s23 + $0x4] ss:$16 sps:$4 sm:$0xff]  }
 0x781   : > { %2956 = vmatpush3.bf16.msra.mxu0 %v3056_v50  ;;  %v3080_v50 = vld [vmem:[%s3418_s23 + $0x4c] ss:$16 sps:$4 sm:$0xff]  }
 0x782   : > { %2936 = vmatpush3.bf16.msra.mxu1 %v1353_v58  ;;  %2957 = vmatprep.subr.bf16.mxu0 %v3239_v3  ;;  %v3066_v58 = vld [vmem:[%s3418_s23 + $0x8] ss:$16 sps:$4 sm:$0xff]  }
 0x783   : > { %2947 = vmatprep.subr.bf16.mxu1 %v3239_v3  ;;  %v3022_v29 = vpop.permute.xlu1 %3021 }
 0x784   : > { %v3024_v31 = vunpack.i.h.bf16 %v3022_v29  ;;  %v3023_v32 = vunpack.i.l.bf16 %v3022_v29  ;;  %v3099_v29 = vld [vmem:[%s3418_s23 + $0xc0] ss:$16 sps:$4 sm:$0xff]  }
 0x785   : > { %2958 = vmatpush3.bf16.msra.mxu0 %v3057_v7  ;;  %v3075_v7 = vld [vmem:[%s3418_s23 + $0x40] ss:$16 sps:$4 sm:$0xff]  }
 0x786   : > { %v3170_v51 = vpop.eup %3169  ;;  %2959 = vmatprep.subr.bf16.mxu0 %v3239_v3  ;;  %v1546_v37 = vsel %vm1017_vm2, %v3544_v21, %v3024_v31  ;;  %v1545_v38 = vsel %vm1017_vm2, %v3542_v19, %v3023_v32  ;;  %v2720_v19 = vld [vmem:[%s3821_s26] ss:$0 sm:$0xff]  ;;  %v3107_v31 = vld [vmem:[%s3418_s23 + $0xe4] ss:$16 sps:$4 sm:$0xff]   ;;  %v3110_v32 = vld [vmem:[%s3418_s23 + $0xec] ss:$16 sps:$4 sm:$0xff]  }
 0x787   : > { %v1344_v60 = vmul.f32 %v3170_v51, %v3164_v47  ;;  %v3172_v62 = vpop.eup %3171  ;;  %v3071_v51 = vld [vmem:[%s3418_s23 + $0x24] ss:$16 sps:$4 sm:$0xff]  }
 0x788   : > { %v3174_v0 = vpop.eup %3173  ;;  %v1470_v1 = vmul.f32 %v3172_v62, %v3166_v48 }
 0x789   : > { %v1346_v61 = vpack.c.bf16 %v1345_v59, %v1344_v60  ;;  %v1469_v2 = vmul.f32 %v3174_v0, %v3162_v44  ;;  %2960 = vmatpush3.bf16.msra.mxu0 %v3058_v8  ;;  %v3074_v59 = vld [vmem:[%s3418_s23 + $0x2c] ss:$16 sps:$4 sm:$0xff]   ;;  %v3069_v60 = vld [vmem:[%s3418_s23 + $0x20] ss:$16 sps:$4 sm:$0xff]   ;;  %v3078_v8 = vld [vmem:[%s3418_s23 + $0x48] ss:$16 sps:$4 sm:$0xff]  }
 0x78a   : > { %2961 = vmatprep.subr.bf16.mxu0 %v3239_v3 }
 0x78b   : > { %2938 = vmatmul.mubr.msk.bf16.vlgmr.msra.gmra.mrb[24].mxu1 %vm1067_vm5, %v1346_v61  ;;  %v1471_v4 = vpack.c.bf16 %v1470_v1, %v1469_v2 }
 0x78c   : > { %2948 = vmatpush3.bf16.msra.mxu1 %v1478_v63  ;;  %2949 = vmatprep.mubr.msk.bf16.mxu1 %vm3241_vm0, %v3239_v3 }
 0x78d   : > { %2962 = vmatpush3.bf16.msra.mxu0 %v3059_v9  ;;  %1925 = vmatprep.subr.bf16.mxu1 %v3065_v57  ;;  %v3083_v9 = vld [vmem:[%s3418_s23 + $0x64] ss:$16 sps:$4 sm:$0xff]   ;;  %v3115_v57 = vld [vmem:[%s3428_s3 + $0x48] sm:$0xff]  }
 0x78e   : > { %2963 = vmatprep.subr.bf16.mxu0 %v3239_v3 }
 0x791   : > { %2964 = vmatpush3.bf16.msra.mxu0 %v3060_v10  ;;  %v3086_v10 = vld [vmem:[%s3418_s23 + $0x6c] ss:$16 sps:$4 sm:$0xff]  }
 0x792   : > { %2965 = vmatprep.subr.bf16.mxu0 %v3239_v3 }
 0x793   : > { %2950 = vmatmul.mubr.msk.bf16.vlgmr.msra.gmra.mrb[28].mxu1 %vm1067_vm5, %v1471_v4 }
 0x794   : > { %1957 = vmatprep.mubr.bf16.mxu1 %v3240_v6  ;;  %1926 = vmatpush1.bf16.msra.mxu1 %v3063_v56 }
 0x795   : > { %2966 = vmatpush3.bf16.msra.mxu0 %v3061_v11  ;;  %1927 = vmatprep.subr.bf16.mxu1 %v3071_v51  ;;  %v3081_v11 = vld [vmem:[%s3418_s23 + $0x60] ss:$16 sps:$4 sm:$0xff]   ;;  %v3118_v51 = vld [vmem:[%s3428_s3 + $0x88] sm:$0xff]  }
 0x796   : > { %2967 = vmatprep.subr.bf16.mxu0 %v3239_v3 }
 0x798   : > { %1928 = vmatpush1.bf16.msra.mxu1 %v3069_v60  ;;  %v3120_v60 = vld [vmem:[%s3428_s3 + $0xd0] sm:$0xff]  }
 0x799   : > { %2968 = vmatpush3.bf16.msra.mxu0 %v3062_v14  ;;  %1929 = vmatprep.subr.bf16.mxu1 %v3077_v5  ;;  %v3092_v14 = vld [vmem:[%s3418_s23 + $0x8c] ss:$16 sps:$4 sm:$0xff]  }
 0x79a   : > { %1968 = vmatprep.subr.bf16.mxu0 %v3068_v34  ;;  %v3117_v34 = vld [vmem:[%s3428_s3 + $0x8] sm:$0xff]  }
 0x79b   : > { %v3131_v5 = vld [vmem:[%s3428_s3 + $0x68] sm:$0xff]  }
 0x79c   : > { %1930 = vmatpush1.bf16.msra.mxu1 %v3075_v7  ;;  %v3133_v7 = vld [vmem:[%s3428_s3 + $0x28] sm:$0xff]  }
 0x79d   : > { %1931 = vmatprep.subr.bf16.mxu1 %v3083_v9  ;;  %v3135_v9 = vld [vmem:[%s3428_s3 + $0x70] sm:$0xff]  }
 0x7a0   : > { %1932 = vmatpush1.bf16.msra.mxu1 %v3081_v11  ;;  %v3137_v11 = vld [vmem:[%s3428_s3 + $0x30] sm:$0xff]  }
 0x85e   : > { %v1389_v12 = vpop.f32.mrb[24].mxu1 }
 0x85f   : > { %v2939_v13 = vpop.f32.mrb[25].mxu1 }
 0x860   : > { %v1392_v15 = vpop.f32.mrb[26].mxu1  ;;  %v3089_v13 = vld [vmem:[%s3418_s23 + $0x84] ss:$16 sps:$4 sm:$0xff]  }
 0x861   : > { %v3025_v16 = vpack.i.bf16 %v1392_v15, %v1389_v12  ;;  %v2940_v17 = vpop.f32.mrb[27].mxu1  ;;  %v3084_v12 = vld [vmem:[%s3418_s23 + $0x68] ss:$16 sps:$4 sm:$0xff]   ;;  %v3087_v15 = vld [vmem:[%s3418_s23 + $0x80] ss:$16 sps:$4 sm:$0xff]   ;;  %1933 = vmatprep.subr.bf16.mxu1 %v3089_v13 }
 0x862   : > { %1934 = vmatpush1.bf16.msra.mxu1 %v3087_v15  ;;  %v3095_v17 = vld [vmem:[%s3418_s23 + $0xa4] ss:$16 sps:$4 sm:$0xff]   ;;  %v3139_v13 = vld [vmem:[%s3428_s3 + $0x78] sm:$0xff]  }
 0x863   : > { %3026 = vrot.lane.b32.xlu1 %v3025_v16, %s3244_s0  ;;  %v3090_v16 = vld [vmem:[%s3418_s23 + $0x88] ss:$16 sps:$4 sm:$0xff]   ;;  %1935 = vmatprep.subr.bf16.mxu1 %v3095_v17  ;;  %v1755_v17 = vsub.s32 2, %v3493_v26 }
 0x864   : > { %v3141_v15 = vld [vmem:[%s3428_s3 + $0x38] sm:$0xff]  }
 0x866   : > { %v1514_v18 = vpop.f32.mrb[28].mxu1 }
 0x867   : > { %v2951_v20 = vpop.f32.mrb[29].mxu1 }
 0x868   : > { %v1517_v24 = vpop.f32.mrb[30].mxu1  ;;  %v3093_v20 = vld [vmem:[%s3418_s23 + $0xa0] ss:$16 sps:$4 sm:$0xff]  }
 0x869   : > { %v3030_v25 = vpack.i.bf16 %v1517_v24, %v1514_v18  ;;  %v2952_v28 = vpop.f32.mrb[31].mxu1  ;;  %v3098_v18 = vld [vmem:[%s3418_s23 + $0xac] ss:$16 sps:$4 sm:$0xff]   ;;  %v3096_v24 = vld [vmem:[%s3418_s23 + $0xa8] ss:$16 sps:$4 sm:$0xff]   ;;  %1936 = vmatpush1.bf16.msra.mxu1 %v3093_v20  ;;  %v1759_v20 = vsub.s32 3, %v3493_v26 }
 0x86a   : > { %v3104_v28 = vld [vmem:[%s3418_s23 + $0xcc] ss:$16 sps:$4 sm:$0xff]  }
 0x86b   : > { %3031 = vrot.lane.b32.xlu1 %v3030_v25, %s3243_s22  ;;  %v3101_v25 = vld [vmem:[%s3418_s23 + $0xc4] ss:$16 sps:$4 sm:$0xff]  }
 0x86c   : > { %1937 = vmatprep.subr.bf16.mxu1 %v3101_v25 }
 0x86d   : > { %1938 = vmatpush1.bf16.msra.mxu1 %v3099_v29 }
 0x86e   : > { %1939 = vmatprep.subr.bf16.mxu1 %v3107_v31 }
 0x8d5   : > { %v3027_v30 = vpop.permute.xlu1 %3026 }
 0x8d6   : > { %v3029_v3 = vunpack.i.h.bf16 %v3027_v30  ;;  %v3028_v33 = vunpack.i.l.bf16 %v3027_v30  ;;  %v3102_v30 = vld [vmem:[%s3418_s23 + $0xc8] ss:$16 sps:$4 sm:$0xff]  }
 0x8d8   : > { %v1548_v41 = vsel %vm969_vm1, %v1546_v37, %v3029_v3  ;;  %v1547_v42 = vsel %vm969_vm1, %v1545_v38, %v3028_v33  ;;  %v3105_v3 = vld [vmem:[%s3418_s23 + $0xe0] ss:$16 sps:$4 sm:$0xff]   ;;  %v3108_v33 = vld [vmem:[%s3418_s23 + $0xe8] ss:$16 sps:$4 sm:$0xff]  }
 0x8d9   : > { %1940 = vmatpush1.bf16.msra.mxu1 %v3105_v3  ;;  %v3112_v37 = vld [vmem:[%s3428_s3 + $0xc0] sm:$0xff]  }
 0x8dd   : > { %v3032_v36 = vpop.permute.xlu1 %3031 }
 0x8de   : > { %v3034_v39 = vunpack.i.h.bf16 %v3032_v36  ;;  %v3033_v40 = vunpack.i.l.bf16 %v3032_v36  ;;  %v3111_v36 = vld [vmem:[%s3428_s3 + $0x40] sm:$0xff]  }
 0x8df   : > { %2841 = vmatprep.subr.bf16.mxu1 %v3111_v36 }
 0x8e0   : > { %v1551_v43 = vsel %vm1549_vm7, %v1548_v41, %v3034_v39  ;;  %v1550_v44 = vsel %vm1549_vm7, %v1547_v42, %v3033_v40 }
 0x8e1   : > { %v1552_v46 = vpack.c.bf16 %v1551_v43, %v1550_v44 }
 0x8e3   : > { %2970 = vmatmul.mubr.bf16.vlgmr.msra.gmra.mrb[8].mxu0 %v1552_v46 }
 0x8e4   : > { %2000 = vmatprep.mubr.bf16.mxu0 %v3240_v6  ;;  %1969 = vmatpush1.bf16.msra.mxu0 %v3066_v58  ;;  %v3116_v58 = vld [vmem:[%s3428_s3 + $0xc8] sm:$0xff]  }
 0x8e5   : > { %1970 = vmatprep.subr.bf16.mxu0 %v3074_v59  ;;  %v3119_v59 = vld [vmem:[%s3428_s3 + $0x50] sm:$0xff]  }
 0x9b6   : > { %v1658_v21 = vpop.f32.mrb[8].mxu0 }
 0x9b7   : > { %v1659_v47 = vadd.f32 %v2720_v19, %v1658_v21  ;;  %v2971_v48 = vpop.f32.mrb[9].mxu0 }
 0x9b8   : > { %v1661_v49 = vpop.f32.mrb[10].mxu0 }
 0x9b9   : > { %v1662_v52 = vadd.f32 %v2720_v19, %v1661_v49  ;;  %v2972_v53 = vpop.f32.mrb[11].mxu0  ;;  %v1665_v54 = vadd.f32 %v1659_v47, %v3482_v22  ;;  %v3072_v22 = vld [vmem:[%s3418_s23 + $0x28] ss:$16 sps:$4 sm:$0xff]   ;;  %v2729_v19 = vld [vmem:[%s3822_s20] ss:$0 sm:$0xff] }
 0x9ba   : > { %1971 = vmatpush1.bf16.msra.mxu0 %v3072_v22  ;;  %v2730_v49 = vld [vmem:[%s3824_s2] ss:$0 sm:$0xff]  ;;  %v3121_v22 = vld [vmem:[%s3428_s3 + $0x10] sm:$0xff]  }
 0x9bb   : > { %1669 = vadd.xlane.f32.xlu1 %v1665_v54  ;;  %v1666_v6 = vadd.f32 %v1662_v52, %v3485_v23  ;;  %1972 = vmatprep.subr.bf16.mxu0 %v3080_v50  ;;  %v3132_v50 = vld [vmem:[%s3428_s3 + $0xe8] sm:$0xff]  }
 0x9bd   : > { %v1671_v55 = vsel %vm1095_vm3, %v1666_v6, 0.0 }
 0x9be   : > { %1672 = vadd.xlane.f32.xlu0 %v1671_v55  ;;  %1973 = vmatpush1.bf16.msra.mxu0 %v3078_v8  ;;  %v3114_v55 = vld [vmem:[%s3428_s3 + $0x80] sm:$0xff]   ;;  %v3134_v8 = vld [vmem:[%s3428_s3 + $0xa8] sm:$0xff]  }
 0x9bf   : > { %1974 = vmatprep.subr.bf16.mxu0 %v3086_v10  ;;  %v3136_v10 = vld [vmem:[%s3428_s3 + $0xf0] sm:$0xff]  }
 0x9c2   : > { %1975 = vmatpush1.bf16.msra.mxu0 %v3084_v12  ;;  %v3138_v12 = vld [vmem:[%s3428_s3 + $0xb0] sm:$0xff]  }
 0x9c3   : > { %1976 = vmatprep.subr.bf16.mxu0 %v3092_v14  ;;  %v3140_v14 = vld [vmem:[%s3428_s3 + $0xf8] sm:$0xff]  }
 0x9c6   : > { %1977 = vmatpush1.bf16.msra.mxu0 %v3090_v16  ;;  %v3142_v16 = vld [vmem:[%s3428_s3 + $0xb8] sm:$0xff]  }
 0x9c7   : > { %1978 = vmatprep.subr.bf16.mxu0 %v3098_v18  ;;  %v1743_v18 = vld [vmem:[%s3423_s15] sm:$0xf] }
 0x9c8   : > { %v1756_v25 = vrot.slane %v1743_v18, %v1755_v17  ;;  %v1760_v29 = vrot.slane %v1743_v18, %v1759_v20 }
 0x9ca   : > { %1979 = vmatpush1.bf16.msra.mxu0 %v3096_v24  ;;  %v1748_v24 = vrot.slane %v1743_v18, %v921_v27 }
 0x9cb   : > { %1980 = vmatprep.subr.bf16.mxu0 %v3104_v28  ;;  %v1752_v28 = vrot.slane %v1743_v18, %v925_v35 }
 0x9ce   : > { %1981 = vmatpush1.bf16.msra.mxu0 %v3102_v30 }
 0x9cf   : > { %1982 = vmatprep.subr.bf16.mxu0 %v3110_v32 }
 0x9d2   : > { %1983 = vmatpush1.bf16.msra.mxu0 %v3108_v33 }
 0x9d3   : > { %2863 = vmatprep.subr.bf16.mxu0 %v3112_v37 }
 0xa48   : > { %v1670_v23 = vpop.xlane.xlu1 %1669 }
 0xa49   : > { %v1675_v45 = vmul.f32 0.0078125, %v1670_v23  ;;  %v3122_v23 = vld [vmem:[%s3428_s3 + $0x90] sm:$0xff]  }
 0xa4b   : > { %v3636_v61 = vsub.f32 %v1665_v54, %v1675_v45  ;;  %v1673_v62 = vpop.xlane.xlu0 %1672  ;;  %v3123_v45 = vld [vmem:[%s3428_s3 + $0x58] sm:$0xff]  }
 0xa4c   : > { %v1676_v63 = vmul.f32 0.0078125, %v1673_v62  ;;  %v3125_v62 = vld [vmem:[%s3428_s3 + $0x18] sm:$0xff]  }
 0xa4d   : > { %v1679_v0 = vmul.f32 %v3636_v61, %v3636_v61 }
 0xa4e   : > { %v3640_v1 = vsub.f32 %v1666_v6, %v1676_v63  ;;  %v3113_v6 = vld [vmem:[%s3428_s3] sm:$0xff]   ;;  %v3126_v63 = vld [vmem:[%s3428_s3 + $0x98] sm:$0xff]  }
 0xa4f   : > { %1681 = vadd.xlane.f32.xlu0 %v1679_v0  ;;  %v3127_v0 = vld [vmem:[%s3428_s3 + $0x60] sm:$0xff]  }
 0xa50   : > { %v1680_v2 = vmul.f32 %v3640_v1, %v3640_v1 }
 0xa52   : > { %v1683_v4 = vsel %vm1095_vm3, %v1680_v2, 0.0  ;;  %v3129_v2 = vld [vmem:[%s3428_s3 + $0x20] sm:$0xff]  }
 0xa53   : > { %1684 = vadd.xlane.f32.xlu0 %v1683_v4  ;;  %v3130_v4 = vld [vmem:[%s3428_s3 + $0xa0] sm:$0xff]  }
 0xadc   : > { %v1682_v38 = vpop.xlane.xlu0 %1681 }
 0xadd   : > { %v1686_v39 = vmul.f32 0.0078125, %v1682_v38 }
 0xadf   : > { %v1688_v40 = vadd.f32 1e-12, %v1686_v39 }
 0xae0   : > { %v1685_v41 = vpop.xlane.xlu0 %1684 }
 0xae1   : > { %3175 = vrsqrt.f32 %v1688_v40  ;;  %v1687_v42 = vmul.f32 0.0078125, %v1685_v41 }
 0xae3   : > { %v1689_v43 = vadd.f32 1e-12, %v1687_v42 }
 0xae5   : > { %3177 = vrsqrt.f32 %v1689_v43 }
 0xaeb   : > { %v3176_v44 = vpop.eup %3175 }
 0xaec   : > { %v1692_v46 = vmul.f32 %v3176_v44, %v3636_v61  ;;  %v3124_v61 = vld [vmem:[%s3428_s3 + $0xd8] sm:$0xff]  }
 0xaee   : > { %v1700_v48 = vmul.f32 %v2729_v19, %v1692_v46 }
 0xaef   : > { %v3178_v21 = vpop.eup %3177 }
 0xaf0   : > { %v1693_v47 = vmul.f32 %v3178_v21, %v3640_v1  ;;  %v3683_v53 = vadd.f32 %v2730_v49, %v1700_v48  ;;  %v3128_v1 = vld [vmem:[%s3428_s3 + $0xe0] sm:$0xff]  }
 0xaf2   : > { %v1701_v52 = vmul.f32 %v2729_v19, %v1693_v47 }
 0xaf4   : > { %v3685_v54 = vadd.f32 %v2730_v49, %v1701_v52 }
 0xaf6   : > { %v1710_v56 = vpack.c.bf16 %v3685_v54, %v3683_v53 }
 0xaf8   : > { %1958 = vmatmul.mubr.bf16.vlgmr.msra.gmra.mrb[32].mxu1 %v1710_v56  ;;  %2001 = vmatmul.mubr.bf16.vlgmr.msra.gmra.mrb[12].mxu0 %v1710_v56 }
 0xaf9   : > { %2842 = vmatpush3.bf16.msra.mxu1 %v3113_v6  ;;  %2864 = vmatpush3.bf16.msra.mxu0 %v3114_v55 }
 0xafa   : > { %2843 = vmatprep.subr.bf16.mxu1 %v3115_v57  ;;  %2865 = vmatprep.subr.bf16.mxu0 %v3116_v58 }
 0xafd   : > { %2844 = vmatpush3.bf16.msra.mxu1 %v3117_v34  ;;  %2866 = vmatpush3.bf16.msra.mxu0 %v3118_v51 }
 0xafe   : > { %2845 = vmatprep.subr.bf16.mxu1 %v3119_v59  ;;  %2867 = vmatprep.subr.bf16.mxu0 %v3120_v60 }
 0xb01   : > { %2846 = vmatpush3.bf16.msra.mxu1 %v3121_v22  ;;  %2868 = vmatpush3.bf16.msra.mxu0 %v3122_v23 }
 0xb02   : > { %2847 = vmatprep.subr.bf16.mxu1 %v3123_v45  ;;  %2869 = vmatprep.subr.bf16.mxu0 %v3124_v61 }
 0xb05   : > { %2848 = vmatpush3.bf16.msra.mxu1 %v3125_v62  ;;  %2870 = vmatpush3.bf16.msra.mxu0 %v3126_v63 }
 0xb06   : > { %2849 = vmatprep.subr.bf16.mxu1 %v3127_v0  ;;  %2871 = vmatprep.subr.bf16.mxu0 %v3128_v1 }
 0xb09   : > { %2850 = vmatpush3.bf16.msra.mxu1 %v3129_v2  ;;  %2872 = vmatpush3.bf16.msra.mxu0 %v3130_v4 }
 0xb0a   : > { %2851 = vmatprep.subr.bf16.mxu1 %v3131_v5  ;;  %2873 = vmatprep.subr.bf16.mxu0 %v3132_v50 }
 0xb0d   : > { %2852 = vmatpush3.bf16.msra.mxu1 %v3133_v7  ;;  %2874 = vmatpush3.bf16.msra.mxu0 %v3134_v8 }
 0xb0e   : > { %2853 = vmatprep.subr.bf16.mxu1 %v3135_v9  ;;  %2875 = vmatprep.subr.bf16.mxu0 %v3136_v10 }
 0xb11   : > { %2854 = vmatpush3.bf16.msra.mxu1 %v3137_v11  ;;  %2876 = vmatpush3.bf16.msra.mxu0 %v3138_v12 }
 0xb12   : > { %2855 = vmatprep.subr.bf16.mxu1 %v3139_v13  ;;  %2877 = vmatprep.subr.bf16.mxu0 %v3140_v14 }
 0xb15   : > { %2856 = vmatpush3.bf16.msra.mxu1 %v3141_v15  ;;  %2878 = vmatpush3.bf16.msra.mxu0 %v3142_v16 }
 0xbcb   : > { %v1959_v30 = vpop.f32.mrb[32].mxu1  ;;  %v2002_v31 = vpop.f32.mrb[12].mxu0 }
 0xbcc   : > { %v1960_v32 = vadd.f32 %v1959_v30, %v1748_v24  ;;  %v2003_v3 = vadd.f32 %v2002_v31, %v1756_v25  ;;  %v1961_v33 = vpop.f32.mrb[33].mxu1  ;;  %v2004_v36 = vpop.f32.mrb[13].mxu0  ;;  %v2763_v30 = vld [vmem:[%s771_s17] ss:$0 sm:$0xff] }
 0xbcd   : > { %v1962_v37 = vadd.f32 %v1961_v33, %v1752_v28  ;;  %v2005_v38 = vadd.f32 %v2004_v36, %v1760_v29  ;;  %v1963_v39 = vpop.f32.mrb[34].mxu1  ;;  %v2006_v40 = vpop.f32.mrb[14].mxu0 }
 0xbce   : > { %v2019_v41 = vmul.f32 0.70710677, %v1960_v32  ;;  %v2021_v42 = vmul.f32 0.70710677, %v2003_v3  ;;  %v1964_v27 = vadd.f32 %v1963_v39, %v1748_v24  ;;  %v2007_v46 = vadd.f32 %v2006_v40, %v1756_v25  ;;  %v1965_v26 = vpop.f32.mrb[35].mxu1  ;;  %v2008_v35 = vpop.f32.mrb[15].mxu0 }
 0xbcf   : > { %v2020_v43 = vmul.f32 0.70710677, %v1962_v37  ;;  %v2022_v44 = vmul.f32 0.70710677, %v2005_v38  ;;  %v1966_v19 = vadd.f32 %v1965_v26, %v1752_v28  ;;  %v2009_v21 = vadd.f32 %v2008_v35, %v1760_v29 }
 0xbd0   : > { %3179 = verf.f32 %v2019_v41  ;;  %v2023_v47 = vmul.f32 0.70710677, %v1964_v27  ;;  %v2025_v48 = vmul.f32 0.70710677, %v2007_v46  ;;  %v2011_v51 = vmul.f32 0.5, %v1960_v32 }
 0xbd1   : > { %3181 = verf.f32 %v2021_v42  ;;  %v2024_v49 = vmul.f32 0.70710677, %v1966_v19  ;;  %v2026_v52 = vmul.f32 0.70710677, %v2009_v21  ;;  %v2013_v59 = vmul.f32 0.5, %v2003_v3 }
 0xbd2   : > { %3183 = verf.f32 %v2020_v43  ;;  %v2012_v23 = vmul.f32 0.5, %v1962_v37  ;;  %v2015_v61 = vmul.f32 0.5, %v1964_v27  ;;  %v2014_v0 = vmul.f32 0.5, %v2005_v38 }
 0xbd3   : > { %3185 = verf.f32 %v2022_v44  ;;  %v2017_v2 = vmul.f32 0.5, %v2007_v46  ;;  %v2016_v8 = vmul.f32 0.5, %v1966_v19  ;;  %v2018_v12 = vmul.f32 0.5, %v2009_v21 }
 0xbd4   : > { %3187 = verf.f32 %v2023_v47 }
 0xbd5   : > { %3189 = verf.f32 %v2025_v48 }
 0xbd6   : > { %3191 = verf.f32 %v2024_v49 }
 0xbd7   : > { %3193 = verf.f32 %v2026_v52 }
 0xbda   : > { %v3180_v6 = vpop.eup %3179 }
 0xbdb   : > { %v3182_v55 = vpop.eup %3181  ;;  %v2035_v58 = vadd.f32 1.0, %v3180_v6 }
 0xbdc   : > { %v3184_v56 = vpop.eup %3183  ;;  %v2037_v60 = vadd.f32 1.0, %v3182_v55 }
 0xbdd   : > { %v3186_v57 = vpop.eup %3185  ;;  %v2036_v45 = vadd.f32 1.0, %v3184_v56  ;;  %v2043_v50 = vmul.f32 %v2035_v58, %v2011_v51 }
 0xbde   : > { %v3188_v34 = vpop.eup %3187  ;;  %v2038_v1 = vadd.f32 1.0, %v3186_v57  ;;  %v2045_v10 = vmul.f32 %v2037_v60, %v2013_v59  ;;  %v2796_v60 = vld [vmem:[%s774_s6] ss:$0 sm:$0xff] }
 0xbdf   : > { %v3190_v22 = vpop.eup %3189  ;;  %v2039_v62 = vadd.f32 1.0, %v3188_v34  ;;  %v2044_v14 = vmul.f32 %v2036_v45, %v2012_v23  ;;  %v2797_v23 = vld [vmem:[%s777_s9] ss:$0 sm:$0xff] }
 0xbe0   : > { %v3192_v63 = vpop.eup %3191  ;;  %v2041_v4 = vadd.f32 1.0, %v3190_v22  ;;  %v2046_v17 = vmul.f32 %v2038_v1, %v2014_v0 }
 0xbe1   : > { %v3194_v5 = vpop.eup %3193  ;;  %v2047_v7 = vmul.f32 %v2039_v62, %v2015_v61  ;;  %v2040_v9 = vadd.f32 1.0, %v3192_v63 }
 0xbe2   : > { %v2049_v11 = vmul.f32 %v2041_v4, %v2017_v2  ;;  %v2042_v13 = vadd.f32 1.0, %v3194_v5 }
 0xbe3   : > { %v2051_v15 = vpack.c.bf16 %v2047_v7, %v2043_v50  ;;  %v2048_v16 = vmul.f32 %v2040_v9, %v2016_v8 }
 0xbe4   : > { %v2053_v18 = vpack.c.bf16 %v2049_v11, %v2045_v10  ;;  %v2050_v20 = vmul.f32 %v2042_v13, %v2018_v12 }
 0xbe5   : > { %v2052_v24 = vpack.c.bf16 %v2048_v16, %v2044_v14 }
 0xbe6   : > { %v2054_v25 = vpack.c.bf16 %v2050_v20, %v2046_v17 }
 0xbe7   : > { %2350 = vmatprep.mubr.bf16.mxu1 %v2052_v24 }
 0xbe8   : > { %2391 = vmatprep.mubr.bf16.mxu0 %v2054_v25  ;;  %2351 = vmatmul.mubr.bf16.vlgmr.msra.gmra.mrb[36].mxu1 %v2051_v15 }
 0xbe9   : > { %2392 = vmatmul.mubr.bf16.vlgmr.msra.gmra.mrb[16].mxu0 %v2053_v18 }
 0xcbb   : > { %v2857_v28 = vpop.f32.mrb[36].mxu1 }
 0xcbc   : > { %v2879_v29 = vpop.f32.mrb[16].mxu0  ;;  %v2858_v31 = vpop.f32.mrb[37].mxu1 }
 0xcbd   : > { %v2859_v32 = vadd.f32 %v2858_v31, %v2857_v28  ;;  %v2880_v3 = vpop.f32.mrb[17].mxu0  ;;  %v2860_v33 = vpop.f32.mrb[38].mxu1 }
 0xcbe   : > { %v2881_v36 = vadd.f32 %v2880_v3, %v2879_v29  ;;  %v2882_v37 = vpop.f32.mrb[18].mxu0  ;;  %v2861_v38 = vpop.f32.mrb[39].mxu1 }
 0xcbf   : > { %v2353_v39 = vadd.f32 %v2859_v32, %v2763_v30  ;;  %v2862_v40 = vadd.f32 %v2861_v38, %v2860_v33  ;;  %v2883_v41 = vpop.f32.mrb[19].mxu0 }
 0xcc0   : > { %v2884_v42 = vadd.f32 %v2883_v41, %v2882_v37 }
 0xcc1   : > { %v2394_v43 = vadd.f32 %v2881_v36, %v2353_v39  ;;  %v2356_v44 = vadd.f32 %v2862_v40, %v2763_v30 }
 0xcc3   : > { %v2397_v27 = vadd.f32 %v2884_v42, %v2356_v44  ;;  %v2400_v46 = vadd.f32 %v2394_v43, %v3683_v53 }
 0xcc5   : > { %2404 = vadd.xlane.f32.xlu1 %v2400_v46  ;;  %v2401_v26 = vadd.f32 %v2397_v27, %v3685_v54 }
 0xcc7   : > { %v2406_v35 = vsel %vm1095_vm3, %v2401_v26, 0.0 }
 0xcc8   : > { %2407 = vadd.xlane.f32.xlu0 %v2406_v35 }
 0xd52   : > { %v2405_v19 = vpop.xlane.xlu1 %2404 }
 0xd53   : > { %v2409_v21 = vmul.f32 0.0078125, %v2405_v19 }
 0xd55   : > { %v2411_v47 = vsub.f32 %v2400_v46, %v2409_v21  ;;  %v2408_v48 = vpop.xlane.xlu0 %2407 }
 0xd56   : > { %v2410_v49 = vmul.f32 0.0078125, %v2408_v48 }
 0xd57   : > { %v2413_v52 = vmul.f32 %v2411_v47, %v2411_v47 }
 0xd58   : > { %v2412_v6 = vsub.f32 %v2401_v26, %v2410_v49 }
 0xd59   : > { %2415 = vadd.xlane.f32.xlu0 %v2413_v52 }
 0xd5a   : > { %v2414_v55 = vmul.f32 %v2412_v6, %v2412_v6 }
 0xd5c   : > { %v2417_v56 = vsel %vm1095_vm3, %v2414_v55, 0.0 }
 0xd5d   : > { %2418 = vadd.xlane.f32.xlu1 %v2417_v56 }
 0xde6   : > { %v2416_v53 = vpop.xlane.xlu0 %2415 }
 0xde7   : > { %v2420_v54 = vmul.f32 0.0078125, %v2416_v53 }
 0xde9   : > { %v2422_v57 = vadd.f32 1e-12, %v2420_v54 }
 0xdea   : > { %v2419_v58 = vpop.xlane.xlu1 %2418 }
 0xdeb   : > { %3195 = vrsqrt.f32 %v2422_v57  ;;  %v2421_v34 = vmul.f32 0.0078125, %v2419_v58 }
 0xded   : > { %v2423_v51 = vadd.f32 1e-12, %v2421_v34 }
 0xdef   : > { %3197 = vrsqrt.f32 %v2423_v51 }
 0xdf5   : > { %v3196_v59 = vpop.eup %3195 }
 0xdf6   : > { %v2426_v22 = vmul.f32 %v3196_v59, %v2411_v47 }
 0xdf8   : > { %v2434_v45 = vmul.f32 %v2796_v60, %v2426_v22 }
 0xdf9   : > { %v3198_v61 = vpop.eup %3197 }
 0xdfa   : > { %v2442_v62 = vadd.f32 %v2797_v23, %v2434_v45  ;;  %v2427_v63 = vmul.f32 %v3198_v61, %v2412_v6 }
 0xdfc   : > { %2444 = vst [vmem:[%s3445_s11] sm:$0xff] %v2442_v62  ;;  %v2435_v0 = vmul.f32 %v2796_v60, %v2427_v63 }
 0xdfe   : > { %v2443_v1 = vadd.f32 %v2797_v23, %v2435_v0 }
 0xe00   : > { %2445 = vst [vmem:[%s3445_s11 + $0x8] sm:$0x3] %v2443_v1 }
 0xe01 PF: > { %s3826_s29 = sld [smem:[#allocation5_spill]]  ;;  %s3827_s21 = sld [smem:[#allocation3_spill]] }
 0xe02   : > { %s3828_s22 = sld [smem:[#allocation4_spill]]  ;;  %s3829_s23 = sld [smem:[#allocation6_spill]] }
 0xe03   : > { %s3830_s24 = sld [smem:[#allocation7_spill]] }
 0xe07   : > { %s26_s25 = sadd.s32 1, %s3826_s29  }
 0xe08   : > { %p23_p8 = scmp.ge.s32.totalorder %s26_s25, 6  }
 0xe0a   :  { %25 = sbr.rel (!%p23_p8) target bundleno = 13 (0xd), region = 163 }

</bundles_post_ra>
